<compile_context>
chip_gen: v7x
topology: tpu7x:2x2x1
jax: 0.10.0
libtpu: 0.0.40
codegen_flags: <defaults>
</compile_context>

<pallas_src>
import jax
import jax.numpy as jnp
from jax.experimental import pallas as pl
from jax.experimental.pallas import tpu as pltpu

HIDDEN_DIM = 128
HIDDEN_LAYERS = 3

_SUBLANE = 8
_LANES = 128
_TARGET_BLOCK_BYTES = 2 << 20      # ~2 MiB per input block (x2 inputs x2 bufs ~ 8 MiB VMEM)
_MIN_KERNEL_ROWS = 512             # below this (or < 1 MiB total) plain XLA wins
_MIN_KERNEL_BYTES = 1 << 20


# ----------------------------------------------------------------------------
# Kernel: per batch-tile affine map  out = e1 @ W1_blk + e2 @ W2_blk + b
# ----------------------------------------------------------------------------
def mi_probe_kernel(e1_ref, e2_ref, w1_ref, w2_ref, b_ref, out_ref):
    # e1_ref, e2_ref : [TB, EP]  native dtype (VMEM, pipelined over batch grid)
    # w1_ref, w2_ref : [EP, P]   f32 block-diagonal effective weights (resident)
    # b_ref          : [1, 1]    f32 scalar bias (SMEM)
    # out_ref        : [TB, P]   f32
    #
    # NOTE: a partial last batch block reads padded/garbage rows; that is safe
    # only because every output row depends solely on its own input row and
    # out-of-range output rows are masked on store.  Keep this strictly
    # row-wise (no cross-row reduction) if refactoring.
    e1 = e1_ref[...].astype(jnp.float32)          # in-kernel cast: stream native dtype
    e2 = e2_ref[...].astype(jnp.float32)
    acc = jnp.dot(e1, w1_ref[...],
                  preferred_element_type=jnp.float32,
                  precision=jax.lax.Precision.HIGHEST)
    acc = acc + jnp.dot(e2, w2_ref[...],
                        preferred_element_type=jnp.float32,
                        precision=jax.lax.Precision.HIGHEST)
    out_ref[...] = (acc + b_ref[0, 0]).astype(out_ref.dtype)


# ----------------------------------------------------------------------------
# Parameter init (matches torch module layout, stored as [in, out])
# ----------------------------------------------------------------------------
def init_params(key, emb_dim, hidden_dim=HIDDEN_DIM, hidden_layers_num=HIDDEN_LAYERS):
    def xavier(k, fan_in, fan_out):
        std = (2.0 / (fan_in + fan_out)) ** 0.5
        return jax.random.normal(k, (fan_in, fan_out), dtype=jnp.float32) * std

    ks = jax.random.split(key, 2 * (hidden_layers_num + 2))
    i = 0
    w1 = xavier(ks[i], emb_dim * 2, hidden_dim); i += 1
    b1 = jax.random.uniform(ks[i], (1, hidden_dim), minval=-0.01, maxval=0.01); i += 1
    wh_list, bh_list = [], []
    for _ in range(hidden_layers_num):
        wh_list.append(xavier(ks[i], hidden_dim, hidden_dim)); i += 1
        bh_list.append(jax.random.uniform(ks[i], (1, hidden_dim), minval=-0.01, maxval=0.01)); i += 1
    wh = jnp.stack(wh_list, axis=0)          # [L, H, H]
    bh = jnp.stack(bh_list, axis=0)          # [L, 1, H]
    wf = xavier(ks[i], hidden_dim, 1); i += 1
    bf = jax.random.uniform(ks[i], (1, 1), minval=-0.01, maxval=0.01); i += 1
    return dict(w1=w1, b1=b1, wh=wh, bh=bh, wf=wf, bf=bf)


# ----------------------------------------------------------------------------
# Wrapper helpers
# ----------------------------------------------------------------------------
def _collapse(params):
    """Fold the purely-linear layer chain into a single affine map (tiny, f32)."""
    w = params["w1"].astype(jnp.float32)                 # [2E, H]
    b = params["b1"].astype(jnp.float32)                 # [1,  H]
    for l in range(params["wh"].shape[0]):
        b = b @ params["wh"][l] + params["bh"][l]
        w = w @ params["wh"][l]
    w_eff = w @ params["wf"]                             # [2E, 1]
    b_eff = b @ params["wf"] + params["bf"]              # [1,  1]
    return w_eff, b_eff


def _affine_xla(e1, e2, w1, w2, b_eff):
    """Folded affine map in plain XLA (small-batch / tail fallback)."""
    e1 = e1.astype(jnp.float32)
    e2 = e2.astype(jnp.float32)
    return e1 @ w1 + e2 @ w2 + b_eff[0, 0]


def _block_weight(w_col, pack):
    """(E,) -> (E*pack, pack) block-diagonal so (row-packed x) @ W_blk yields
    one dot product per original row."""
    w_col = w_col.astype(jnp.float32).reshape(-1, 1)
    if pack == 1:
        return w_col
    return jnp.kron(jnp.eye(pack, dtype=jnp.float32), w_col)


def _choose_batch_tile(n_rows, row_bytes):
    """Rows per batch block: ~_TARGET_BLOCK_BYTES per input block (amortizes the
    ~0.35 us per-grid-step cost) but capped so the grid keeps >= ~8 steps, so
    the "parallel" axis shards across both v7x TensorCores and each core still
    has steps to pipeline."""
    tile = min(_TARGET_BLOCK_BYTES // max(row_bytes, 1), max(1, n_rows // 8))
    tile = max(_SUBLANE, (tile // _SUBLANE) * _SUBLANE)
    if tile >= n_rows:
        return n_rows                  # single full block (equal-to-dim is always legal)
    return tile


# ----------------------------------------------------------------------------
# Forward
# ----------------------------------------------------------------------------
def mi_probe_forward(emb1, emb2, params):
    B, E = emb1.shape
    assert emb2.shape == (B, E)

    w_eff, b_eff = _collapse(params)              # [2E, 1] f32, [1, 1] f32
    w1 = w_eff[:E, 0]                             # weights hitting emb1
    w2 = w_eff[E:, 0]                             # weights hitting emb2

    total_bytes = 2 * B * E * emb1.dtype.itemsize
    if B < _MIN_KERNEL_ROWS or total_bytes < _MIN_KERNEL_BYTES:
        # Tiny problem: kernel launch / pipeline warmup is not worth it.
        return _affine_xla(emb1, emb2, w1, w2, b_eff)

    # Lane-dense packing: view (B, E) as (B//P, E*P) with E*P == 128 so each
    # vreg carries 128 useful lanes (free, row-major-contiguous reshape).
    pack = _LANES // E if (E <= _LANES and _LANES % E == 0) else 1
    b_main = (B // pack) * pack
    n_rows, ep = b_main // pack, E * pack

    e1m = emb1[:b_main].reshape(n_rows, ep)
    e2m = emb2[:b_main].reshape(n_rows, ep)
    w1_blk = _block_weight(w1, pack)              # [EP, P]
    w2_blk = _block_weight(w2, pack)              # [EP, P]

    tile = _choose_batch_tile(n_rows, ep * emb1.dtype.itemsize)
    grid = (pl.cdiv(n_rows, tile),)

    out_main = pl.pallas_call(
        mi_probe_kernel,
        out_shape=jax.ShapeDtypeStruct((n_rows, pack), jnp.float32),
        grid=grid,
        in_specs=[
            pl.BlockSpec((tile, ep), lambda i: (i, 0)),              # emb1 tile
            pl.BlockSpec((tile, ep), lambda i: (i, 0)),              # emb2 tile
            pl.BlockSpec((ep, pack), lambda i: (0, 0)),              # W1 (VMEM-resident)
            pl.BlockSpec((ep, pack), lambda i: (0, 0)),              # W2 (VMEM-resident)
            pl.BlockSpec(memory_space=pltpu.MemorySpace.SMEM),       # scalar bias
        ],
        out_specs=pl.BlockSpec((tile, pack), lambda i: (i, 0)),
        compiler_params=pltpu.CompilerParams(
            dimension_semantics=("parallel",)),
    )(e1m, e2m, w1_blk, w2_blk, b_eff)
    out = out_main.reshape(b_main)                                   # free (row-major)

    if b_main != B:
        # < pack leftover rows: compute them with the folded map in XLA.
        out_tail = _affine_xla(emb1[b_main:], emb2[b_main:], w1, w2, b_eff)
        out = jnp.concatenate([out, out_tail], axis=0)
    return out                                                       # [B] == squeeze(-1)


# ----------------------------------------------------------------------------
# Pure-JAX reference (mirrors the torch forward exactly, layer by layer)
# ----------------------------------------------------------------------------
def mi_probe_reference(emb1, emb2, params):
    x = jnp.concatenate([emb1, emb2], axis=-1).astype(jnp.float32)
    h = x @ params["w1"] + params["b1"]
    for l in range(params["wh"].shape[0]):
        h = h @ params["wh"][l] + params["bh"][l]
    out = h @ params["wf"] + params["bf"]
    return out[..., 0]


if __name__ == "__main__":
    key = jax.random.PRNGKey(0)
    keys = jax.random.split(key, 9)

    # --- E = 32: packed lane-dense path (P = 4) -------------------------------
    EMB_DIM = 32
    params = init_params(keys[0], EMB_DIM)

    # Case 1: tiny batch -> plain-XLA fallback path.
    B0 = 8
    e1 = jax.random.normal(keys[1], (B0, EMB_DIM), dtype=jnp.float32)
    e2 = jax.random.normal(keys[2], (B0, EMB_DIM), dtype=jnp.float32)
    out0 = jax.block_until_ready(mi_probe_forward(e1, e2, params))
    ref0 = mi_probe_reference(e1, e2, params)
    assert out0.shape == (B0,), out0.shape
    assert jnp.allclose(out0, ref0, atol=2e-4, rtol=2e-4)

    # Case 2: f32 inputs, multi-step pipelined grid, packed P = 4.
    B1 = 8192
    e1 = jax.random.normal(keys[3], (B1, EMB_DIM), dtype=jnp.float32)
    e2 = jax.random.normal(keys[4], (B1, EMB_DIM), dtype=jnp.float32)
    out1 = jax.block_until_ready(mi_probe_forward(e1, e2, params))
    ref1 = mi_probe_reference(e1, e2, params)
    assert out1.shape == (B1,), out1.shape
    assert jnp.allclose(out1, ref1, atol=2e-4, rtol=2e-4)

    # Case 3: bf16 inputs (in-kernel cast), B not divisible by pack (tail path).
    B2 = 8195
    e1 = jax.random.normal(keys[5], (B2, EMB_DIM), dtype=jnp.float32).astype(jnp.bfloat16)
    e2 = jax.random.normal(keys[6], (B2, EMB_DIM), dtype=jnp.float32).astype(jnp.bfloat16)
    out2 = jax.block_until_ready(mi_probe_forward(e1, e2, params))
    ref2 = mi_probe_reference(e1, e2, params)
    assert out2.shape == (B2,), out2.shape
    assert jnp.allclose(out2, ref2, atol=2e-4, rtol=2e-4)

    # --- E = 256: general (already lane-dense) path, P = 1 --------------------
    EMB_DIM2 = 256
    params2 = init_params(keys[7], EMB_DIM2)
    B3 = 2048
    e1 = jax.random.normal(keys[8], (B3, EMB_DIM2), dtype=jnp.float32)
    e2 = jax.random.normal(keys[0], (B3, EMB_DIM2), dtype=jnp.float32)
    out3 = jax.block_until_ready(mi_probe_forward(e1, e2, params2))
    ref3 = mi_probe_reference(e1, e2, params2)
    assert out3.shape == (B3,), out3.shape
    assert jnp.allclose(out3, ref3, atol=2e-4, rtol=2e-4)

    print("KERNEL_OK")
</pallas_src>

<mosaic_0001>
module attributes {stable_mosaic.version = 11 : i64} {
  func.func @mi_probe_kernel(%arg0: i32, %arg1: memref<256x128xf32, #tpu.memory_space<vmem>>, %arg2: memref<256x128xf32, #tpu.memory_space<vmem>>, %arg3: memref<128x4xf32, #tpu.memory_space<vmem>>, %arg4: memref<128x4xf32, #tpu.memory_space<vmem>>, %arg5: memref<1x1xf32, #tpu.memory_space<smem>>, %arg6: memref<256x4xf32, #tpu.memory_space<vmem>>) attributes {dimension_semantics = [#tpu.dimension_semantics<parallel>], iteration_bounds = array<i64: 8>, scalar_prefetch = 0 : i64, scratch_operands = 0 : i64, tpu.core_type = #tpu.core_type<tc>, window_params = [{transform_indices = @transform_0, window_bounds = array<i64: 256, 128>}, {transform_indices = @transform_1, window_bounds = array<i64: 256, 128>}, {pipeline_mode = #tpu.pipeline_mode<synchronous>, transform_indices = @transform_2, window_bounds = array<i64: 128, 4>}, {pipeline_mode = #tpu.pipeline_mode<synchronous>, transform_indices = @transform_3, window_bounds = array<i64: 128, 4>}, {transform_indices = @transform_4, window_bounds = array<i64: 1, 1>}, {transform_indices = @transform_5, window_bounds = array<i64: 256, 4>}]} {
    %c0 = arith.constant 0 : index
    %c0_0 = arith.constant 0 : index
    %0 = vector.load %arg1[%c0, %c0_0] : memref<256x128xf32, #tpu.memory_space<vmem>>, vector<256x128xf32>
    %c0_1 = arith.constant 0 : index
    %c0_2 = arith.constant 0 : index
    %1 = vector.load %arg2[%c0_1, %c0_2] : memref<256x128xf32, #tpu.memory_space<vmem>>, vector<256x128xf32>
    %c0_3 = arith.constant 0 : index
    %c0_4 = arith.constant 0 : index
    %2 = vector.load %arg3[%c0_3, %c0_4] : memref<128x4xf32, #tpu.memory_space<vmem>>, vector<128x4xf32>
    %cst = arith.constant dense<0.000000e+00> : vector<256x4xf32>
    %3 = tpu.matmul %0, %2, %cst {dimension_numbers = #tpu.dot_dimension_numbers<[1], [0], [0], [1], [0, 0, 1, 1], [], []>, precision = #tpu.contract_precision<fp32>} : vector<256x128xf32>, vector<128x4xf32>, vector<256x4xf32> -> vector<256x4xf32>
    %c0_5 = arith.constant 0 : index
    %c0_6 = arith.constant 0 : index
    %4 = vector.load %arg4[%c0_5, %c0_6] : memref<128x4xf32, #tpu.memory_space<vmem>>, vector<128x4xf32>
    %cst_7 = arith.constant dense<0.000000e+00> : vector<256x4xf32>
    %5 = tpu.matmul %1, %4, %cst_7 {dimension_numbers = #tpu.dot_dimension_numbers<[1], [0], [0], [1], [0, 0, 1, 1], [], []>, precision = #tpu.contract_precision<fp32>} : vector<256x128xf32>, vector<128x4xf32>, vector<256x4xf32> -> vector<256x4xf32>
    %6 = arith.addf %3, %5 : vector<256x4xf32>
    %c0_8 = arith.constant 0 : index
    %c0_9 = arith.constant 0 : index
    %7 = memref.load %arg5[%c0_8, %c0_9] : memref<1x1xf32, #tpu.memory_space<smem>>
    %8 = vector.broadcast %7 : f32 to vector<256x4xf32>
    %9 = arith.addf %6, %8 : vector<256x4xf32>
    %c0_10 = arith.constant 0 : index
    %c0_11 = arith.constant 0 : index
    %10 = vector.load %arg6[%c0_10, %c0_11] : memref<256x4xf32, #tpu.memory_space<vmem>>, vector<256x4xf32>
    tpu.vector_store %arg6[%c0_10, %c0_11], %9 {strides = array<i32>} : memref<256x4xf32, #tpu.memory_space<vmem>>, vector<256x4xf32>,
    return
  }
  func.func @transform_0(%arg0: i32) -> (i32, i32) {
    %c0_i32 = arith.constant 0 : i32
    %c0_i32_0 = arith.constant 0 : i32
    return %arg0, %c0_i32 : i32, i32
  }
  func.func @transform_1(%arg0: i32) -> (i32, i32) {
    %c0_i32 = arith.constant 0 : i32
    %c0_i32_0 = arith.constant 0 : i32
    return %arg0, %c0_i32 : i32, i32
  }
  func.func @transform_2(%arg0: i32) -> (i32, i32) {
    %c0_i32 = arith.constant 0 : i32
    %c0_i32_0 = arith.constant 0 : i32
    %c0_i32_1 = arith.constant 0 : i32
    return %c0_i32, %c0_i32_0 : i32, i32
  }
  func.func @transform_3(%arg0: i32) -> (i32, i32) {
    %c0_i32 = arith.constant 0 : i32
    %c0_i32_0 = arith.constant 0 : i32
    %c0_i32_1 = arith.constant 0 : i32
    return %c0_i32, %c0_i32_0 : i32, i32
  }
  func.func @transform_4(%arg0: i32) -> (i32, i32) {
    %c0_i32 = arith.constant 0 : i32
    %c0_i32_0 = arith.constant 0 : i32
    %c0_i32_1 = arith.constant 0 : i32
    return %c0_i32, %c0_i32_0 : i32, i32
  }
  func.func @transform_5(%arg0: i32) -> (i32, i32) {
    %c0_i32 = arith.constant 0 : i32
    %c0_i32_0 = arith.constant 0 : i32
    return %arg0, %c0_i32 : i32, i32
  }
}

</mosaic_0001>

<bundles_post_ra>
// kernel: tpu_custom_call.1
= control target key start
LH: loop header
LB: loop body
LE: loop exit
PB: predicated region body
PF: predicated region fallthrough
CT: control target
= control target key end

     0   :  { %s9089_s0 = inlined_call_operand.hbm [shape: f32[2048,128], index: 0, kind: input, shape index: {}]   ;;  %s9090_s1 = inlined_call_operand.hbm [shape: f32[2048,128], index: 1, kind: input, shape index: {}]   ;;  %s9091_s2 = inlined_call_operand.vmem [shape: f32[128,4], index: 2, kind: input, shape index: {}]   ;;  %s9092_s3 = inlined_call_operand.vmem [shape: f32[128,4], index: 3, kind: input, shape index: {}]   ;;  %s9093_s4 = inlined_call_operand.<no memory space> [shape: f32[1,1], index: 4, kind: input, shape index: {}]   ;;  %s9094_s5 = inlined_call_operand.vmem [shape: f32[2048,4], index: 5, kind: output, shape index: {}]  }
   0x1   :  { %10 = sst [smem:[#allocation2]] %s9093_s4 }
   0x2   :  { %11 = vsyncpa [#allocation4], 0 }
   0x3   :  { %13 = vsyncpa [#allocation4 + $0x1], 0 }
   0x4   :  { %14 = vsyncpa [#allocation6], 0 }
   0x5   :  { %16 = vsyncpa [#allocation6 + $0x1], 0  ;;  %s6972_s20 = smov 0   ;;  %s6974_s21 = smov 0  }
   0x6   :  { %s6976_s22 = smov 0   ;;  %s6978_s23 = smov 0  }
   0x7 LB: > { %s4490_s4 = sadd.s32 4294967295, %s6933_s23   ;;  %s6992_s24 = sadd.s32 1, %s6933_s23   ;;  %s6933_s23 = sphi %s6978_s23, %s10063_s23   ;;  %s6929_s22 = sphi %s6976_s22, %s10062_s22   ;;  %s6925_s21 = sphi %s6974_s21, %s10061_s21   ;;  %s6921_s20 = sphi %s6972_s20, %s10060_s20  }
   0x8   : > { %s26_s25 = ssub.s32 %s6933_s23, %s6992_s24  ;;  %s29_s26 = sadd.s32 1, %s6929_s22 }
   0x9   : > { %p27_p0 = scmp.eq.s32.totalorder %s26_s25, 0  ;;  %p36_p1 = scmp.ne.s32.totalorder %s6929_s22, %s6925_s21 }
   0xa   : > { %p37_p2 = scmp.eq.s32.totalorder %s6933_s23, 0  ;;  %p42_p3 = scmp.ne.s32.totalorder %s6925_s21, %s6921_s20 }
   0xb   : > { %s7002_s27 = scalar_select %p27_p0, %s6929_s22, %s29_s26  }
   0xc   : > { %p38_p4 = por %p37_p2, %p36_p1  ;;  %p43_p5 = scmp.eq.s32.totalorder %s4490_s4, 0 }
   0xd   : > { %p6792_p6 = scmp.lt.s32.totalorder %s6933_s23, 8  ;;  %s7012_s29 = sand.u32 1, %s6929_s22  }
   0xe   : > { %p7007_p7 = por %p43_p5, %p42_p3  ;;  %s4494_s30 = sshll.u32 %s7012_s29, 8 }
   0xf   : > { %s4507_s6 = sshll.u32 %s6933_s23, 12  ;;  %s194_s10 = scalar_lea.vmem [#allocation3], %s4494_s30 }
  0x10   : > { %s9494_s28 = scalar_select %p7007_p7, 1, 0 }
  0x11   : > { %s7021_s9 = scalar_lea.hbm %s9089_s0, %s4507_s6  ;;  %s201_s11 = sshll.u32 %s194_s10, 4  ;;  %s7025_s11 = int_to_ptr.vmem [resolvable:$true] %s201_s11 }
  0x12   : > { %p7027_p8 = pnand %p6792_p6, %p38_p4  ;;  %s191_s13 = scalar_lea.sflag [#allocation4], %s7012_s29 }
  0x13   : > { %s6835_s14 = scalar_lea.hbm %s7021_s9, 4096  ;;  %s6840_s17 = scalar_lea.hbm %s9089_s0, 32768 }
  0x14   : > { %p6836_p10 = scmp.ne.s32.totalorder %s7021_s9, %s6835_s14  ;;  %p6837_p11 = pneg %p7027_p8 }
  0x15   : > { %p6841_p0 = scmp.lt.u32.totalorder %s7021_s9, %s9089_s0  ;;  %p6842_p1 = scmp.lt.u32.totalorder %s6840_s17, %s6835_s14 }
  0x16   : > { %p6838_p12 = pnand %p6837_p11, %p6836_p10  ;;  %p6844_p3 = scmp.lt.u32.totalorder %s6835_s14, %s7021_s9 }
  0x17   : > { %p6843_p2 = por %p6842_p1, %p6841_p0 }
  0x18   : > { %p6839_p13 = pneg %p6838_p12 }
  0x19   : > { %p6845_p4 = por %p6844_p3, %p6843_p2 }
  0x1b   : > { %p6846_p5 = pnand %p6845_p4, %p6839_p13 }
  0x1d   : > { %6849 = shalt.err (!%p6846_p5)
}
  0x1e   : > { %s6850_s20 = scalar_lea.vmem %s7025_s11, 4096  ;;  %s6935_s25 = smov [#allocation3]  }
  0x1f   : > { %p6851_p6 = scmp.ne.s32.totalorder %s7025_s11, %s6850_s20  ;;  %s6855_s26 = sshll.u32 %s6935_s25, 4  ;;  %s6856_s26 = int_to_ptr.vmem [resolvable:$false] %s6855_s26 }
  0x20   : > { %s6857_s7 = scalar_lea.vmem %s6856_s26, 8192  ;;  %p6858_p9 = scmp.lt.s32.totalorder %s7025_s11, %s6856_s26 }
  0x21   : > { %p6853_p10 = pnand %p6851_p6, %p6837_p11  ;;  %p6859_p0 = scmp.lt.s32.totalorder %s6857_s7, %s6850_s20 }
  0x23   : > { %p6854_p12 = pneg %p6853_p10  ;;  %p6860_p1 = por %p6859_p0, %p6858_p9 }
  0x25   : > { %p6861_p2 = pnand %p6860_p1, %p6854_p12 }
  0x27   : > { %6864 = shalt.err (!%p6861_p2)
}
  0x28   : > { %s6936_s8 = smov 128   ;;  %s6937_s10 = smov 8  }
  0x29   : > { %6788 = dma.hbm_to_vmem [thread:$0]  (!%p7027_p8), %s7021_s9, 4096, %s7025_s11, %s191_s13, %s6936_s8, %s6936_s8, %s6937_s10  }
  0x2a   : > { %p230_p9 = scmp.lt.s32.totalorder %s6933_s23, 9  ;;  %s7069_s16 = scalar_lea.hbm %s9090_s1, %s4507_s6 }
  0x2b   : > { %p9496_p13 = scmp.ge.s32.totalorder %s6933_s23, 1  ;;  %s215_s18 = scalar_lea.vmem [#allocation5], %s4494_s30 }
  0x2c   : > { %s222_s19 = sshll.u32 %s215_s18, 4  ;;  %s212_s9 = scalar_lea.sflag [#allocation6], %s7012_s29  ;;  %s7079_s19 = int_to_ptr.vmem [resolvable:$true] %s222_s19 }
  0x2d   : > { %p7073_p3 = pnand %p9496_p13, %p230_p9  ;;  %s6865_s11 = scalar_lea.hbm %s7069_s16, 4096 }
  0x2e   : > { %p6866_p4 = scmp.ne.s32.totalorder %s7069_s16, %s6865_s11  ;;  %s6870_s20 = scalar_lea.hbm %s9090_s1, 32768 }
  0x2f   : > { %p6871_p10 = scmp.lt.u32.totalorder %s7069_s16, %s9090_s1  ;;  %p6872_p12 = scmp.lt.u32.totalorder %s6870_s20, %s6865_s11 }
  0x30   : > { %p6868_p5 = pnand %p6866_p4, %p6837_p11  ;;  %p6874_p1 = scmp.lt.u32.totalorder %s6865_s11, %s7069_s16 }
  0x31   : > { %p6873_p0 = por %p6872_p12, %p6871_p10 }
  0x32   : > { %p6869_p6 = pneg %p6868_p5 }
  0x33   : > { %p6875_p2 = por %p6874_p1, %p6873_p0 }
  0x35   : > { %p6876_p9 = pnand %p6875_p2, %p6869_p6 }
  0x37   : > { %6879 = shalt.err (!%p6876_p9)
}
  0x38   : > { %s6880_s30 = scalar_lea.vmem %s7079_s19, 4096  ;;  %s6938_s7 = smov [#allocation5]  }
  0x39   : > { %p6881_p13 = scmp.ne.s32.totalorder %s7079_s19, %s6880_s30  ;;  %s6885_s14 = sshll.u32 %s6938_s7, 4  ;;  %s6886_s14 = int_to_ptr.vmem [resolvable:$false] %s6885_s14 }
  0x3a   : > { %s6887_s15 = scalar_lea.vmem %s6886_s14, 8192  ;;  %p6888_p7 = scmp.lt.s32.totalorder %s7079_s19, %s6886_s14 }
  0x3b   : > { %p6883_p4 = pnand %p6881_p13, %p6837_p11  ;;  %p6889_p10 = scmp.lt.s32.totalorder %s6887_s15, %s6880_s30 }
  0x3d   : > { %p6884_p5 = pneg %p6883_p4  ;;  %p6890_p12 = por %p6889_p10, %p6888_p7 }
  0x3f   : > { %p6891_p0 = pnand %p6890_p12, %p6884_p5 }
  0x41   : > { %6894 = shalt.err (!%p6891_p0)
}
  0x42   : > { %6791 = dma.hbm_to_vmem [thread:$0]  (!%p7027_p8), %s7069_s16, 4096, %s7079_s19, %s212_s9, %s6936_s8, %s6936_s8, %s6937_s10  }
  0x43   : > { %234 = sbr.rel (%p7073_p3) target bundleno = 762 (0x2fa), region = 40 }
  0x4a   : > { %s236_s18 = sand.u32 1, %s6925_s21   ;;  %p9498_p7 = scmp.ne.s32.totalorder %s9494_s28, 0 }
  0x4b   : > { %s4501_s11 = sshll.u32 %s236_s18, 8  ;;  %s237_s6 = scalar_lea.sflag [#allocation4], %s236_s18 }
  0x4c   : > { %s7113_s13 = scalar_lea.vmem [#allocation3], %s4501_s11 }
  0x4d   : > { %6912 = dma.done.wait (%p9498_p7), %s237_s6, 4096  }
  0x4e   : > { %6914 = vsyncadd (%p9498_p7), %s237_s6, 4294963200  ;;  %s246_s29 = scalar_lea.sflag [#allocation6], %s236_s18  ;;  %s7119_s12 = scalar_lea.vmem [#allocation5], %s4501_s11 }
  0x4f   : > { %6916 = dma.done.wait (%p9498_p7), %s246_s29, 4096  }
  0x50   : > { %6918 = vsyncadd (%p9498_p7), %s246_s29, 4294963200  ;;  %v7128_v0 = vld [vmem:[%s9092_s3] sm:$0xff]  ;;  %v7133_v1 = vld [vmem:[%s9092_s3 + $0x8] sm:$0xff]  ;;  %s4333_s20 = sld [smem:[#allocation2]]  ;;  %vm4367_vm0 = vcmask 31744  }
  0x51   : > { %v7138_v2 = vld [vmem:[%s9091_s2] sm:$0xff]  ;;  %v386_v3 = vand.u32 4294901760, %v7128_v0  ;;  %v389_v4 = vand.u32 4294901760, %v7133_v1  ;;  %v7145_v5 = vld [vmem:[%s9091_s2 + $0x8] sm:$0xff]  ;;  %v7151_v7 = vld [vmem:[%s9092_s3 + $0x10] sm:$0xff] }
  0x52   : > { %v2360_v6 = vand.u32 4294901760, %v7138_v2  ;;  %v7156_v8 = vld [vmem:[%s9092_s3 + $0x18] sm:$0xff]  ;;  %v9118_v9 = vand.u32 4294901760, %v7145_v5  ;;  %v9115_v10 = vand.u32 4294901760, %v7151_v7  ;;  %v7164_v12 = vld [vmem:[%s9091_s2 + $0x10] sm:$0xff]  ;;  %v7174_v14 = vld [vmem:[%s9092_s3 + $0x20] sm:$0xff] }
  0x53   : > { %v9114_v11 = vand.u32 4294901760, %v7156_v8  ;;  %v7169_v13 = vld [vmem:[%s9091_s2 + $0x18] sm:$0xff]  ;;  %v7180_v15 = vpack.c.bf16 %v389_v4, %v386_v3  ;;  %v9113_v16 = vand.u32 4294901760, %v7164_v12  ;;  %v7187_v18 = vld [vmem:[%s9092_s3 + $0x28] sm:$0xff]  ;;  %v9109_v19 = vand.u32 4294901760, %v7174_v14  ;;  %v7193_v20 = vld [vmem:[%s9091_s2 + $0x20] sm:$0xff] }
  0x54   : > { %v9110_v17 = vand.u32 4294901760, %v7169_v13  ;;  %v7198_v21 = vld [vmem:[%s9091_s2 + $0x28] sm:$0xff]  ;;  %v7204_v22 = vpack.c.bf16 %v9118_v9, %v2360_v6  ;;  %v9108_v24 = vand.u32 4294901760, %v7187_v18  ;;  %v9107_v25 = vand.u32 4294901760, %v7193_v20  ;;  %v7217_v26 = vld [vmem:[%s9092_s3 + $0x30] sm:$0xff]  ;;  %v7222_v27 = vld [vmem:[%s9092_s3 + $0x38] sm:$0xff] }
  0x55   : > { %9499 = vst [vmem:[#allocation9_spill] sm:$0xff] %v7180_v15  ;;  %v7210_v23 = vpack.c.bf16 %v9114_v11, %v9115_v10  ;;  %v7227_v28 = vld [vmem:[%s9091_s2 + $0x30] sm:$0xff]  ;;  %6046 = vmatprep.subr.bf16.mxu1 %v7180_v15  ;;  %v9106_v30 = vand.u32 4294901760, %v7198_v21  ;;  %v9105_v31 = vand.u32 4294901760, %v7217_v26  ;;  %v9100_v32 = vand.u32 4294901760, %v7222_v27  ;;  %v7242_v33 = vld [vmem:[%s9091_s2 + $0x38] sm:$0xff] }
  0x56   : > { %9500 = vst [vmem:[#allocation10_spill] sm:$0xff] %v7204_v22  ;;  %v7234_v29 = vpack.c.bf16 %v9110_v17, %v9113_v16  ;;  %v7247_v34 = vld [vmem:[%s9092_s3 + $0x40] sm:$0xff]  ;;  %v7252_v35 = vld [vmem:[%s9092_s3 + $0x48] sm:$0xff]  ;;  %6238 = vmatprep.subr.bf16.mxu0 %v7204_v22  ;;  %6048 = vmatpush3.bf16.msra.mxu1 %v7180_v15  ;;  %v7260_v36 = vpack.c.bf16 %v9108_v24, %v9109_v19  ;;  %v9099_v37 = vand.u32 4294901760, %v7227_v28  ;;  %v9098_v38 = vand.u32 4294901760, %v7242_v33  ;;  %v7278_v42 = vld [vmem:[%s9092_s3 + $0x50] sm:$0xff] }
  0x57   : > { %9501 = vst [vmem:[#allocation11_spill] sm:$0xff] %v7210_v23  ;;  %v9097_v39 = vand.u32 4294901760, %v7247_v34  ;;  %v7268_v40 = vld [vmem:[%s9091_s2 + $0x40] sm:$0xff]  ;;  %v7273_v41 = vld [vmem:[%s9091_s2 + $0x48] sm:$0xff]  ;;  %6240 = vmatpush3.bf16.msra.mxu0 %v7204_v22  ;;  %6050 = vmatprep.subr.bf16.mxu1 %v7210_v23  ;;  %v7286_v43 = vpack.c.bf16 %v9106_v30, %v9107_v25  ;;  %v7292_v44 = vpack.c.bf16 %v9100_v32, %v9105_v31  ;;  %v9096_v45 = vand.u32 4294901760, %v7252_v35  ;;  %v7299_v47 = vld [vmem:[%s9092_s3 + $0x58] sm:$0xff] }
  0x58   : > { %9502 = vst [vmem:[#allocation12_spill] sm:$0xff] %v7234_v29  ;;  %9503 = vst [vmem:[#allocation13_spill] sm:$0xff] %v7260_v36  ;;  %v9102_v46 = vand.u32 4294901760, %v7268_v40  ;;  %v7304_v48 = vld [vmem:[%s9091_s2 + $0x50] sm:$0xff]  ;;  %v7309_v49 = vld [vmem:[%s9091_s2 + $0x58] sm:$0xff]  ;;  %6242 = vmatprep.subr.bf16.mxu0 %v7234_v29  ;;  %v7316_v50 = vpack.c.bf16 %v9098_v38, %v9099_v37  ;;  %v9101_v51 = vand.u32 4294901760, %v7273_v41 }
  0x59   : > { %9504 = vst [vmem:[#allocation14_spill] sm:$0xff] %v7286_v43  ;;  %9505 = vst [vmem:[#allocation15_spill] sm:$0xff] %v7292_v44  ;;  %v9104_v52 = vand.u32 4294901760, %v7278_v42  ;;  %v9103_v53 = vand.u32 4294901760, %v7299_v47  ;;  %v7324_v54 = vld [vmem:[%s9092_s3 + $0x60] sm:$0xff]  ;;  %v7329_v55 = vld [vmem:[%s9092_s3 + $0x68] sm:$0xff]  ;;  %v7340_v57 = vpack.c.bf16 %v9096_v45, %v9097_v39 }
  0x5a   : > { %9506 = vst [vmem:[#allocation16_spill] sm:$0xff] %v7316_v50  ;;  %v7334_v56 = vld [vmem:[%s9091_s2 + $0x60] sm:$0xff]  ;;  %v9112_v58 = vand.u32 4294901760, %v7304_v48  ;;  %v9111_v59 = vand.u32 4294901760, %v7309_v49  ;;  %v9117_v60 = vand.u32 4294901760, %v7324_v54  ;;  %v7348_v61 = vld [vmem:[%s9091_s2 + $0x68] sm:$0xff]  ;;  %6052 = vmatpush3.bf16.msra.mxu1 %v7210_v23  ;;  %v7365_v45 = vpack.c.bf16 %v9101_v51, %v9102_v46 }
  0x5b   : > { %9507 = vst [vmem:[#allocation17_spill] sm:$0xff] %v7340_v57  ;;  %v7353_v62 = vld [vmem:[%s9092_s3 + $0x70] sm:$0xff]  ;;  %v7358_v63 = vld [vmem:[%s9092_s3 + $0x78] sm:$0xff]  ;;  %v7371_v39 = vpack.c.bf16 %v9103_v53, %v9104_v52  ;;  %v9116_v38 = vand.u32 4294901760, %v7329_v55  ;;  %v9124_v37 = vand.u32 4294901760, %v7334_v56  ;;  %v321_v46 = vld [vmem:[%s7119_s12] sm:$0xff]  ;;  %6244 = vmatpush3.bf16.msra.mxu0 %v7234_v29  ;;  %6054 = vmatprep.subr.bf16.mxu1 %v7260_v36 }
  0x5c   : > { %9508 = vst [vmem:[#allocation18_spill] sm:$0xff] %v7365_v45  ;;  %v7378_v32 = vld [vmem:[%s9091_s2 + $0x70] sm:$0xff]  ;;  %v7383_v51 = vld [vmem:[%s9091_s2 + $0x78] sm:$0xff]  ;;  %v7392_v53 = vpack.c.bf16 %v9111_v59, %v9112_v58  ;;  %v9119_v52 = vand.u32 4294901760, %v7348_v61  ;;  %v9121_v31 = vand.u32 4294901760, %v7353_v62  ;;  %v9120_v30 = vand.u32 4294901760, %v7358_v63  ;;  %6246 = vmatprep.subr.bf16.mxu0 %v7286_v43 }
  0x5d   : > { %9509 = vst [vmem:[#allocation19_spill] sm:$0xff] %v7371_v39  ;;  %v289_v25 = vld [vmem:[%s7113_s13] sm:$0xff]  ;;  %v322_v24 = vld [vmem:[%s7119_s12 + $0x8] sm:$0xff]  ;;  %v7404_v19 = vpack.c.bf16 %v9116_v38, %v9117_v60  ;;  %v9123_v17 = vand.u32 4294901760, %v7378_v32  ;;  %v9122_v59 = vand.u32 4294901760, %v7383_v51  ;;  %v7408_v58 = vand.u32 4294901760, %v321_v46 }
  0x5e   : > { %9510 = vst [vmem:[#allocation20_spill] sm:$0xff] %v7392_v53  ;;  %v290_v16 = vld [vmem:[%s7113_s13 + $0x8] sm:$0xff]  ;;  %v7415_v11 = vpack.c.bf16 %v9119_v52, %v9124_v37  ;;  %v7421_v10 = vpack.c.bf16 %v9120_v30, %v9121_v31  ;;  %v7423_v38 = vand.u32 4294901760, %v289_v25  ;;  %v7425_v60 = vand.u32 4294901760, %v322_v24  ;;  %6056 = vmatpush3.bf16.msra.mxu1 %v7260_v36  ;;  %v323_v36 = vld [vmem:[%s7119_s12 + $0x10] sm:$0xff] }
  0x5f   : > { %9511 = vst [vmem:[#allocation21_spill] sm:$0xff] %v7404_v19  ;;  %9512 = vst [vmem:[#allocation22_spill] sm:$0xff] %v7408_v58  ;;  %v7432_v9 = vpack.c.bf16 %v9122_v59, %v9123_v17  ;;  %v7435_v52 = vsub.f32 %v321_v46, %v7408_v58  ;;  %v7440_v30 = vsub.f32 %v7128_v0, %v386_v3  ;;  %6248 = vmatpush3.bf16.msra.mxu0 %v7286_v43  ;;  %v325_v43 = vld [vmem:[%s7119_s12 + $0x20] sm:$0xff] }
  0x60   : > { %9513 = vst [vmem:[#allocation23_spill] sm:$0xff] %v7415_v11  ;;  %9514 = vst [vmem:[#allocation24_spill] sm:$0xff] %v7421_v10  ;;  %v7445_v31 = vsub.f32 %v7133_v1, %v389_v4  ;;  %6058 = vmatprep.subr.bf16.mxu1 %v7292_v44  ;;  %v7450_v59 = vsub.f32 %v289_v25, %v7423_v38  ;;  %v7453_v46 = vsub.f32 %v322_v24, %v7425_v60 }
  0x61   : > { %9515 = vst [vmem:[#allocation25_spill] sm:$0xff] %v7423_v38  ;;  %9516 = vst [vmem:[#allocation26_spill] sm:$0xff] %v7425_v60  ;;  %v7455_v17 = vand.u32 4294901760, %v290_v16  ;;  %v7460_v0 = vsub.f32 %v7138_v2, %v2360_v6  ;;  %6250 = vmatprep.subr.bf16.mxu0 %v7316_v50  ;;  %v9522_v25 = vand.u32 4294901760, %v7145_v5  ;;  %v9524_v4 = vand.u32 4294901760, %v7435_v52 }
  0x62   : > { %9517 = vst [vmem:[#allocation27_spill] sm:$0xff] %v7432_v9  ;;  %9518 = vst [vmem:[#allocation28_spill] sm:$0xff] %v7435_v52  ;;  %6060 = vmatpush3.bf16.msra.mxu1 %v7292_v44  ;;  %v9526_v37 = vand.u32 4294901760, %v7445_v31  ;;  %v9527_v1 = vand.u32 4294901760, %v7450_v59  ;;  %v9528_v44 = vand.u32 4294901760, %v7453_v46 }
  0x63   : > { %9519 = vst [vmem:[#allocation29_spill] sm:$0xff] %v7450_v59  ;;  %9520 = vst [vmem:[#allocation30_spill] sm:$0xff] %v7453_v46  ;;  %v7469_v24 = vsub.f32 %v7145_v5, %v9522_v25  ;;  %v7474_v6 = vsub.f32 %v290_v16, %v7455_v17  ;;  %v469_v3 = vsub.f32 %v7435_v52, %v9524_v4  ;;  %v9525_v5 = vand.u32 4294901760, %v7440_v30 }
  0x64   : > { %9521 = vst [vmem:[#allocation31_spill] sm:$0xff] %v7455_v17  ;;  %v797_v2 = vsub.f32 %v7445_v31, %v9526_v37  ;;  %6252 = vmatpush3.bf16.msra.mxu0 %v7316_v50  ;;  %6062 = vmatprep.subr.bf16.mxu1 %v7340_v57  ;;  %v2443_v4 = vsub.f32 %v7450_v59, %v9527_v1  ;;  %v9529_v37 = vand.u32 4294901760, %v7460_v0  ;;  %v291_v50 = vld [vmem:[%s7113_s13 + $0x10] sm:$0xff]  ;;  %v292_v59 = vld [vmem:[%s7113_s13 + $0x18] sm:$0xff] }
  0x65   : > { %9523 = vst [vmem:[#allocation32_spill] sm:$0xff] %v7474_v6  ;;  %v790_v25 = vsub.f32 %v7440_v30, %v9525_v5  ;;  %v7496_v5 = vsub.f32 %v7453_v46, %v9528_v44  ;;  %6254 = vmatprep.subr.bf16.mxu0 %v7365_v45  ;;  %v470_v29 = vand.u32 4294901760, %v469_v3  ;;  %v9530_v1 = vand.u32 4294901760, %v7469_v24  ;;  %v324_v46 = vld [vmem:[%s7119_s12 + $0x18] sm:$0xff]  ;;  %v293_v3 = vld [vmem:[%s7113_s13 + $0x20] sm:$0xff] }
  0x66   : > { %v2764_v16 = vsub.f32 %v7460_v0, %v9529_v37  ;;  %v798_v52 = vand.u32 4294901760, %v797_v2  ;;  %v2444_v22 = vand.u32 4294901760, %v2443_v4  ;;  %v9531_v37 = vand.u32 4294901760, %v7474_v6  ;;  %6064 = vmatpush3.bf16.msra.mxu1 %v7340_v57  ;;  %v326_v4 = vld [vmem:[%s7119_s12 + $0x28] sm:$0xff] }
  0x67   : > { %v791_v23 = vand.u32 4294901760, %v790_v25  ;;  %v2771_v44 = vsub.f32 %v7469_v24, %v9530_v1  ;;  %5117 = vmatprep.mubr.f32.mxu1 %v470_v29  ;;  %v7521_v1 = vand.u32 4294901760, %v323_v36  ;;  %v7523_v38 = vand.u32 4294901760, %v291_v50  ;;  %6066 = vmatprep.subr.bf16.mxu1 %v7371_v39 }
  0x68   : > { %v7515_v17 = vsub.f32 %v7474_v6, %v9531_v37  ;;  %v2765_v60 = vand.u32 4294901760, %v2764_v16  ;;  %6256 = vmatpush3.bf16.msra.mxu0 %v7365_v45  ;;  %v7529_v15 = vand.u32 4294901760, %v324_v46  ;;  %v7531_v16 = vand.u32 4294901760, %v292_v59  ;;  %5597 = vmatprep.mubr.f32.mxu0 %v2444_v22 }
  0x69   : > { %v7519_v2 = vpack.c.bf16 %v798_v52, %v791_v23  ;;  %v2772_v25 = vand.u32 4294901760, %v2771_v44  ;;  %9532 = vst [vmem:[#allocation33_spill] sm:$0xff] %v7521_v1  ;;  %9533 = vst [vmem:[#allocation34_spill] sm:$0xff] %v7523_v38  ;;  %v7533_v57 = vand.u32 4294901760, %v325_v43  ;;  %6258 = vmatprep.subr.bf16.mxu0 %v7392_v53  ;;  %v7539_v29 = vsub.f32 %v323_v36, %v7521_v1 }
  0x6a   : > { %9534 = vst [vmem:[#allocation35_spill] sm:$0xff] %v7529_v15  ;;  %9535 = vst [vmem:[#allocation36_spill] sm:$0xff] %v7531_v16  ;;  %v7542_v52 = vsub.f32 %v291_v50, %v7523_v38  ;;  %v7544_v44 = vand.u32 4294901760, %v293_v3  ;;  %v7547_v37 = vsub.f32 %v324_v46, %v7529_v15  ;;  %v7550_v45 = vsub.f32 %v292_v59, %v7531_v16  ;;  %v294_v59 = vld [vmem:[%s7113_s13 + $0x28] sm:$0xff] }
  0x6b   : > { %9536 = vst [vmem:[#allocation37_spill] sm:$0xff] %v7533_v57  ;;  %v7536_v23 = vpack.c.bf16 %v2772_v25, %v2765_v60  ;;  %9537 = vst [vmem:[#allocation38_spill] sm:$0xff] %v7539_v29  ;;  %v7553_v6 = vsub.f32 %v325_v43, %v7533_v57  ;;  %v7555_v22 = vand.u32 4294901760, %v326_v4  ;;  %6068 = vmatpush3.bf16.msra.mxu1 %v7371_v39  ;;  %v9545_v46 = vand.u32 4294901760, %v7151_v7 }
  0x6c   : > { %9538 = vst [vmem:[#allocation39_spill] sm:$0xff] %v7542_v52  ;;  %9539 = vst [vmem:[#allocation40_spill] sm:$0xff] %v7544_v44  ;;  %v7561_v60 = vsub.f32 %v293_v3, %v7544_v44  ;;  %6260 = vmatpush3.bf16.msra.mxu0 %v7392_v53  ;;  %6070 = vmatprep.subr.bf16.mxu1 %v7404_v19  ;;  %v9549_v36 = vand.u32 4294901760, %v7547_v37  ;;  %v9550_v39 = vand.u32 4294901760, %v7550_v45  ;;  %v9555_v44 = vand.u32 4294901760, %v7156_v8 }
  0x6d   : > { %9540 = vst [vmem:[#allocation41_spill] sm:$0xff] %v7547_v37  ;;  %9541 = vst [vmem:[#allocation42_spill] sm:$0xff] %v7550_v45  ;;  %v7566_v25 = vsub.f32 %v7151_v7, %v9545_v46  ;;  %v7574_v50 = vsub.f32 %v326_v4, %v7555_v22  ;;  %6262 = vmatprep.subr.bf16.mxu0 %v7415_v11  ;;  %v9547_v7 = vand.u32 4294901760, %v7539_v29  ;;  %v9548_v46 = vand.u32 4294901760, %v7542_v52 }
  0x6e   : > { %9542 = vst [vmem:[#allocation43_spill] sm:$0xff] %v7553_v6  ;;  %9543 = vst [vmem:[#allocation44_spill] sm:$0xff] %v7555_v22  ;;  %v7590_v4 = vsub.f32 %v7547_v37, %v9549_v36  ;;  %v7595_v22 = vsub.f32 %v7550_v45, %v9550_v39  ;;  %v9552_v37 = vand.u32 4294901760, %v7561_v60  ;;  %v9558_v16 = vand.u32 4294901760, %v7169_v13 }
  0x6f   : > { %9544 = vst [vmem:[#allocation45_spill] sm:$0xff] %v7561_v60  ;;  %9546 = vst [vmem:[#allocation46_spill] sm:$0xff] %v7574_v50  ;;  %v489_v3 = vsub.f32 %v7539_v29, %v9547_v7  ;;  %v7583_v53 = vsub.f32 %v7542_v52, %v9548_v46  ;;  %v9551_v7 = vand.u32 4294901760, %v7553_v6  ;;  %6072 = vmatpush3.bf16.msra.mxu1 %v7404_v19  ;;  %v9553_v45 = vand.u32 4294901760, %v7566_v25  ;;  %v328_v29 = vld [vmem:[%s7119_s12 + $0x38] sm:$0xff] }
  0x70   : > { %v7609_v39 = vsub.f32 %v7561_v60, %v9552_v37  ;;  %6264 = vmatpush3.bf16.msra.mxu0 %v7415_v11  ;;  %6074 = vmatprep.subr.bf16.mxu1 %v7421_v10  ;;  %v500_v43 = vand.u32 4294901760, %v7590_v4  ;;  %v9554_v19 = vand.u32 4294901760, %v7574_v50  ;;  %v295_v60 = vld [vmem:[%s7113_s13 + $0x30] sm:$0xff]  ;;  %v7632_v4 = vsub.f32 %v7156_v8, %v9555_v44 }
  0x71   : > { %v7600_v46 = vsub.f32 %v7553_v6, %v9551_v7  ;;  %v490_v52 = vand.u32 4294901760, %v489_v3  ;;  %v2464_v36 = vand.u32 4294901760, %v7583_v53  ;;  %v804_v7 = vsub.f32 %v7566_v25, %v9553_v45  ;;  %v327_v6 = vld [vmem:[%s7119_s12 + $0x30] sm:$0xff]  ;;  %6266 = vmatprep.subr.bf16.mxu0 %v7432_v9 }
  0x72   : > { %v2474_v3 = vand.u32 4294901760, %v7595_v22  ;;  %v7623_v37 = vsub.f32 %v7574_v50, %v9554_v19  ;;  %v2484_v45 = vand.u32 4294901760, %v7609_v39  ;;  %v7634_v22 = vand.u32 4294901760, %v294_v59 }
  0x73   : > { %v510_v53 = vand.u32 4294901760, %v7600_v46  ;;  %v805_v11 = vand.u32 4294901760, %v804_v7  ;;  %v296_v46 = vld [vmem:[%s7113_s13 + $0x38] sm:$0xff]  ;;  %v9557_v19 = vand.u32 4294901760, %v7164_v12  ;;  %v7646_v39 = vsub.f32 %v7169_v13, %v9558_v16  ;;  %6076 = vmatpush3.bf16.msra.mxu1 %v7421_v10 }
  0x74   : > { %9556 = vst [vmem:[#allocation47_spill] sm:$0xff] %v7634_v22  ;;  %v7648_v7 = vand.u32 4294901760, %v327_v6  ;;  %v9201_v8 = vand.u32 4294901760, %v7632_v4  ;;  %v7653_v44 = vsub.f32 %v294_v59, %v7634_v22  ;;  %v7655_v57 = vand.u32 4294901760, %v295_v60  ;;  %6268 = vmatpush3.bf16.msra.mxu0 %v7432_v9  ;;  %6078 = vmatprep.subr.bf16.mxu1 %v7519_v2 }
  0x75   : > { %v7641_v50 = vsub.f32 %v7164_v12, %v9557_v19  ;;  %v7657_v15 = vand.u32 4294901760, %v328_v29  ;;  %v7666_v19 = vand.u32 4294901760, %v296_v46  ;;  %6270 = vmatprep.subr.bf16.mxu0 %v7536_v23  ;;  %v9569_v22 = vand.u32 4294901760, %v7646_v39 }
  0x76   : > { %9559 = vst [vmem:[#allocation48_spill] sm:$0xff] %v7648_v7  ;;  %9560 = vst [vmem:[#allocation49_spill] sm:$0xff] %v7653_v44  ;;  %v7664_v16 = vsub.f32 %v327_v6, %v7648_v7  ;;  %v811_v59 = vsub.f32 %v7632_v4, %v9201_v8  ;;  %v9206_v9 = vand.u32 4294901760, %v7653_v44  ;;  %v7674_v10 = vsub.f32 %v295_v60, %v7655_v57 }
  0x77   : > { %9561 = vst [vmem:[#allocation50_spill] sm:$0xff] %v7655_v57  ;;  %9562 = vst [vmem:[#allocation51_spill] sm:$0xff] %v7657_v15  ;;  %v7677_v12 = vsub.f32 %v328_v29, %v7657_v15  ;;  %v9567_v6 = vand.u32 4294901760, %v7496_v5  ;;  %v9568_v13 = vand.u32 4294901760, %v7641_v50  ;;  %v2785_v38 = vsub.f32 %v7646_v39, %v9569_v22  ;;  %v329_v15 = vld [vmem:[%s7119_s12 + $0x40] sm:$0xff] }
  0x78   : > { %9563 = vst [vmem:[#allocation52_spill] sm:$0xff] %v7664_v16  ;;  %9564 = vst [vmem:[#allocation53_spill] sm:$0xff] %v7666_v19  ;;  %v7689_v60 = vsub.f32 %v296_v46, %v7666_v19  ;;  %v9571_v29 = vand.u32 4294901760, %v7515_v17  ;;  %v812_v5 = vand.u32 4294901760, %v811_v59  ;;  %v9572_v17 = vand.u32 4294901760, %v7664_v16  ;;  %v330_v19 = vld [vmem:[%s7119_s12 + $0x48] sm:$0xff] }
  0x79   : > { %9565 = vst [vmem:[#allocation54_spill] sm:$0xff] %v7674_v10  ;;  %9566 = vst [vmem:[#allocation55_spill] sm:$0xff] %v7677_v12  ;;  %5118 = vmatmul.mubr.f32.vlgmr.msra.gmra.mrb[0].mxu1 %v9567_v6  ;;  %v2778_v7 = vsub.f32 %v7641_v50, %v9568_v13  ;;  %v2493_v13 = vsub.f32 %v7653_v44, %v9206_v9  ;;  %v2786_v8 = vand.u32 4294901760, %v2785_v38  ;;  %v9573_v22 = vand.u32 4294901760, %v7674_v10 }
  0x7a   : > { %9570 = vst [vmem:[#allocation56_spill] sm:$0xff] %v7689_v60  ;;  %5598 = vmatmul.mubr.f32.vlgmr.msra.gmra.mrb[0].mxu0 %v9571_v29  ;;  %6080 = vmatpush3.bf16.msra.mxu1 %v7519_v2  ;;  %v529_v2 = vsub.f32 %v7664_v16, %v9572_v17  ;;  %v9212_v59 = vand.u32 4294901760, %v7689_v60  ;;  %v297_v29 = vld [vmem:[%s7113_s13 + $0x40] sm:$0xff]  ;;  %v6081_v9 = vpack.c.bf16 %v812_v5, %v805_v11  ;;  %v7716_v16 = vand.u32 4294901760, %v329_v15 }
  0x7b   : > { %6272 = vmatpush3.bf16.msra.mxu0 %v7536_v23  ;;  %5120 = vmatprep.mubr.f32.mxu1 %v490_v52  ;;  %v2779_v46 = vand.u32 4294901760, %v2778_v7  ;;  %v2494_v6 = vand.u32 4294901760, %v2493_v13  ;;  %v2503_v44 = vsub.f32 %v7674_v10, %v9573_v22  ;;  %v9574_v23 = vand.u32 4294901760, %v7677_v12 }
  0x7c   : > { %5600 = vmatprep.mubr.f32.mxu0 %v2464_v36  ;;  %v530_v7 = vand.u32 4294901760, %v529_v2  ;;  %v2513_v17 = vsub.f32 %v7689_v60, %v9212_v59  ;;  %9575 = vst [vmem:[#allocation57_spill] sm:$0xff] %v7716_v16  ;;  %v298_v36 = vld [vmem:[%s7113_s13 + $0x48] sm:$0xff]  ;;  %v7719_v13 = vand.u32 4294901760, %v297_v29  ;;  %v7721_v22 = vand.u32 4294901760, %v330_v19  ;;  %6082 = vmatprep.subr.bf16.mxu1 %v6081_v9 }
  0x7d   : > { %v539_v52 = vsub.f32 %v7677_v12, %v9574_v23  ;;  %5121 = vmatmul.mubr.f32.gmra.mrb[2].mxu1 %v500_v43  ;;  %v6273_v38 = vpack.c.bf16 %v2786_v8, %v2779_v46  ;;  %v2504_v11 = vand.u32 4294901760, %v2503_v44  ;;  %v7724_v8 = vsub.f32 %v329_v15, %v7716_v16 }
  0x7e   : > { %5601 = vmatmul.mubr.f32.gmra.mrb[2].mxu0 %v2474_v3  ;;  %5123 = vmatprep.mubr.f32.mxu1 %v510_v53  ;;  %9576 = vst [vmem:[#allocation58_spill] sm:$0xff] %v7719_v13  ;;  %9577 = vst [vmem:[#allocation59_spill] sm:$0xff] %v7721_v22  ;;  %v2514_v43 = vand.u32 4294901760, %v2513_v17  ;;  %v9579_v46 = vand.u32 4294901760, %v7174_v14  ;;  %v9580_v3 = vand.u32 4294901760, %v7187_v18  ;;  %v7737_v44 = vsub.f32 %v297_v29, %v7719_v13 }
  0x7f   : > { %v540_v5 = vand.u32 4294901760, %v539_v52  ;;  %5603 = vmatprep.mubr.f32.mxu0 %v2484_v45  ;;  %9578 = vst [vmem:[#allocation60_spill] sm:$0xff] %v7724_v8  ;;  %6274 = vmatprep.subr.bf16.mxu0 %v6273_v38  ;;  %v7740_v45 = vsub.f32 %v330_v19, %v7721_v22  ;;  %v7742_v15 = vand.u32 4294901760, %v298_v36  ;;  %v9584_v23 = vand.u32 4294901760, %v7193_v20 }
  0x80   : > { %v7729_v2 = vsub.f32 %v7174_v14, %v9579_v46  ;;  %v7734_v53 = vsub.f32 %v7187_v18, %v9580_v3  ;;  %6084 = vmatpush3.bf16.msra.mxu1 %v6081_v9  ;;  %9581 = vst [vmem:[#allocation61_spill] sm:$0xff] %v7737_v44  ;;  %v9585_v52 = vand.u32 4294901760, %v7623_v37  ;;  %6276 = vmatpush3.bf16.msra.mxu0 %v6273_v38  ;;  %v9211_v18 = vand.u32 4294901760, %v7724_v8 }
  0x81   : > { %9582 = vst [vmem:[#allocation62_spill] sm:$0xff] %v7740_v45  ;;  %9583 = vst [vmem:[#allocation63_spill] sm:$0xff] %v7742_v15  ;;  %v7747_v14 = vsub.f32 %v7193_v20, %v9584_v23  ;;  %v9586_v19 = vand.u32 4294901760, %v7198_v21  ;;  %v9215_v20 = vand.u32 4294901760, %v7737_v44  ;;  %v9218_v37 = vand.u32 4294901760, %v7740_v45 }
  0x82   : > { %5124 = vmatmul.mubr.f32.gmra.mrb[4].mxu1 %v9585_v52  ;;  %v9214_v9 = vand.u32 4294901760, %v7729_v2  ;;  %v9213_v29 = vand.u32 4294901760, %v7734_v53  ;;  %5604 = vmatmul.mubr.f32.gmra.mrb[4].mxu0 %v2494_v6  ;;  %v7762_v38 = vsub.f32 %v298_v36, %v7742_v15 }
  0x83   : > { %v7757_v17 = vsub.f32 %v7198_v21, %v9586_v19  ;;  %5126 = vmatprep.mubr.f32.mxu1 %v530_v7  ;;  %v9223_v46 = vand.u32 4294901760, %v7747_v14  ;;  %5606 = vmatprep.mubr.f32.mxu0 %v2504_v11  ;;  %v549_v21 = vsub.f32 %v7724_v8, %v9211_v18  ;;  %v2523_v11 = vsub.f32 %v7737_v44, %v9215_v20  ;;  %v331_v19 = vld [vmem:[%s7119_s12 + $0x50] sm:$0xff]  ;;  %v332_v44 = vld [vmem:[%s7119_s12 + $0x58] sm:$0xff] }
  0x84   : > { %9587 = vst [vmem:[#allocation64_spill] sm:$0xff] %v7762_v38  ;;  %v818_v6 = vsub.f32 %v7729_v2, %v9214_v9  ;;  %v825_v7 = vsub.f32 %v7734_v53, %v9213_v29  ;;  %v559_v3 = vsub.f32 %v7740_v45, %v9218_v37  ;;  %v299_v18 = vld [vmem:[%s7113_s13 + $0x50] sm:$0xff]  ;;  %v300_v37 = vld [vmem:[%s7113_s13 + $0x58] sm:$0xff]  ;;  %v333_v45 = vld [vmem:[%s7119_s12 + $0x60] sm:$0xff]  ;;  %v7802_v22 = vand.u32 4294901760, %v332_v44 }
  0x85   : > { %v9230_v36 = vand.u32 4294901760, %v7757_v17  ;;  %v2792_v52 = vsub.f32 %v7747_v14, %v9223_v46  ;;  %v550_v59 = vand.u32 4294901760, %v549_v21  ;;  %v2524_v23 = vand.u32 4294901760, %v2523_v11 }
  0x86   : > { %5127 = vmatmul.mubr.f32.gmra.mrb[6].mxu1 %v540_v5  ;;  %v819_v29 = vand.u32 4294901760, %v818_v6  ;;  %v826_v9 = vand.u32 4294901760, %v825_v7  ;;  %5607 = vmatmul.mubr.f32.gmra.mrb[6].mxu0 %v2514_v43  ;;  %v560_v8 = vand.u32 4294901760, %v559_v3  ;;  %v9588_v46 = vand.u32 4294901760, %v7762_v38  ;;  %v301_v5 = vld [vmem:[%s7113_s13 + $0x60] sm:$0xff]  ;;  %9591 = vst [vmem:[#allocation67_spill] sm:$0xff] %v7802_v22 }
  0x87   : > { %v2799_v20 = vsub.f32 %v7757_v17, %v9230_v36  ;;  %v2793_v12 = vand.u32 4294901760, %v2792_v52  ;;  %5129 = vmatprep.mubr.f32.mxu1 %v550_v59  ;;  %v7797_v7 = vand.u32 4294901760, %v331_v19  ;;  %v7799_v10 = vand.u32 4294901760, %v299_v18  ;;  %v334_v36 = vld [vmem:[%s7119_s12 + $0x68] sm:$0xff]  ;;  %5609 = vmatprep.mubr.f32.mxu0 %v2524_v23 }
  0x88   : > { %v2533_v60 = vsub.f32 %v7762_v38, %v9588_v46  ;;  %v6085_v21 = vpack.c.bf16 %v826_v9, %v819_v29  ;;  %v7804_v43 = vand.u32 4294901760, %v300_v37  ;;  %v7806_v11 = vand.u32 4294901760, %v333_v45  ;;  %v335_v38 = vld [vmem:[%s7119_s12 + $0x70] sm:$0xff] }
  0x89   : > { %v2800_v6 = vand.u32 4294901760, %v2799_v20  ;;  %9589 = vst [vmem:[#allocation65_spill] sm:$0xff] %v7797_v7  ;;  %9590 = vst [vmem:[#allocation66_spill] sm:$0xff] %v7799_v10  ;;  %v7809_v59 = vsub.f32 %v331_v19, %v7797_v7  ;;  %v7812_v9 = vsub.f32 %v299_v18, %v7799_v10  ;;  %v7814_v29 = vand.u32 4294901760, %v301_v5 }
  0x8a   : > { %v2534_v15 = vand.u32 4294901760, %v2533_v60  ;;  %9592 = vst [vmem:[#allocation68_spill] sm:$0xff] %v7804_v43  ;;  %9593 = vst [vmem:[#allocation69_spill] sm:$0xff] %v7806_v11  ;;  %5130 = vmatmul.mubr.f32.gmra.mrb[8].mxu1 %v560_v8  ;;  %6086 = vmatprep.subr.bf16.mxu1 %v6085_v21  ;;  %v7817_v60 = vsub.f32 %v332_v44, %v7802_v22  ;;  %v7820_v20 = vsub.f32 %v300_v37, %v7804_v43  ;;  %v306_v43 = vld [vmem:[%s7113_s13 + $0x88] sm:$0xff] }
  0x8b   : > { %v6277_v46 = vpack.c.bf16 %v2800_v6, %v2793_v12  ;;  %9594 = vst [vmem:[#allocation70_spill] sm:$0xff] %v7809_v59  ;;  %9595 = vst [vmem:[#allocation71_spill] sm:$0xff] %v7812_v9  ;;  %6088 = vmatpush3.bf16.msra.mxu1 %v6085_v21  ;;  %v7823_v8 = vsub.f32 %v333_v45, %v7806_v11  ;;  %v7825_v12 = vand.u32 4294901760, %v334_v36  ;;  %v9236_v3 = vand.u32 4294901760, %v7809_v59  ;;  %v342_v22 = vld [vmem:[%s7119_s12 + $0xa8] sm:$0xff] }
  0x8c   : > { %9596 = vst [vmem:[#allocation72_spill] sm:$0xff] %v7814_v29  ;;  %5610 = vmatmul.mubr.f32.gmra.mrb[8].mxu0 %v2534_v15  ;;  %9597 = vst [vmem:[#allocation73_spill] sm:$0xff] %v7817_v60  ;;  %v9235_v18 = vand.u32 4294901760, %v7812_v9  ;;  %v7830_v15 = vsub.f32 %v301_v5, %v7814_v29  ;;  %v9602_v44 = vand.u32 4294901760, %v7217_v26  ;;  %v9241_v45 = vand.u32 4294901760, %v7817_v60 }
  0x8d   : > { %9598 = vst [vmem:[#allocation74_spill] sm:$0xff] %v7820_v20  ;;  %9599 = vst [vmem:[#allocation75_spill] sm:$0xff] %v7823_v8  ;;  %6278 = vmatprep.subr.bf16.mxu0 %v6277_v46  ;;  %v9246_v37 = vand.u32 4294901760, %v7820_v20  ;;  %v9251_v52 = vand.u32 4294901760, %v7823_v8  ;;  %v7841_v19 = vsub.f32 %v334_v36, %v7825_v12  ;;  %v569_v5 = vsub.f32 %v7809_v59, %v9236_v3  ;;  %v302_v3 = vld [vmem:[%s7113_s13 + $0x68] sm:$0xff] }
  0x8e   : > { %9600 = vst [vmem:[#allocation76_spill] sm:$0xff] %v7825_v12  ;;  %9601 = vst [vmem:[#allocation77_spill] sm:$0xff] %v7830_v15  ;;  %v7835_v23 = vsub.f32 %v7217_v26, %v9602_v44  ;;  %6280 = vmatpush3.bf16.msra.mxu0 %v6277_v46  ;;  %v2543_v26 = vsub.f32 %v7812_v9, %v9235_v18  ;;  %v579_v46 = vsub.f32 %v7817_v60, %v9241_v45 }
  0x8f   : > { %9603 = vst [vmem:[#allocation78_spill] sm:$0xff] %v7841_v19  ;;  %v2553_v36 = vsub.f32 %v7820_v20, %v9246_v37  ;;  %v589_v44 = vsub.f32 %v7823_v8, %v9251_v52  ;;  %v9258_v18 = vand.u32 4294901760, %v7841_v19  ;;  %v570_v21 = vand.u32 4294901760, %v569_v5  ;;  %v303_v8 = vld [vmem:[%s7113_s13 + $0x70] sm:$0xff]  ;;  %v336_v5 = vld [vmem:[%s7119_s12 + $0x78] sm:$0xff] }
  0x90   : > { %v2544_v9 = vand.u32 4294901760, %v2543_v26  ;;  %v9604_v6 = vand.u32 4294901760, %v7830_v15  ;;  %v9605_v45 = vand.u32 4294901760, %v7835_v23  ;;  %v580_v37 = vand.u32 4294901760, %v579_v46  ;;  %v304_v46 = vld [vmem:[%s7113_s13 + $0x78] sm:$0xff] }
  0x91   : > { %v2554_v20 = vand.u32 4294901760, %v2553_v36  ;;  %v590_v12 = vand.u32 4294901760, %v589_v44  ;;  %v599_v52 = vsub.f32 %v7841_v19, %v9258_v18  ;;  %5132 = vmatprep.mubr.f32.mxu1 %v570_v21  ;;  %v9608_v44 = vand.u32 4294901760, %v7227_v28 }
  0x92   : > { %v2563_v59 = vsub.f32 %v7830_v15, %v9604_v6  ;;  %v832_v60 = vsub.f32 %v7835_v23, %v9605_v45  ;;  %5612 = vmatprep.mubr.f32.mxu0 %v2544_v9  ;;  %v9606_v6 = vand.u32 4294901760, %v7222_v27  ;;  %v7879_v45 = vand.u32 4294901760, %v302_v3  ;;  %5133 = vmatmul.mubr.f32.gmra.mrb[10].mxu1 %v580_v37 }
  0x93   : > { %5613 = vmatmul.mubr.f32.gmra.mrb[10].mxu0 %v2554_v20  ;;  %v600_v36 = vand.u32 4294901760, %v599_v52  ;;  %v7885_v18 = vsub.f32 %v7227_v28, %v9608_v44  ;;  %v9609_v9 = vand.u32 4294901760, %v7242_v33  ;;  %5135 = vmatprep.mubr.f32.mxu1 %v590_v12  ;;  %v7898_v20 = vand.u32 4294901760, %v303_v8 }
  0x94   : > { %v2564_v26 = vand.u32 4294901760, %v2563_v59  ;;  %v833_v29 = vand.u32 4294901760, %v832_v60  ;;  %v7877_v15 = vsub.f32 %v7222_v27, %v9606_v6  ;;  %9607 = vst [vmem:[#allocation79_spill] sm:$0xff] %v7879_v45  ;;  %v7892_v60 = vand.u32 4294901760, %v335_v38 }
  0x95   : > { %v7890_v59 = vsub.f32 %v7242_v33, %v9609_v9  ;;  %v7896_v37 = vsub.f32 %v302_v3, %v7879_v45  ;;  %9612 = vst [vmem:[#allocation82_spill] sm:$0xff] %v7898_v20  ;;  %v7900_v52 = vand.u32 4294901760, %v336_v5  ;;  %v9264_v28 = vand.u32 4294901760, %v7885_v18 }
  0x96   : > { %9610 = vst [vmem:[#allocation80_spill] sm:$0xff] %v7892_v60  ;;  %5615 = vmatprep.mubr.f32.mxu0 %v2564_v26  ;;  %v9259_v27 = vand.u32 4294901760, %v7877_v15  ;;  %v7905_v33 = vsub.f32 %v335_v38, %v7892_v60  ;;  %v7907_v6 = vand.u32 4294901760, %v304_v46  ;;  %v7914_v26 = vsub.f32 %v303_v8, %v7898_v20  ;;  %5136 = vmatmul.mubr.f32.gmra.mrb[12].mxu1 %v600_v36 }
  0x97   : > { %9611 = vst [vmem:[#allocation81_spill] sm:$0xff] %v7896_v37  ;;  %9613 = vst [vmem:[#allocation83_spill] sm:$0xff] %v7900_v52  ;;  %v9269_v21 = vand.u32 4294901760, %v7890_v59  ;;  %v7917_v44 = vsub.f32 %v336_v5, %v7900_v52  ;;  %v2806_v38 = vsub.f32 %v7885_v18, %v9264_v28  ;;  %v9619_v19 = vand.u32 4294901760, %v7896_v37  ;;  %v337_v28 = vld [vmem:[%s7119_s12 + $0x80] sm:$0xff] }
  0x98   : > { %9614 = vst [vmem:[#allocation84_spill] sm:$0xff] %v7905_v33  ;;  %9615 = vst [vmem:[#allocation85_spill] sm:$0xff] %v7907_v6  ;;  %v839_v12 = vsub.f32 %v7877_v15, %v9259_v27  ;;  %v9278_v27 = vand.u32 4294901760, %v7905_v33  ;;  %v7927_v3 = vsub.f32 %v304_v46, %v7907_v6  ;;  %v9283_v36 = vand.u32 4294901760, %v7914_v26  ;;  %v305_v6 = vld [vmem:[%s7113_s13 + $0x80] sm:$0xff] }
  0x99   : > { %9616 = vst [vmem:[#allocation86_spill] sm:$0xff] %v7914_v26  ;;  %9617 = vst [vmem:[#allocation87_spill] sm:$0xff] %v7917_v44  ;;  %v2813_v9 = vsub.f32 %v7890_v59, %v9269_v21  ;;  %v2573_v5 = vsub.f32 %v7896_v37, %v9619_v19  ;;  %v9284_v52 = vand.u32 4294901760, %v7917_v44  ;;  %v2807_v20 = vand.u32 4294901760, %v2806_v38 }
  0x9a   : > { %9618 = vst [vmem:[#allocation88_spill] sm:$0xff] %v7927_v3  ;;  %v840_v8 = vand.u32 4294901760, %v839_v12  ;;  %v609_v21 = vsub.f32 %v7905_v33, %v9278_v27  ;;  %v9285_v46 = vand.u32 4294901760, %v7927_v3  ;;  %v338_v12 = vld [vmem:[%s7119_s12 + $0x88] sm:$0xff]  ;;  %v2583_v19 = vsub.f32 %v7914_v26, %v9283_v36  ;;  %v308_v26 = vld [vmem:[%s7113_s13 + $0x98] sm:$0xff] }
  0x9b   : > { %v2814_v60 = vand.u32 4294901760, %v2813_v9  ;;  %v2574_v11 = vand.u32 4294901760, %v2573_v5  ;;  %v619_v37 = vsub.f32 %v7917_v44, %v9284_v52  ;;  %v7950_v33 = vand.u32 4294901760, %v337_v28 }
  0x9c   : > { %v6089_v45 = vpack.c.bf16 %v840_v8, %v833_v29  ;;  %v610_v9 = vand.u32 4294901760, %v609_v21  ;;  %v2593_v27 = vsub.f32 %v7927_v3, %v9285_v46  ;;  %v2584_v29 = vand.u32 4294901760, %v2583_v19 }
  0x9d   : > { %v6281_v38 = vpack.c.bf16 %v2814_v60, %v2807_v20  ;;  %9620 = vst [vmem:[#allocation89_spill] sm:$0xff] %v7950_v33  ;;  %5616 = vmatmul.mubr.f32.gmra.mrb[12].mxu0 %v2574_v11  ;;  %v620_v8 = vand.u32 4294901760, %v619_v37  ;;  %v7953_v5 = vand.u32 4294901760, %v305_v6  ;;  %v7955_v36 = vand.u32 4294901760, %v338_v12 }
  0x9e   : > { %6090 = vmatprep.subr.bf16.mxu1 %v6089_v45  ;;  %v2594_v52 = vand.u32 4294901760, %v2593_v27  ;;  %v7958_v60 = vsub.f32 %v337_v28, %v7950_v33  ;;  %v9624_v20 = vand.u32 4294901760, %v7247_v34  ;;  %v9625_v46 = vand.u32 4294901760, %v7252_v35  ;;  %5138 = vmatprep.mubr.f32.mxu1 %v610_v9 }
  0x9f   : > { %9621 = vst [vmem:[#allocation90_spill] sm:$0xff] %v7953_v5  ;;  %9622 = vst [vmem:[#allocation91_spill] sm:$0xff] %v7955_v36  ;;  %6282 = vmatprep.subr.bf16.mxu0 %v6281_v38  ;;  %6092 = vmatpush3.bf16.msra.mxu1 %v6089_v45  ;;  %v7971_v37 = vsub.f32 %v305_v6, %v7953_v5  ;;  %v7974_v45 = vsub.f32 %v338_v12, %v7955_v36  ;;  %v7976_v27 = vand.u32 4294901760, %v306_v43  ;;  %v309_v5 = vld [vmem:[%s7113_s13 + $0xa0] sm:$0xff] }
  0xa0   : > { %9623 = vst [vmem:[#allocation92_spill] sm:$0xff] %v7958_v60  ;;  %v7963_v21 = vsub.f32 %v7247_v34, %v9624_v20  ;;  %v7968_v11 = vsub.f32 %v7252_v35, %v9625_v46  ;;  %6284 = vmatpush3.bf16.msra.mxu0 %v6281_v38  ;;  %v9629_v28 = vand.u32 4294901760, %v7268_v40  ;;  %5618 = vmatprep.mubr.f32.mxu0 %v2584_v29  ;;  %v9286_v35 = vand.u32 4294901760, %v7958_v60 }
  0xa1   : > { %9626 = vst [vmem:[#allocation93_spill] sm:$0xff] %v7971_v37  ;;  %9627 = vst [vmem:[#allocation94_spill] sm:$0xff] %v7974_v45  ;;  %5139 = vmatmul.mubr.f32.gmra.mrb[14].mxu1 %v620_v8  ;;  %v9630_v19 = vand.u32 4294901760, %v7273_v41  ;;  %5619 = vmatmul.mubr.f32.gmra.mrb[14].mxu0 %v2594_v52  ;;  %v9295_v38 = vand.u32 4294901760, %v7971_v37  ;;  %v7994_v9 = vsub.f32 %v306_v43, %v7976_v27 }
  0xa2   : > { %9628 = vst [vmem:[#allocation95_spill] sm:$0xff] %v7976_v27  ;;  %v7981_v34 = vsub.f32 %v7268_v40, %v9629_v28  ;;  %v9287_v46 = vand.u32 4294901760, %v7963_v21  ;;  %v9290_v6 = vand.u32 4294901760, %v7968_v11  ;;  %v9300_v40 = vand.u32 4294901760, %v7974_v45 }
  0xa3   : > { %v7989_v12 = vsub.f32 %v7273_v41, %v9630_v19  ;;  %9631 = vst [vmem:[#allocation96_spill] sm:$0xff] %v7994_v9  ;;  %v629_v8 = vsub.f32 %v7958_v60, %v9286_v35  ;;  %v2603_v20 = vsub.f32 %v7971_v37, %v9295_v38  ;;  %v9316_v19 = vand.u32 4294901760, %v7994_v9  ;;  %v307_v60 = vld [vmem:[%s7113_s13 + $0x90] sm:$0xff]  ;;  %v340_v37 = vld [vmem:[%s7119_s12 + $0x98] sm:$0xff] }
  0xa4   : > { %v9307_v29 = vand.u32 4294901760, %v7981_v34  ;;  %v846_v41 = vsub.f32 %v7963_v21, %v9287_v46  ;;  %v853_v52 = vsub.f32 %v7968_v11, %v9290_v6  ;;  %v639_v28 = vsub.f32 %v7974_v45, %v9300_v40  ;;  %v339_v46 = vld [vmem:[%s7119_s12 + $0x90] sm:$0xff]  ;;  %v341_v40 = vld [vmem:[%s7119_s12 + $0xa0] sm:$0xff] }
  0xa5   : > { %v630_v6 = vand.u32 4294901760, %v629_v8  ;;  %v9632_v44 = vand.u32 4294901760, %v7989_v12  ;;  %v2604_v45 = vand.u32 4294901760, %v2603_v20  ;;  %v2613_v36 = vsub.f32 %v7994_v9, %v9316_v19 }
  0xa6   : > { %v2820_v35 = vsub.f32 %v7981_v34, %v9307_v29  ;;  %v847_v3 = vand.u32 4294901760, %v846_v41  ;;  %v854_v43 = vand.u32 4294901760, %v853_v52  ;;  %v640_v27 = vand.u32 4294901760, %v639_v28 }
  0xa7   : > { %v2827_v38 = vsub.f32 %v7989_v12, %v9632_v44  ;;  %5141 = vmatprep.mubr.f32.mxu1 %v630_v6  ;;  %v8029_v33 = vand.u32 4294901760, %v339_v46  ;;  %v8031_v52 = vand.u32 4294901760, %v307_v60  ;;  %5621 = vmatprep.mubr.f32.mxu0 %v2604_v45  ;;  %v2614_v44 = vand.u32 4294901760, %v2613_v36 }
  0xa8   : > { %v2821_v29 = vand.u32 4294901760, %v2820_v35  ;;  %v6093_v8 = vpack.c.bf16 %v854_v43, %v847_v3  ;;  %5142 = vmatmul.mubr.f32.gmra.mrb[16].mxu1 %v640_v27  ;;  %v8034_v10 = vand.u32 4294901760, %v340_v37  ;;  %v8036_v20 = vand.u32 4294901760, %v308_v26 }
  0xa9   : > { %v2828_v41 = vand.u32 4294901760, %v2827_v38  ;;  %9633 = vst [vmem:[#allocation97_spill] sm:$0xff] %v8029_v33  ;;  %9634 = vst [vmem:[#allocation98_spill] sm:$0xff] %v8031_v52  ;;  %v8038_v28 = vand.u32 4294901760, %v341_v40  ;;  %v8041_v6 = vsub.f32 %v339_v46, %v8029_v33  ;;  %v8044_v3 = vsub.f32 %v307_v60, %v8031_v52  ;;  %5622 = vmatmul.mubr.f32.gmra.mrb[16].mxu0 %v2614_v44  ;;  %v350_v52 = vld [vmem:[%s7119_s12 + $0xe8] sm:$0xff] }
  0xaa   : > { %9635 = vst [vmem:[#allocation99_spill] sm:$0xff] %v8034_v10  ;;  %9636 = vst [vmem:[#allocation100_spill] sm:$0xff] %v8036_v20  ;;  %6094 = vmatprep.subr.bf16.mxu1 %v6093_v8  ;;  %v8046_v38 = vand.u32 4294901760, %v309_v5  ;;  %v8049_v36 = vsub.f32 %v340_v37, %v8034_v10  ;;  %v8052_v45 = vsub.f32 %v308_v26, %v8036_v20  ;;  %v9646_v37 = vand.u32 4294901760, %v7278_v42  ;;  %v314_v10 = vld [vmem:[%s7113_s13 + $0xc8] sm:$0xff] }
  0xab   : > { %9637 = vst [vmem:[#allocation101_spill] sm:$0xff] %v8038_v28  ;;  %v6285_v35 = vpack.c.bf16 %v2828_v41, %v2821_v29  ;;  %9638 = vst [vmem:[#allocation102_spill] sm:$0xff] %v8041_v6  ;;  %6096 = vmatpush3.bf16.msra.mxu1 %v6093_v8  ;;  %v8055_v27 = vsub.f32 %v341_v40, %v8038_v28  ;;  %v8057_v29 = vand.u32 4294901760, %v342_v22  ;;  %v9317_v46 = vand.u32 4294901760, %v8041_v6 }
  0xac   : > { %9639 = vst [vmem:[#allocation103_spill] sm:$0xff] %v8044_v3  ;;  %9640 = vst [vmem:[#allocation104_spill] sm:$0xff] %v8046_v38  ;;  %v9318_v60 = vand.u32 4294901760, %v8044_v3  ;;  %v8062_v43 = vsub.f32 %v309_v5, %v8046_v38  ;;  %v8067_v8 = vsub.f32 %v7278_v42, %v9646_v37  ;;  %v9325_v26 = vand.u32 4294901760, %v8049_v36 }
  0xad   : > { %9641 = vst [vmem:[#allocation105_spill] sm:$0xff] %v8049_v36  ;;  %9642 = vst [vmem:[#allocation106_spill] sm:$0xff] %v8052_v45  ;;  %6286 = vmatprep.subr.bf16.mxu0 %v6285_v35  ;;  %v9330_v40 = vand.u32 4294901760, %v8052_v45  ;;  %v9335_v41 = vand.u32 4294901760, %v8055_v27  ;;  %v8073_v44 = vsub.f32 %v342_v22, %v8057_v29  ;;  %v649_v5 = vsub.f32 %v8041_v6, %v9317_v46 }
  0xae   : > { %9643 = vst [vmem:[#allocation107_spill] sm:$0xff] %v8055_v27  ;;  %9644 = vst [vmem:[#allocation108_spill] sm:$0xff] %v8057_v29  ;;  %6288 = vmatpush3.bf16.msra.mxu0 %v6285_v35  ;;  %v2623_v42 = vsub.f32 %v8044_v3, %v9318_v60  ;;  %v659_v19 = vsub.f32 %v8049_v36, %v9325_v26  ;;  %v310_v3 = vld [vmem:[%s7113_s13 + $0xa8] sm:$0xff]  ;;  %v9648_v37 = vand.u32 4294901760, %v8062_v43  ;;  %v9649_v26 = vand.u32 4294901760, %v8067_v8  ;;  %v343_v29 = vld [vmem:[%s7119_s12 + $0xb0] sm:$0xff] }
  0xaf   : > { %9645 = vst [vmem:[#allocation109_spill] sm:$0xff] %v8062_v43  ;;  %9647 = vst [vmem:[#allocation110_spill] sm:$0xff] %v8073_v44  ;;  %v2633_v22 = vsub.f32 %v8052_v45, %v9330_v40  ;;  %v669_v46 = vsub.f32 %v8055_v27, %v9335_v41  ;;  %v9342_v60 = vand.u32 4294901760, %v8073_v44  ;;  %v650_v35 = vand.u32 4294901760, %v649_v5  ;;  %v311_v27 = vld [vmem:[%s7113_s13 + $0xb0] sm:$0xff]  ;;  %v344_v5 = vld [vmem:[%s7119_s12 + $0xb8] sm:$0xff] }
  0xb0   : > { %v2624_v6 = vand.u32 4294901760, %v2623_v42  ;;  %v2643_v9 = vsub.f32 %v8062_v43, %v9648_v37  ;;  %v860_v36 = vsub.f32 %v8067_v8, %v9649_v26  ;;  %v660_v40 = vand.u32 4294901760, %v659_v19  ;;  %v312_v19 = vld [vmem:[%s7113_s13 + $0xb8] sm:$0xff] }
  0xb1   : > { %v2634_v45 = vand.u32 4294901760, %v2633_v22  ;;  %v670_v38 = vand.u32 4294901760, %v669_v46  ;;  %v679_v41 = vsub.f32 %v8073_v44, %v9342_v60  ;;  %5144 = vmatprep.mubr.f32.mxu1 %v650_v35  ;;  %v9650_v37 = vand.u32 4294901760, %v7299_v47 }
  0xb2   : > { %5624 = vmatprep.mubr.f32.mxu0 %v2624_v6  ;;  %v2644_v42 = vand.u32 4294901760, %v2643_v9  ;;  %v861_v28 = vand.u32 4294901760, %v860_v36  ;;  %v8111_v26 = vand.u32 4294901760, %v310_v3  ;;  %5145 = vmatmul.mubr.f32.gmra.mrb[18].mxu1 %v660_v40  ;;  %v9652_v22 = vand.u32 4294901760, %v7304_v48 }
  0xb3   : > { %v8109_v43 = vsub.f32 %v7299_v47, %v9650_v37  ;;  %5625 = vmatmul.mubr.f32.gmra.mrb[18].mxu0 %v2634_v45  ;;  %v680_v46 = vand.u32 4294901760, %v679_v41  ;;  %v9653_v6 = vand.u32 4294901760, %v7309_v49  ;;  %v8124_v36 = vand.u32 4294901760, %v343_v29  ;;  %5147 = vmatprep.mubr.f32.mxu1 %v670_v38 }
  0xb4   : > { %9651 = vst [vmem:[#allocation111_spill] sm:$0xff] %v8111_v26  ;;  %v8117_v60 = vsub.f32 %v7304_v48, %v9652_v22  ;;  %5627 = vmatprep.mubr.f32.mxu0 %v2644_v42  ;;  %v8128_v40 = vsub.f32 %v310_v3, %v8111_v26  ;;  %v8130_v45 = vand.u32 4294901760, %v311_v27  ;;  %v8132_v41 = vand.u32 4294901760, %v344_v5 }
  0xb5   : > { %v8122_v9 = vsub.f32 %v7309_v49, %v9653_v6  ;;  %9654 = vst [vmem:[#allocation112_spill] sm:$0xff] %v8124_v36  ;;  %v9343_v47 = vand.u32 4294901760, %v8109_v43  ;;  %v8137_v49 = vsub.f32 %v343_v29, %v8124_v36  ;;  %v8139_v37 = vand.u32 4294901760, %v312_v19 }
  0xb6   : > { %9655 = vst [vmem:[#allocation113_spill] sm:$0xff] %v8128_v40  ;;  %9656 = vst [vmem:[#allocation114_spill] sm:$0xff] %v8130_v45  ;;  %v9348_v48 = vand.u32 4294901760, %v8117_v60  ;;  %v8146_v42 = vsub.f32 %v311_v27, %v8130_v45  ;;  %v8149_v22 = vsub.f32 %v344_v5, %v8132_v41  ;;  %5148 = vmatmul.mubr.f32.gmra.mrb[20].mxu1 %v680_v46  ;;  %v9663_v44 = vand.u32 4294901760, %v8128_v40 }
  0xb7   : > { %9657 = vst [vmem:[#allocation115_spill] sm:$0xff] %v8132_v41  ;;  %v9353_v35 = vand.u32 4294901760, %v8122_v9  ;;  %9658 = vst [vmem:[#allocation116_spill] sm:$0xff] %v8137_v49  ;;  %v867_v38 = vsub.f32 %v8109_v43, %v9343_v47  ;;  %v9362_v47 = vand.u32 4294901760, %v8137_v49  ;;  %v8159_v3 = vsub.f32 %v312_v19, %v8139_v37 }
  0xb8   : > { %9659 = vst [vmem:[#allocation117_spill] sm:$0xff] %v8139_v37  ;;  %9660 = vst [vmem:[#allocation118_spill] sm:$0xff] %v8146_v42  ;;  %v2834_v29 = vsub.f32 %v8117_v60, %v9348_v48  ;;  %v2653_v5 = vsub.f32 %v8128_v40, %v9663_v44  ;;  %v9367_v46 = vand.u32 4294901760, %v8146_v42  ;;  %v9368_v41 = vand.u32 4294901760, %v8149_v22  ;;  %v345_v48 = vld [vmem:[%s7119_s12 + $0xc0] sm:$0xff] }
  0xb9   : > { %9661 = vst [vmem:[#allocation119_spill] sm:$0xff] %v8149_v22  ;;  %v2841_v6 = vsub.f32 %v8122_v9, %v9353_v35  ;;  %9662 = vst [vmem:[#allocation120_spill] sm:$0xff] %v8159_v3  ;;  %v868_v27 = vand.u32 4294901760, %v867_v38  ;;  %v689_v35 = vsub.f32 %v8137_v49, %v9362_v47  ;;  %v9369_v19 = vand.u32 4294901760, %v8159_v3  ;;  %v313_v37 = vld [vmem:[%s7113_s13 + $0xc0] sm:$0xff]  ;;  %v346_v38 = vld [vmem:[%s7119_s12 + $0xc8] sm:$0xff] }
  0xba   : > { %v2835_v45 = vand.u32 4294901760, %v2834_v29  ;;  %v2654_v20 = vand.u32 4294901760, %v2653_v5  ;;  %v2663_v44 = vsub.f32 %v8146_v42, %v9367_v46  ;;  %v699_v40 = vsub.f32 %v8149_v22, %v9368_v41  ;;  %v316_v42 = vld [vmem:[%s7113_s13 + $0xd8] sm:$0xff] }
  0xbb   : > { %v2842_v36 = vand.u32 4294901760, %v2841_v6  ;;  %v6097_v26 = vpack.c.bf16 %v868_v27, %v861_v28  ;;  %v690_v6 = vand.u32 4294901760, %v689_v35  ;;  %v2673_v47 = vsub.f32 %v8159_v3, %v9369_v19 }
  0xbc   : > { %v8182_v49 = vand.u32 4294901760, %v345_v48  ;;  %5628 = vmatmul.mubr.f32.gmra.mrb[20].mxu0 %v2654_v20  ;;  %v2664_v28 = vand.u32 4294901760, %v2663_v44  ;;  %v700_v27 = vand.u32 4294901760, %v699_v40  ;;  %v8185_v5 = vand.u32 4294901760, %v313_v37  ;;  %v6828_v20 = vld [vmem:[%s9092_s3 + $0x68] sm:$0xff] }
  0xbd   : > { %v6289_v29 = vpack.c.bf16 %v2842_v36, %v2835_v45  ;;  %6098 = vmatprep.subr.bf16.mxu1 %v6097_v26  ;;  %v8187_v46 = vand.u32 4294901760, %v346_v38  ;;  %v2674_v41 = vand.u32 4294901760, %v2673_v47  ;;  %v6827_v45 = vld [vmem:[%s9092_s3 + $0x60] sm:$0xff]  ;;  %v9668_v35 = vand.u32 4294901760, %v7324_v54  ;;  %5150 = vmatprep.mubr.f32.mxu1 %v690_v6 }
  0xbe   : > { %9664 = vst [vmem:[#allocation121_spill] sm:$0xff] %v8182_v49  ;;  %9665 = vst [vmem:[#allocation122_spill] sm:$0xff] %v8185_v5  ;;  %6100 = vmatpush3.bf16.msra.mxu1 %v6097_v26  ;;  %v8190_v36 = vsub.f32 %v345_v48, %v8182_v49  ;;  %v9669_v40 = vand.u32 4294901760, %v7329_v55  ;;  %v8207_v26 = vsub.f32 %v313_v37, %v8185_v5  ;;  %v8212_v48 = vand.u32 4294901760, %v314_v10  ;;  %v6829_v54 = vld [vmem:[%s9091_s2 + $0x60] sm:$0xff] }
  0xbf   : > { %9666 = vst [vmem:[#allocation123_spill] sm:$0xff] %v8187_v46  ;;  %6290 = vmatprep.subr.bf16.mxu0 %v6289_v29  ;;  %v8197_v19 = vsub.f32 %v6827_v45, %v9668_v35  ;;  %v8210_v47 = vsub.f32 %v346_v38, %v8187_v46  ;;  %v9673_v45 = vand.u32 4294901760, %v7334_v56  ;;  %5630 = vmatprep.mubr.f32.mxu0 %v2664_v28  ;;  %v6830_v38 = vld [vmem:[%s9091_s2 + $0x68] sm:$0xff]  ;;  %v9675_v6 = vand.u32 4294901760, %v7348_v61  ;;  %v317_v5 = vld [vmem:[%s7113_s13 + $0xe0] sm:$0xff] }
  0xc0   : > { %9667 = vst [vmem:[#allocation124_spill] sm:$0xff] %v8190_v36  ;;  %v8204_v44 = vsub.f32 %v6828_v20, %v9669_v40  ;;  %6292 = vmatpush3.bf16.msra.mxu0 %v6289_v29  ;;  %9670 = vst [vmem:[#allocation125_spill] sm:$0xff] %v8207_v26  ;;  %5151 = vmatmul.mubr.f32.gmra.mrb[22].mxu1 %v700_v27  ;;  %v9370_v55 = vand.u32 4294901760, %v8190_v36  ;;  %v9379_v56 = vand.u32 4294901760, %v8207_v26 }
  0xc1   : > { %9671 = vst [vmem:[#allocation126_spill] sm:$0xff] %v8210_v47  ;;  %9672 = vst [vmem:[#allocation127_spill] sm:$0xff] %v8212_v48  ;;  %v8219_v35 = vsub.f32 %v6829_v54, %v9673_v45  ;;  %v9371_v37 = vand.u32 4294901760, %v8197_v19  ;;  %v8229_v20 = vsub.f32 %v6830_v38, %v9675_v6  ;;  %5631 = vmatmul.mubr.f32.gmra.mrb[22].mxu0 %v2674_v41  ;;  %v9384_v28 = vand.u32 4294901760, %v8210_v47 }
  0xc2   : > { %v9374_v29 = vand.u32 4294901760, %v8204_v44  ;;  %v8234_v27 = vsub.f32 %v314_v10, %v8212_v48  ;;  %v709_v54 = vsub.f32 %v8190_v36, %v9370_v55  ;;  %v2683_v45 = vsub.f32 %v8207_v26, %v9379_v56  ;;  %v315_v36 = vld [vmem:[%s7113_s13 + $0xd0] sm:$0xff]  ;;  %v348_v26 = vld [vmem:[%s7119_s12 + $0xd8] sm:$0xff] }
  0xc3   : > { %9674 = vst [vmem:[#allocation128_spill] sm:$0xff] %v8219_v35  ;;  %9676 = vst [vmem:[#allocation129_spill] sm:$0xff] %v8229_v20  ;;  %v9391_v40 = vand.u32 4294901760, %v8219_v35  ;;  %v874_v61 = vsub.f32 %v8197_v19, %v9371_v37  ;;  %v719_v38 = vsub.f32 %v8210_v47, %v9384_v28  ;;  %v347_v37 = vld [vmem:[%s7119_s12 + $0xd0] sm:$0xff]  ;;  %v9678_v22 = vand.u32 4294901760, %v8229_v20  ;;  %v349_v28 = vld [vmem:[%s7119_s12 + $0xe0] sm:$0xff] }
  0xc4   : > { %9677 = vst [vmem:[#allocation130_spill] sm:$0xff] %v8234_v27  ;;  %v881_v41 = vsub.f32 %v8204_v44, %v9374_v29  ;;  %v9400_v6 = vand.u32 4294901760, %v8234_v27  ;;  %v710_v29 = vand.u32 4294901760, %v709_v54  ;;  %v2684_v47 = vand.u32 4294901760, %v2683_v45 }
  0xc5   : > { %v2848_v55 = vsub.f32 %v8219_v35, %v9391_v40  ;;  %v875_v3 = vand.u32 4294901760, %v874_v61  ;;  %v2855_v56 = vsub.f32 %v8229_v20, %v9678_v22  ;;  %v720_v48 = vand.u32 4294901760, %v719_v38 }
  0xc6   : > { %v882_v10 = vand.u32 4294901760, %v881_v41  ;;  %v2693_v46 = vsub.f32 %v8234_v27, %v9400_v6  ;;  %5153 = vmatprep.mubr.f32.mxu1 %v710_v29  ;;  %v8269_v49 = vand.u32 4294901760, %v347_v37  ;;  %v8271_v41 = vand.u32 4294901760, %v315_v36  ;;  %5633 = vmatprep.mubr.f32.mxu0 %v2684_v47 }
  0xc7   : > { %v2849_v40 = vand.u32 4294901760, %v2848_v55  ;;  %v2856_v61 = vand.u32 4294901760, %v2855_v56  ;;  %5154 = vmatmul.mubr.f32.gmra.mrb[24].mxu1 %v720_v48  ;;  %v8274_v33 = vand.u32 4294901760, %v348_v26  ;;  %v8276_v45 = vand.u32 4294901760, %v316_v42 }
  0xc8   : > { %v6101_v54 = vpack.c.bf16 %v882_v10, %v875_v3  ;;  %9679 = vst [vmem:[#allocation131_spill] sm:$0xff] %v8269_v49  ;;  %9680 = vst [vmem:[#allocation132_spill] sm:$0xff] %v8271_v41  ;;  %v2694_v22 = vand.u32 4294901760, %v2693_v46  ;;  %v8278_v38 = vand.u32 4294901760, %v349_v28  ;;  %v8281_v29 = vsub.f32 %v347_v37, %v8269_v49 }
  0xc9   : > { %9681 = vst [vmem:[#allocation133_spill] sm:$0xff] %v8274_v33  ;;  %9682 = vst [vmem:[#allocation134_spill] sm:$0xff] %v8276_v45  ;;  %v6293_v55 = vpack.c.bf16 %v2856_v61, %v2849_v40  ;;  %v8284_v3 = vsub.f32 %v315_v36, %v8271_v41  ;;  %v8286_v56 = vand.u32 4294901760, %v317_v5  ;;  %v8289_v46 = vsub.f32 %v348_v26, %v8274_v33  ;;  %v6831_v26 = vld [vmem:[%s9092_s3 + $0x70] sm:$0xff] }
  0xca   : > { %9683 = vst [vmem:[#allocation135_spill] sm:$0xff] %v8278_v38  ;;  %6102 = vmatprep.subr.bf16.mxu1 %v6101_v54  ;;  %9684 = vst [vmem:[#allocation136_spill] sm:$0xff] %v8281_v29  ;;  %5634 = vmatmul.mubr.f32.gmra.mrb[24].mxu0 %v2694_v22  ;;  %v8292_v47 = vsub.f32 %v316_v42, %v8276_v45  ;;  %v8295_v48 = vsub.f32 %v349_v28, %v8278_v38  ;;  %v8297_v40 = vand.u32 4294901760, %v350_v52 }
  0xcb   : > { %9685 = vst [vmem:[#allocation137_spill] sm:$0xff] %v8284_v3  ;;  %9686 = vst [vmem:[#allocation138_spill] sm:$0xff] %v8286_v56  ;;  %6104 = vmatpush3.bf16.msra.mxu1 %v6101_v54  ;;  %6294 = vmatprep.subr.bf16.mxu0 %v6293_v55  ;;  %v9401_v37 = vand.u32 4294901760, %v8281_v29  ;;  %v9402_v36 = vand.u32 4294901760, %v8284_v3  ;;  %v8302_v10 = vsub.f32 %v317_v5, %v8286_v56  ;;  %v9692_v42 = vand.u32 4294901760, %v7353_v62 }
  0xcc   : > { %9687 = vst [vmem:[#allocation139_spill] sm:$0xff] %v8289_v46  ;;  %9688 = vst [vmem:[#allocation140_spill] sm:$0xff] %v8292_v47  ;;  %6296 = vmatpush3.bf16.msra.mxu0 %v6293_v55  ;;  %v9411_v28 = vand.u32 4294901760, %v8289_v46  ;;  %v9414_v61 = vand.u32 4294901760, %v8292_v47  ;;  %v9419_v22 = vand.u32 4294901760, %v8295_v48  ;;  %v8315_v5 = vsub.f32 %v350_v52, %v8297_v40 }
  0xcd   : > { %9689 = vst [vmem:[#allocation141_spill] sm:$0xff] %v8295_v48  ;;  %9690 = vst [vmem:[#allocation142_spill] sm:$0xff] %v8297_v40  ;;  %v8309_v54 = vsub.f32 %v6831_v26, %v9692_v42  ;;  %v729_v6 = vsub.f32 %v8281_v29, %v9401_v37  ;;  %v2703_v62 = vsub.f32 %v8284_v3, %v9402_v36  ;;  %v318_v3 = vld [vmem:[%s7113_s13 + $0xe8] sm:$0xff]  ;;  %v9695_v26 = vand.u32 4294901760, %v8302_v10 }
  0xce   : > { %9691 = vst [vmem:[#allocation143_spill] sm:$0xff] %v8302_v10  ;;  %9694 = vst [vmem:[#allocation145_spill] sm:$0xff] %v8315_v5  ;;  %v739_v42 = vsub.f32 %v8289_v46, %v9411_v28  ;;  %v2713_v52 = vsub.f32 %v8292_v47, %v9414_v61  ;;  %v749_v37 = vsub.f32 %v8295_v48, %v9419_v22  ;;  %v9426_v36 = vand.u32 4294901760, %v8315_v5  ;;  %v351_v46 = vld [vmem:[%s7119_s12 + $0xf0] sm:$0xff] }
  0xcf   : > { %9693 = vst [vmem:[#allocation144_spill] sm:$0xff] %v8309_v54  ;;  %v730_v55 = vand.u32 4294901760, %v729_v6  ;;  %v2704_v29 = vand.u32 4294901760, %v2703_v62  ;;  %v2723_v27 = vsub.f32 %v8302_v10, %v9695_v26  ;;  %v9696_v40 = vand.u32 4294901760, %v8309_v54  ;;  %v319_v48 = vld [vmem:[%s7113_s13 + $0xf0] sm:$0xff]  ;;  %v352_v6 = vld [vmem:[%s7119_s12 + $0xf8] sm:$0xff] }
  0xd0   : > { %v740_v61 = vand.u32 4294901760, %v739_v42  ;;  %v2714_v47 = vand.u32 4294901760, %v2713_v52  ;;  %v750_v56 = vand.u32 4294901760, %v749_v37  ;;  %v759_v22 = vsub.f32 %v8315_v5, %v9426_v36  ;;  %v6832_v26 = vld [vmem:[%s9092_s3 + $0x78] sm:$0xff] }
  0xd1   : > { %v888_v28 = vsub.f32 %v8309_v54, %v9696_v40  ;;  %5156 = vmatprep.mubr.f32.mxu1 %v730_v55  ;;  %5636 = vmatprep.mubr.f32.mxu0 %v2704_v29  ;;  %v2724_v62 = vand.u32 4294901760, %v2723_v27  ;;  %v9697_v40 = vand.u32 4294901760, %v7358_v63  ;;  %v8355_v42 = vand.u32 4294901760, %v318_v3  ;;  %v320_v37 = vld [vmem:[%s7113_s13 + $0xf8] sm:$0xff]  ;;  %v6833_v29 = vld [vmem:[%s9091_s2 + $0x70] sm:$0xff]  ;;  %s4503_s13 = sshll.u32 %s4490_s4, 5 }
  0xd2   : > { %5157 = vmatmul.mubr.f32.gmra.mrb[26].mxu1 %v740_v61  ;;  %5637 = vmatmul.mubr.f32.gmra.mrb[26].mxu0 %v2714_v47  ;;  %v760_v52 = vand.u32 4294901760, %v759_v22  ;;  %v9700_v27 = vand.u32 4294901760, %v7378_v32  ;;  %v6834_v63 = vld [vmem:[%s9091_s2 + $0x78] sm:$0xff]  ;;  %v9702_v55 = vand.u32 4294901760, %v7383_v51  ;;  %v8378_v32 = vand.u32 4294901760, %v319_v48  ;;  %p284_p8 = scmp.lt.s32.totalorder %s4503_s13, 255 }
  0xd3   : > { %v889_v38 = vand.u32 4294901760, %v888_v28  ;;  %v8353_v10 = vsub.f32 %v6832_v26, %v9697_v40  ;;  %9699 = vst [vmem:[#allocation147_spill] sm:$0xff] %v8355_v42  ;;  %v8372_v40 = vand.u32 4294901760, %v351_v46  ;;  %5159 = vmatprep.mubr.f32.mxu1 %v750_v56  ;;  %5639 = vmatprep.mubr.f32.mxu0 %v2724_v62  ;;  %v8376_v61 = vsub.f32 %v318_v3, %v8355_v42 }
  0xd4   : > { %v8363_v28 = vsub.f32 %v6833_v29, %v9700_v27  ;;  %v8370_v26 = vsub.f32 %v6834_v63, %v9702_v55  ;;  %9706 = vst [vmem:[#allocation152_spill] sm:$0xff] %v8378_v32  ;;  %v8380_v22 = vand.u32 4294901760, %v352_v6  ;;  %v8387_v63 = vand.u32 4294901760, %v320_v37  ;;  %s10065_s13 = smov (!%p284_p8, %s4503_s13), 255 }
  0xd5   : > { %9698 = vst [vmem:[#allocation146_spill] sm:$0xff] %v8353_v10  ;;  %9704 = vst [vmem:[#allocation150_spill] sm:$0xff] %v8372_v40  ;;  %v9429_v47 = vand.u32 4294901760, %v8353_v10  ;;  %v8385_v51 = vsub.f32 %v351_v46, %v8372_v40  ;;  %v8394_v62 = vsub.f32 %v319_v48, %v8378_v32  ;;  %v9713_v48 = vand.u32 4294901760, %v8376_v61  ;;  %s4504_s25 = sshll.u32 %s10065_s13, 3 }
  0xd6   : > { %9701 = vst [vmem:[#allocation148_spill] sm:$0xff] %v8363_v28  ;;  %9703 = vst [vmem:[#allocation149_spill] sm:$0xff] %v8370_v26  ;;  %v9434_v29 = vand.u32 4294901760, %v8363_v28  ;;  %v9435_v27 = vand.u32 4294901760, %v8370_v26  ;;  %v8397_v55 = vsub.f32 %v352_v6, %v8380_v22  ;;  %5160 = vmatmul.mubr.f32.gmra.mrb[28].mxu1 %v760_v52  ;;  %s8978_s7 = scalar_lea.vmem %s9094_s5, %s4504_s25 }
  0xd7   : > { %9705 = vst [vmem:[#allocation151_spill] sm:$0xff] %v8376_v61  ;;  %9707 = vst [vmem:[#allocation153_spill] sm:$0xff] %v8380_v22  ;;  %v895_v56 = vsub.f32 %v8353_v10, %v9429_v47  ;;  %v9444_v5 = vand.u32 4294901760, %v8385_v51  ;;  %v8407_v47 = vsub.f32 %v320_v37, %v8387_v63  ;;  %v2733_v6 = vsub.f32 %v8376_v61, %v9713_v48 }
  0xd8   : > { %9708 = vst [vmem:[#allocation154_spill] sm:$0xff] %v8385_v51  ;;  %9709 = vst [vmem:[#allocation155_spill] sm:$0xff] %v8387_v63  ;;  %v2862_v46 = vsub.f32 %v8363_v28, %v9434_v29  ;;  %v2869_v36 = vsub.f32 %v8370_v26, %v9435_v27  ;;  %v9447_v52 = vand.u32 4294901760, %v8394_v62  ;;  %v9446_v22 = vand.u32 4294901760, %v8397_v55 }
  0xd9   : > { %9710 = vst [vmem:[#allocation156_spill] sm:$0xff] %v8394_v62  ;;  %9711 = vst [vmem:[#allocation157_spill] sm:$0xff] %v8397_v55  ;;  %v896_v3 = vand.u32 4294901760, %v895_v56  ;;  %v769_v27 = vsub.f32 %v8385_v51, %v9444_v5  ;;  %v9445_v40 = vand.u32 4294901760, %v8407_v47  ;;  %v2734_v37 = vand.u32 4294901760, %v2733_v6 }
  0xda   : > { %9712 = vst [vmem:[#allocation158_spill] sm:$0xff] %v8407_v47  ;;  %v2863_v32 = vand.u32 4294901760, %v2862_v46  ;;  %v2870_v29 = vand.u32 4294901760, %v2869_v36  ;;  %v2743_v56 = vsub.f32 %v8394_v62, %v9447_v52  ;;  %v779_v48 = vsub.f32 %v8397_v55, %v9446_v22  ;;  %v9723_v52 = vld [vmem:[#allocation47_spill] sm:$0xff] }
  0xdb   : > { %v6105_v42 = vpack.c.bf16 %v896_v3, %v889_v38  ;;  %v770_v63 = vand.u32 4294901760, %v769_v27  ;;  %v2753_v36 = vsub.f32 %v8407_v47, %v9445_v40  ;;  %5640 = vmatmul.mubr.f32.gmra.mrb[28].mxu0 %v2734_v37  ;;  %v6109_v3 = vpack.c.bf16 %v7445_v31, %v7440_v30  ;;  %v9716_v37 = vld [vmem:[#allocation31_spill] sm:$0xff]  ;;  %v9722_v40 = vld [vmem:[#allocation44_spill] sm:$0xff] }
  0xdc   : > { %v6297_v61 = vpack.c.bf16 %v2870_v29, %v2863_v32  ;;  %v2744_v46 = vand.u32 4294901760, %v2743_v56  ;;  %v780_v5 = vand.u32 4294901760, %v779_v48  ;;  %v6301_v32 = vpack.c.bf16 %v7469_v24, %v7460_v0  ;;  %v9718_v48 = vld [vmem:[#allocation35_spill] sm:$0xff] }
  0xdd   : > { %6106 = vmatprep.subr.bf16.mxu1 %v6105_v42  ;;  %v2754_v38 = vand.u32 4294901760, %v2753_v36  ;;  %5162 = vmatprep.mubr.f32.mxu1 %v770_v63  ;;  %v6125_v29 = vpack.c.bf16 %v7968_v11, %v7963_v21  ;;  %v6317_v27 = vpack.c.bf16 %v7989_v12, %v7981_v34  ;;  %v9715_v63 = vld [vmem:[#allocation26_spill] sm:$0xff]  ;;  %v6305_v6 = vpack.c.bf16 %v7646_v39, %v7641_v50 }
  0xde   : > { %6298 = vmatprep.subr.bf16.mxu0 %v6297_v61  ;;  %6108 = vmatpush3.bf16.msra.mxu1 %v6105_v42  ;;  %v9714_v42 = vld [vmem:[#allocation25_spill] sm:$0xff]  ;;  %v6117_v56 = vpack.c.bf16 %v7734_v53, %v7729_v2  ;;  %v6309_v36 = vpack.c.bf16 %v7757_v17, %v7747_v14  ;;  %v6313_v22 = vpack.c.bf16 %v7890_v59, %v7885_v18 }
  0xdf   : > { %6300 = vmatpush3.bf16.msra.mxu0 %v6297_v61  ;;  %5642 = vmatprep.mubr.f32.mxu0 %v2744_v46  ;;  %v6113_v61 = vpack.c.bf16 %v7632_v4, %v7566_v25  ;;  %v9719_v46 = vld [vmem:[#allocation36_spill] sm:$0xff] }
  0xe0   : > { %5163 = vmatmul.mubr.f32.gmra.mrb[30].mxu1 %v780_v5  ;;  %5643 = vmatmul.mubr.f32.gmra.mrb[30].mxu0 %v2754_v38  ;;  %v9717_v5 = vld [vmem:[#allocation34_spill] sm:$0xff]  ;;  %v9720_v38 = vld [vmem:[#allocation37_spill] sm:$0xff] }
  0xe1   : > { %5197 = vmatprep.mubr.f32.mxu1 %v7408_v58  ;;  %5677 = vmatprep.mubr.f32.mxu0 %v9714_v42  ;;  %v9798_v42 = vld [vmem:[#allocation70_spill] sm:$0xff]  ;;  %v9799_v58 = vld [vmem:[#allocation71_spill] sm:$0xff] }
  0xe2   : > { %6110 = vmatprep.subr.bf16.mxu1 %v6109_v3  ;;  %6302 = vmatprep.subr.bf16.mxu0 %v6301_v32 }
  0xe4   : > { %5198 = vmatmul.mubr.f32.vlgmr.msra.gmra.mrb[0].mxu1 %v9715_v63  ;;  %5678 = vmatmul.mubr.f32.vlgmr.msra.gmra.mrb[0].mxu0 %v9716_v37  ;;  %v9794_v37 = vld [vmem:[#allocation17_spill] sm:$0xff]  ;;  %v9797_v63 = vld [vmem:[#allocation64_spill] sm:$0xff] }
  0xe5   : > { %6112 = vmatpush3.bf16.msra.mxu1 %v6109_v3  ;;  %6304 = vmatpush3.bf16.msra.mxu0 %v6301_v32  ;;  %v9721_v3 = vld [vmem:[#allocation40_spill] sm:$0xff]  ;;  %v6121_v32 = vpack.c.bf16 %v7877_v15, %v7835_v23 }
  0xe6   : > { %5200 = vmatprep.mubr.f32.mxu1 %v7521_v1  ;;  %5680 = vmatprep.mubr.f32.mxu0 %v9717_v5  ;;  %v9792_v5 = vld [vmem:[#allocation60_spill] sm:$0xff]  ;;  %v9793_v1 = vld [vmem:[#allocation61_spill] sm:$0xff] }
  0xe7   : > { %6114 = vmatprep.subr.bf16.mxu1 %v6113_v61  ;;  %6306 = vmatprep.subr.bf16.mxu0 %v6305_v6 }
  0xe8   : > { %5201 = vmatmul.mubr.f32.gmra.mrb[2].mxu1 %v9718_v48  ;;  %5681 = vmatmul.mubr.f32.gmra.mrb[2].mxu0 %v9719_v46  ;;  %v9724_v48 = vld [vmem:[#allocation48_spill] sm:$0xff]  ;;  %v9789_v46 = vld [vmem:[#allocation55_spill] sm:$0xff] }
  0xe9   : > { %5203 = vmatprep.mubr.f32.mxu1 %v9720_v38  ;;  %5683 = vmatprep.mubr.f32.mxu0 %v9721_v3  ;;  %v9787_v3 = vld [vmem:[#allocation54_spill] sm:$0xff]  ;;  %v9788_v38 = vld [vmem:[#allocation15_spill] sm:$0xff] }
  0xea   : > { %6116 = vmatpush3.bf16.msra.mxu1 %v6113_v61  ;;  %6308 = vmatpush3.bf16.msra.mxu0 %v6305_v6  ;;  %v9725_v61 = vld [vmem:[#allocation51_spill] sm:$0xff]  ;;  %v9726_v6 = vld [vmem:[#allocation53_spill] sm:$0xff] }
  0xeb   : > { %6118 = vmatprep.subr.bf16.mxu1 %v6117_v56  ;;  %6310 = vmatprep.subr.bf16.mxu0 %v6309_v36 }
  0xec   : > { %5204 = vmatmul.mubr.f32.gmra.mrb[4].mxu1 %v9722_v40  ;;  %5684 = vmatmul.mubr.f32.gmra.mrb[4].mxu0 %v9723_v52  ;;  %v9727_v52 = vld [vmem:[#allocation59_spill] sm:$0xff]  ;;  %v9786_v40 = vld [vmem:[#allocation52_spill] sm:$0xff] }
  0xed   : > { %5206 = vmatprep.mubr.f32.mxu1 %v9724_v48  ;;  %5686 = vmatprep.mubr.f32.mxu0 %v7655_v57  ;;  %v6129_v48 = vpack.c.bf16 %v8109_v43, %v8067_v8  ;;  %v9785_v57 = vld [vmem:[#allocation49_spill] sm:$0xff] }
  0xee   : > { %6120 = vmatpush3.bf16.msra.mxu1 %v6117_v56  ;;  %6312 = vmatpush3.bf16.msra.mxu0 %v6309_v36  ;;  %v6321_v56 = vpack.c.bf16 %v8122_v9, %v8117_v60  ;;  %v9728_v36 = vld [vmem:[#allocation63_spill] sm:$0xff] }
  0xef   : > { %6122 = vmatprep.subr.bf16.mxu1 %v6121_v32  ;;  %6314 = vmatprep.subr.bf16.mxu0 %v6313_v22 }
  0xf0   : > { %5207 = vmatmul.mubr.f32.gmra.mrb[6].mxu1 %v9725_v61  ;;  %5687 = vmatmul.mubr.f32.gmra.mrb[6].mxu0 %v9726_v6  ;;  %v9729_v6 = vld [vmem:[#allocation66_spill] sm:$0xff] }
  0xf1   : > { %5209 = vmatprep.mubr.f32.mxu1 %v7716_v16  ;;  %5689 = vmatprep.mubr.f32.mxu0 %v7719_v13  ;;  %v9731_v13 = vld [vmem:[#allocation68_spill] sm:$0xff]  ;;  %v9732_v16 = vld [vmem:[#allocation69_spill] sm:$0xff]  ;;  %v9755_v61 = vld [vmem:[#allocation114_spill] sm:$0xff] }
  0xf2   : > { %6124 = vmatpush3.bf16.msra.mxu1 %v6121_v32  ;;  %6316 = vmatpush3.bf16.msra.mxu0 %v6313_v22  ;;  %v6133_v22 = vpack.c.bf16 %v8204_v44, %v8197_v19  ;;  %v9730_v32 = vld [vmem:[#allocation67_spill] sm:$0xff] }
  0xf3   : > { %6126 = vmatprep.subr.bf16.mxu1 %v6125_v29  ;;  %6318 = vmatprep.subr.bf16.mxu0 %v6317_v27 }
  0xf4   : > { %5210 = vmatmul.mubr.f32.gmra.mrb[8].mxu1 %v9727_v52  ;;  %5690 = vmatmul.mubr.f32.gmra.mrb[8].mxu0 %v9728_v36  ;;  %v6325_v52 = vpack.c.bf16 %v8229_v20, %v8219_v35  ;;  %v9733_v36 = vld [vmem:[#allocation72_spill] sm:$0xff]  ;;  %v9811_v35 = vld [vmem:[#allocation86_spill] sm:$0xff] }
  0xf5   : > { %5212 = vmatprep.mubr.f32.mxu1 %v7797_v7  ;;  %5692 = vmatprep.mubr.f32.mxu0 %v9729_v6  ;;  %v9735_v6 = vld [vmem:[#allocation79_spill] sm:$0xff]  ;;  %v9736_v7 = vld [vmem:[#allocation80_spill] sm:$0xff] }
  0xf6   : > { %6128 = vmatpush3.bf16.msra.mxu1 %v6125_v29  ;;  %6320 = vmatpush3.bf16.msra.mxu0 %v6317_v27  ;;  %v6137_v29 = vpack.c.bf16 %v8353_v10, %v8309_v54  ;;  %v9734_v27 = vld [vmem:[#allocation76_spill] sm:$0xff]  ;;  %v9806_v10 = vld [vmem:[#allocation21_spill] sm:$0xff] }
  0xf7   : > { %6130 = vmatprep.subr.bf16.mxu1 %v6129_v48  ;;  %6322 = vmatprep.subr.bf16.mxu0 %v6321_v56  ;;  %v9809_v54 = vld [vmem:[#allocation81_spill] sm:$0xff]  ;;  %v9810_v20 = vld [vmem:[#allocation84_spill] sm:$0xff] }
  0xf8   : > { %5213 = vmatmul.mubr.f32.gmra.mrb[10].mxu1 %v9730_v32  ;;  %5693 = vmatmul.mubr.f32.gmra.mrb[10].mxu0 %v9731_v13  ;;  %v6329_v32 = vpack.c.bf16 %v8370_v26, %v8363_v28  ;;  %v9737_v13 = vld [vmem:[#allocation82_spill] sm:$0xff]  ;;  %v9804_v26 = vld [vmem:[#allocation75_spill] sm:$0xff]  ;;  %v9805_v28 = vld [vmem:[#allocation77_spill] sm:$0xff] }
  0xf9   : > { %5215 = vmatprep.mubr.f32.mxu1 %v9732_v16  ;;  %5695 = vmatprep.mubr.f32.mxu0 %v9733_v36  ;;  %v9740_v36 = vld [vmem:[#allocation89_spill] sm:$0xff] }
  0xfa   : > { %6132 = vmatpush3.bf16.msra.mxu1 %v6129_v48  ;;  %6324 = vmatpush3.bf16.msra.mxu0 %v6321_v56  ;;  %v9738_v48 = vld [vmem:[#allocation83_spill] sm:$0xff]  ;;  %v9739_v56 = vld [vmem:[#allocation85_spill] sm:$0xff] }
  0xfb   : > { %6134 = vmatprep.subr.bf16.mxu1 %v6133_v22  ;;  %6326 = vmatprep.subr.bf16.mxu0 %v6325_v52  ;;  %v9742_v16 = vld [vmem:[#allocation9_spill] sm:$0xff] }
  0xfc   : > { %5216 = vmatmul.mubr.f32.gmra.mrb[12].mxu1 %v9734_v27  ;;  %5696 = vmatmul.mubr.f32.gmra.mrb[12].mxu0 %v9735_v6  ;;  %v9741_v27 = vld [vmem:[#allocation90_spill] sm:$0xff]  ;;  %v9743_v6 = vld [vmem:[#allocation91_spill] sm:$0xff] }
  0xfd   : > { %5218 = vmatprep.mubr.f32.mxu1 %v9736_v7  ;;  %5698 = vmatprep.mubr.f32.mxu0 %v9737_v13  ;;  %v9744_v7 = vld [vmem:[#allocation10_spill] sm:$0xff]  ;;  %v9748_v13 = vld [vmem:[#allocation99_spill] sm:$0xff] }
  0xfe   : > { %6136 = vmatpush3.bf16.msra.mxu1 %v6133_v22  ;;  %6328 = vmatpush3.bf16.msra.mxu0 %v6325_v52  ;;  %v9745_v22 = vld [vmem:[#allocation95_spill] sm:$0xff]  ;;  %v9746_v52 = vld [vmem:[#allocation97_spill] sm:$0xff] }
  0xff   : > { %6138 = vmatprep.subr.bf16.mxu1 %v6137_v29  ;;  %6330 = vmatprep.subr.bf16.mxu0 %v6329_v32 }
 0x100   : > { %5219 = vmatmul.mubr.f32.gmra.mrb[14].mxu1 %v9738_v48  ;;  %5699 = vmatmul.mubr.f32.gmra.mrb[14].mxu0 %v9739_v56  ;;  %v9747_v48 = vld [vmem:[#allocation98_spill] sm:$0xff]  ;;  %v9749_v56 = vld [vmem:[#allocation100_spill] sm:$0xff] }
 0x101   : > { %5221 = vmatprep.mubr.f32.mxu1 %v9740_v36  ;;  %5701 = vmatprep.mubr.f32.mxu0 %v9741_v27  ;;  %v9750_v36 = vld [vmem:[#allocation101_spill] sm:$0xff]  ;;  %v9753_v27 = vld [vmem:[#allocation111_spill] sm:$0xff] }
 0x102   : > { %6140 = vmatpush3.bf16.msra.mxu1 %v6137_v29  ;;  %6332 = vmatpush3.bf16.msra.mxu0 %v6329_v32  ;;  %v9751_v29 = vld [vmem:[#allocation104_spill] sm:$0xff] }
 0x103   : > { %6142 = vmatprep.subr.bf16.mxu1 %v9742_v16  ;;  %6334 = vmatprep.subr.bf16.mxu0 %v9744_v7  ;;  %v9752_v32 = vld [vmem:[#allocation108_spill] sm:$0xff] }
 0x104   : > { %5222 = vmatmul.mubr.f32.gmra.mrb[16].mxu1 %v9743_v6  ;;  %5702 = vmatmul.mubr.f32.gmra.mrb[16].mxu0 %v9745_v22  ;;  %v9754_v6 = vld [vmem:[#allocation112_spill] sm:$0xff]  ;;  %v9756_v22 = vld [vmem:[#allocation115_spill] sm:$0xff] }
 0x105   : > { %5224 = vmatprep.mubr.f32.mxu1 %v9746_v52  ;;  %5704 = vmatprep.mubr.f32.mxu0 %v9747_v48  ;;  %v9757_v52 = vld [vmem:[#allocation117_spill] sm:$0xff] }
 0x106   : > { %v9758_v48 = vld [vmem:[#allocation121_spill] sm:$0xff] }
 0x108   : > { %5225 = vmatmul.mubr.f32.gmra.mrb[18].mxu1 %v9748_v13  ;;  %5705 = vmatmul.mubr.f32.gmra.mrb[18].mxu0 %v9749_v56  ;;  %v9759_v13 = vld [vmem:[#allocation122_spill] sm:$0xff]  ;;  %v9760_v56 = vld [vmem:[#allocation123_spill] sm:$0xff] }
 0x109   : > { %5227 = vmatprep.mubr.f32.mxu1 %v9750_v36  ;;  %5707 = vmatprep.mubr.f32.mxu0 %v9751_v29  ;;  %v9761_v36 = vld [vmem:[#allocation127_spill] sm:$0xff]  ;;  %v9784_v29 = vld [vmem:[#allocation14_spill] sm:$0xff] }
 0x10c   : > { %5228 = vmatmul.mubr.f32.gmra.mrb[20].mxu1 %v9752_v32  ;;  %5708 = vmatmul.mubr.f32.gmra.mrb[20].mxu0 %v9753_v27  ;;  %v9782_v27 = vld [vmem:[#allocation13_spill] sm:$0xff]  ;;  %v9783_v32 = vld [vmem:[#allocation46_spill] sm:$0xff] }
 0x10d   : > { %5230 = vmatprep.mubr.f32.mxu1 %v9754_v6  ;;  %5710 = vmatprep.mubr.f32.mxu0 %v9755_v61  ;;  %v9762_v61 = vld [vmem:[#allocation135_spill] sm:$0xff]  ;;  %v9781_v6 = vld [vmem:[#allocation45_spill] sm:$0xff] }
 0x110   : > { %5231 = vmatmul.mubr.f32.gmra.mrb[22].mxu1 %v9756_v22  ;;  %5711 = vmatmul.mubr.f32.gmra.mrb[22].mxu0 %v9757_v52  ;;  %v9763_v22 = vld [vmem:[#allocation138_spill] sm:$0xff] }
 0x111   : > { %5233 = vmatprep.mubr.f32.mxu1 %v9758_v48  ;;  %5713 = vmatprep.mubr.f32.mxu0 %v9759_v13  ;;  %v9764_v52 = vld [vmem:[#allocation142_spill] sm:$0xff]  ;;  %v9765_v48 = vld [vmem:[#allocation147_spill] sm:$0xff] }
 0x112   : > { %v9766_v13 = vld [vmem:[#allocation150_spill] sm:$0xff] }
 0x114   : > { %5234 = vmatmul.mubr.f32.gmra.mrb[24].mxu1 %v9760_v56  ;;  %5714 = vmatmul.mubr.f32.gmra.mrb[24].mxu0 %v9761_v36  ;;  %v9767_v56 = vld [vmem:[#allocation152_spill] sm:$0xff]  ;;  %v9768_v36 = vld [vmem:[#allocation153_spill] sm:$0xff] }
 0x115   : > { %5236 = vmatprep.mubr.f32.mxu1 %v8269_v49  ;;  %5716 = vmatprep.mubr.f32.mxu0 %v8271_v41  ;;  %v9769_v49 = vld [vmem:[#allocation155_spill] sm:$0xff]  ;;  %v9770_v41 = vld [vmem:[#allocation28_spill] sm:$0xff] }
 0x118   : > { %5237 = vmatmul.mubr.f32.gmra.mrb[26].mxu1 %v8274_v33  ;;  %5717 = vmatmul.mubr.f32.gmra.mrb[26].mxu0 %v8276_v45  ;;  %v9771_v33 = vld [vmem:[#allocation29_spill] sm:$0xff]  ;;  %v9772_v45 = vld [vmem:[#allocation30_spill] sm:$0xff] }
 0x119   : > { %5239 = vmatprep.mubr.f32.mxu1 %v9762_v61  ;;  %5719 = vmatprep.mubr.f32.mxu0 %v9763_v22  ;;  %v9773_v61 = vld [vmem:[#allocation32_spill] sm:$0xff]  ;;  %v9780_v22 = vld [vmem:[#allocation43_spill] sm:$0xff] }
 0x11c   : > { %5240 = vmatmul.mubr.f32.gmra.mrb[28].mxu1 %v9764_v52  ;;  %5720 = vmatmul.mubr.f32.gmra.mrb[28].mxu0 %v9765_v48  ;;  %v9774_v48 = vld [vmem:[#allocation38_spill] sm:$0xff] }
 0x11d   : > { %5242 = vmatprep.mubr.f32.mxu1 %v9766_v13  ;;  %5722 = vmatprep.mubr.f32.mxu0 %v9767_v56  ;;  %v9775_v13 = vld [vmem:[#allocation39_spill] sm:$0xff]  ;;  %v9779_v52 = vld [vmem:[#allocation42_spill] sm:$0xff] }
 0x11e   : > { %v9776_v56 = vld [vmem:[#allocation11_spill] sm:$0xff] }
 0x120   : > { %5243 = vmatmul.mubr.f32.gmra.mrb[30].mxu1 %v9768_v36  ;;  %5723 = vmatmul.mubr.f32.gmra.mrb[30].mxu0 %v9769_v49  ;;  %v9777_v36 = vld [vmem:[#allocation41_spill] sm:$0xff]  ;;  %v9778_v49 = vld [vmem:[#allocation12_spill] sm:$0xff] }
 0x121   : > { %5277 = vmatprep.mubr.f32.mxu1 %v9770_v41  ;;  %5757 = vmatprep.mubr.f32.mxu0 %v9771_v33 }
 0x124   : > { %5278 = vmatmul.mubr.f32.vlgmr.msra.gmra.mrb[0].mxu1 %v9772_v45  ;;  %5758 = vmatmul.mubr.f32.vlgmr.msra.gmra.mrb[0].mxu0 %v9773_v61 }
 0x125   : > { %6144 = vmatpush3.bf16.msra.mxu1 %v9742_v16  ;;  %6336 = vmatpush3.bf16.msra.mxu0 %v9744_v7  ;;  %v9800_v7 = vld [vmem:[#allocation19_spill] sm:$0xff]  ;;  %v9803_v16 = vld [vmem:[#allocation74_spill] sm:$0xff] }
 0x126   : > { %5280 = vmatprep.mubr.f32.mxu1 %v9774_v48  ;;  %5760 = vmatprep.mubr.f32.mxu0 %v9775_v13 }
 0x127   : > { %6146 = vmatprep.subr.bf16.mxu1 %v9776_v56  ;;  %6338 = vmatprep.subr.bf16.mxu0 %v9778_v49 }
 0x128   : > { %5281 = vmatmul.mubr.f32.gmra.mrb[2].mxu1 %v9777_v36  ;;  %5761 = vmatmul.mubr.f32.gmra.mrb[2].mxu0 %v9779_v52 }
 0x129   : > { %5283 = vmatprep.mubr.f32.mxu1 %v9780_v22  ;;  %5763 = vmatprep.mubr.f32.mxu0 %v9781_v6 }
 0x12a   : > { %6148 = vmatpush3.bf16.msra.mxu1 %v9776_v56  ;;  %6340 = vmatpush3.bf16.msra.mxu0 %v9778_v49  ;;  %v9790_v49 = vld [vmem:[#allocation16_spill] sm:$0xff] }
 0x12b   : > { %6150 = vmatprep.subr.bf16.mxu1 %v9782_v27  ;;  %6342 = vmatprep.subr.bf16.mxu0 %v9784_v29  ;;  %v9791_v56 = vld [vmem:[#allocation56_spill] sm:$0xff] }
 0x12c   : > { %5284 = vmatmul.mubr.f32.gmra.mrb[4].mxu1 %v9783_v32  ;;  %5764 = vmatmul.mubr.f32.gmra.mrb[4].mxu0 %v9785_v57 }
 0x12d   : > { %5286 = vmatprep.mubr.f32.mxu1 %v9786_v40  ;;  %5766 = vmatprep.mubr.f32.mxu0 %v9787_v3 }
 0x12e   : > { %6152 = vmatpush3.bf16.msra.mxu1 %v9782_v27  ;;  %6344 = vmatpush3.bf16.msra.mxu0 %v9784_v29  ;;  %v9795_v27 = vld [vmem:[#allocation62_spill] sm:$0xff] }
 0x12f   : > { %6154 = vmatprep.subr.bf16.mxu1 %v9788_v38  ;;  %6346 = vmatprep.subr.bf16.mxu0 %v9790_v49  ;;  %v9796_v29 = vld [vmem:[#allocation18_spill] sm:$0xff] }
 0x130   : > { %5287 = vmatmul.mubr.f32.gmra.mrb[6].mxu1 %v9789_v46  ;;  %5767 = vmatmul.mubr.f32.gmra.mrb[6].mxu0 %v9791_v56 }
 0x131   : > { %5289 = vmatprep.mubr.f32.mxu1 %v9792_v5  ;;  %5769 = vmatprep.mubr.f32.mxu0 %v9793_v1 }
 0x132   : > { %6156 = vmatpush3.bf16.msra.mxu1 %v9788_v38  ;;  %6348 = vmatpush3.bf16.msra.mxu0 %v9790_v49  ;;  %v9801_v38 = vld [vmem:[#allocation73_spill] sm:$0xff]  ;;  %v9802_v49 = vld [vmem:[#allocation20_spill] sm:$0xff] }
 0x133   : > { %6158 = vmatprep.subr.bf16.mxu1 %v9794_v37  ;;  %6350 = vmatprep.subr.bf16.mxu0 %v9796_v29 }
 0x134   : > { %5290 = vmatmul.mubr.f32.gmra.mrb[8].mxu1 %v9795_v27  ;;  %5770 = vmatmul.mubr.f32.gmra.mrb[8].mxu0 %v9797_v63 }
 0x135   : > { %5292 = vmatprep.mubr.f32.mxu1 %v9798_v42  ;;  %5772 = vmatprep.mubr.f32.mxu0 %v9799_v58 }
 0x136   : > { %6160 = vmatpush3.bf16.msra.mxu1 %v9794_v37  ;;  %6352 = vmatpush3.bf16.msra.mxu0 %v9796_v29  ;;  %v9807_v37 = vld [vmem:[#allocation78_spill] sm:$0xff]  ;;  %v9808_v29 = vld [vmem:[#allocation23_spill] sm:$0xff] }
 0x137   : > { %6162 = vmatprep.subr.bf16.mxu1 %v9800_v7  ;;  %6354 = vmatprep.subr.bf16.mxu0 %v9802_v49 }
 0x138   : > { %5293 = vmatmul.mubr.f32.gmra.mrb[10].mxu1 %v9801_v38  ;;  %5773 = vmatmul.mubr.f32.gmra.mrb[10].mxu0 %v9803_v16  ;;  %v9816_v16 = vld [vmem:[#allocation27_spill] sm:$0xff]  ;;  %v9819_v38 = vld [vmem:[#allocation88_spill] sm:$0xff] }
 0x139   : > { %5295 = vmatprep.mubr.f32.mxu1 %v9804_v26  ;;  %5775 = vmatprep.mubr.f32.mxu0 %v9805_v28  ;;  %v9812_v28 = vld [vmem:[#allocation24_spill] sm:$0xff] }
 0x13a   : > { %6164 = vmatpush3.bf16.msra.mxu1 %v9800_v7  ;;  %6356 = vmatpush3.bf16.msra.mxu0 %v9802_v49  ;;  %v9813_v49 = vand.u32 4294901760, %v7440_v30  ;;  %v9814_v7 = vand.u32 4294901760, %v7445_v31  ;;  %v9822_v30 = vld [vmem:[#allocation94_spill] sm:$0xff]  ;;  %v9823_v31 = vld [vmem:[#allocation96_spill] sm:$0xff] }
 0x13b   : > { %6166 = vmatprep.subr.bf16.mxu1 %v9806_v10  ;;  %6358 = vmatprep.subr.bf16.mxu0 %v9808_v29 }
 0x13c   : > { %5296 = vmatmul.mubr.f32.gmra.mrb[12].mxu1 %v9807_v37  ;;  %5776 = vmatmul.mubr.f32.gmra.mrb[12].mxu0 %v9809_v54  ;;  %v6173_v26 = vpack.c.bf16 %v9814_v7, %v9813_v49  ;;  %v9815_v37 = vld [vmem:[#allocation87_spill] sm:$0xff]  ;;  %v9817_v54 = vand.u32 4294901760, %v7460_v0  ;;  %v9824_v0 = vld [vmem:[#allocation102_spill] sm:$0xff]  ;;  %v9826_v7 = vld [vmem:[#allocation105_spill] sm:$0xff] }
 0x13d   : > { %5298 = vmatprep.mubr.f32.mxu1 %v9810_v20  ;;  %5778 = vmatprep.mubr.f32.mxu0 %v9811_v35  ;;  %v9818_v20 = vand.u32 4294901760, %v7469_v24  ;;  %v9825_v24 = vld [vmem:[#allocation103_spill] sm:$0xff]  ;;  %v9827_v49 = vld [vmem:[#allocation106_spill] sm:$0xff] }
 0x13e   : > { %6168 = vmatpush3.bf16.msra.mxu1 %v9806_v10  ;;  %6360 = vmatpush3.bf16.msra.mxu0 %v9808_v29  ;;  %v9820_v10 = vld [vmem:[#allocation92_spill] sm:$0xff]  ;;  %v9821_v29 = vld [vmem:[#allocation93_spill] sm:$0xff] }
 0x13f   : > { %6170 = vmatprep.subr.bf16.mxu1 %v9812_v28  ;;  %6362 = vmatprep.subr.bf16.mxu0 %v9816_v16  ;;  %v6365_v35 = vpack.c.bf16 %v9818_v20, %v9817_v54  ;;  %v9828_v20 = vld [vmem:[#allocation107_spill] sm:$0xff]  ;;  %v9829_v54 = vld [vmem:[#allocation109_spill] sm:$0xff] }
 0x140   : > { %5299 = vmatmul.mubr.f32.gmra.mrb[14].mxu1 %v9815_v37  ;;  %5779 = vmatmul.mubr.f32.gmra.mrb[14].mxu0 %v9819_v38 }
 0x141   : > { %5301 = vmatprep.mubr.f32.mxu1 %v9820_v10  ;;  %5781 = vmatprep.mubr.f32.mxu0 %v9821_v29  ;;  %v9833_v29 = vld [vmem:[#allocation118_spill] sm:$0xff] }
 0x142   : > { %6172 = vmatpush3.bf16.msra.mxu1 %v9812_v28  ;;  %6364 = vmatpush3.bf16.msra.mxu0 %v9816_v16  ;;  %v9830_v28 = vld [vmem:[#allocation110_spill] sm:$0xff]  ;;  %v9831_v16 = vld [vmem:[#allocation113_spill] sm:$0xff] }
 0x143   : > { %6174 = vmatprep.subr.bf16.mxu1 %v6173_v26  ;;  %6366 = vmatprep.subr.bf16.mxu0 %v6365_v35 }
 0x144   : > { %5302 = vmatmul.mubr.f32.gmra.mrb[16].mxu1 %v9822_v30  ;;  %5782 = vmatmul.mubr.f32.gmra.mrb[16].mxu0 %v9823_v31  ;;  %v9832_v30 = vld [vmem:[#allocation116_spill] sm:$0xff]  ;;  %v9834_v31 = vld [vmem:[#allocation119_spill] sm:$0xff] }
 0x145   : > { %5304 = vmatprep.mubr.f32.mxu1 %v9824_v0  ;;  %5784 = vmatprep.mubr.f32.mxu0 %v9825_v24  ;;  %v9835_v0 = vld [vmem:[#allocation120_spill] sm:$0xff] }
 0x146   : > { %v9836_v24 = vld [vmem:[#allocation124_spill] sm:$0xff] }
 0x148   : > { %5305 = vmatmul.mubr.f32.gmra.mrb[18].mxu1 %v9826_v7  ;;  %5785 = vmatmul.mubr.f32.gmra.mrb[18].mxu0 %v9827_v49  ;;  %v9837_v7 = vld [vmem:[#allocation125_spill] sm:$0xff]  ;;  %v9838_v49 = vld [vmem:[#allocation126_spill] sm:$0xff] }
 0x149   : > { %5307 = vmatprep.mubr.f32.mxu1 %v9828_v20  ;;  %5787 = vmatprep.mubr.f32.mxu0 %v9829_v54  ;;  %v9839_v20 = vld [vmem:[#allocation130_spill] sm:$0xff]  ;;  %v9840_v54 = vld [vmem:[#allocation136_spill] sm:$0xff] }
 0x14c   : > { %5308 = vmatmul.mubr.f32.gmra.mrb[20].mxu1 %v9830_v28  ;;  %5788 = vmatmul.mubr.f32.gmra.mrb[20].mxu0 %v9831_v16  ;;  %v9841_v28 = vld [vmem:[#allocation137_spill] sm:$0xff]  ;;  %v9842_v16 = vld [vmem:[#allocation139_spill] sm:$0xff] }
 0x14d   : > { %5310 = vmatprep.mubr.f32.mxu1 %v9832_v30  ;;  %5790 = vmatprep.mubr.f32.mxu0 %v9833_v29  ;;  %v9843_v30 = vld [vmem:[#allocation140_spill] sm:$0xff]  ;;  %v9844_v29 = vld [vmem:[#allocation141_spill] sm:$0xff] }
 0x150   : > { %5311 = vmatmul.mubr.f32.gmra.mrb[22].mxu1 %v9834_v31  ;;  %5791 = vmatmul.mubr.f32.gmra.mrb[22].mxu0 %v9835_v0  ;;  %v9845_v31 = vld [vmem:[#allocation143_spill] sm:$0xff]  ;;  %v9846_v0 = vld [vmem:[#allocation145_spill] sm:$0xff] }
 0x151   : > { %5313 = vmatprep.mubr.f32.mxu1 %v9836_v24  ;;  %5793 = vmatprep.mubr.f32.mxu0 %v9837_v7  ;;  %v9847_v24 = vld [vmem:[#allocation151_spill] sm:$0xff] }
 0x154   : > { %5314 = vmatmul.mubr.f32.gmra.mrb[24].mxu1 %v9838_v49  ;;  %5794 = vmatmul.mubr.f32.gmra.mrb[24].mxu0 %v9839_v20 }
 0x155   : > { %5316 = vmatprep.mubr.f32.mxu1 %v9840_v54  ;;  %5796 = vmatprep.mubr.f32.mxu0 %v9841_v28 }
 0x158   : > { %5317 = vmatmul.mubr.f32.gmra.mrb[26].mxu1 %v9842_v16  ;;  %5797 = vmatmul.mubr.f32.gmra.mrb[26].mxu0 %v9843_v30  ;;  %v9848_v16 = vand.u32 4294901760, %v9770_v41  ;;  %v9849_v30 = vand.u32 4294901760, %v9771_v33  ;;  %v9859_v33 = vand.u32 4294901760, %v7734_v53  ;;  %v9861_v41 = vand.u32 4294901760, %v7747_v14 }
 0x159   : > { %5319 = vmatprep.mubr.f32.mxu1 %v9844_v29  ;;  %5799 = vmatprep.mubr.f32.mxu0 %v9845_v31  ;;  %v9850_v31 = vand.u32 4294901760, %v7566_v25  ;;  %v9857_v25 = vand.u32 4294901760, %v9775_v13  ;;  %v9864_v13 = vand.u32 4294901760, %v9780_v22  ;;  %v9866_v53 = vand.u32 4294901760, %v7835_v23 }
 0x15a   : > { %v9873_v23 = vand.u32 4294901760, %v9787_v3  ;;  %v9879_v3 = vand.u32 4294901760, %v9791_v56  ;;  %v9880_v22 = vand.u32 4294901760, %v9792_v5  ;;  %v9885_v56 = vand.u32 4294901760, %v8117_v60 }
 0x15b   : > { %v9886_v5 = vand.u32 4294901760, %v8122_v9 }
 0x15c   : > { %5320 = vmatmul.mubr.f32.gmra.mrb[28].mxu1 %v9846_v0  ;;  %5800 = vmatmul.mubr.f32.gmra.mrb[28].mxu0 %v9847_v24  ;;  %v9851_v0 = vand.u32 4294901760, %v7632_v4  ;;  %v9852_v24 = vand.u32 4294901760, %v9772_v45  ;;  %v9858_v4 = vand.u32 4294901760, %v7729_v2  ;;  %v9865_v2 = vand.u32 4294901760, %v9781_v6 }
 0x15d   : > { %5322 = vmatprep.mubr.f32.mxu1 %v8385_v51  ;;  %5802 = vmatprep.mubr.f32.mxu0 %v8394_v62  ;;  %v9853_v62 = vand.u32 4294901760, %v7641_v50  ;;  %v9871_v6 = vand.u32 4294901760, %v9785_v57  ;;  %v9877_v57 = vand.u32 4294901760, %v7981_v34 }
 0x15e   : > { %v6177_v29 = vpack.c.bf16 %v9851_v0, %v9850_v31  ;;  %v6181_v50 = vpack.c.bf16 %v9859_v33, %v9858_v4  ;;  %v9896_v31 = vld [vmem:[#allocation129_spill] sm:$0xff] }
 0x15f   : > { %v9902_v4 = vld [vmem:[#allocation77_spill] sm:$0xff] }
 0x160   : > { %5323 = vmatmul.mubr.f32.gmra.mrb[30].mxu1 %v8397_v55  ;;  %5803 = vmatmul.mubr.f32.gmra.mrb[30].mxu0 %v8407_v47  ;;  %v9854_v55 = vand.u32 4294901760, %v7646_v39  ;;  %v9855_v47 = vand.u32 4294901760, %v9773_v61  ;;  %v9860_v39 = vand.u32 4294901760, %v9777_v36  ;;  %v9875_v36 = vand.u32 4294901760, %v7968_v11 }
 0x161   : > { %5357 = vmatprep.mubr.f32.mxu1 %v9848_v16  ;;  %5837 = vmatprep.mubr.f32.mxu0 %v9849_v30  ;;  %v9856_v16 = vand.u32 4294901760, %v9774_v48  ;;  %v9882_v11 = vand.u32 4294901760, %v8067_v8  ;;  %v9889_v8 = vand.u32 4294901760, %v9799_v58 }
 0x162   : > { %v6369_v51 = vpack.c.bf16 %v9854_v55, %v9853_v62  ;;  %v9869_v62 = vand.u32 4294901760, %v7885_v18  ;;  %v9870_v55 = vand.u32 4294901760, %v7890_v59  ;;  %v9876_v59 = vand.u32 4294901760, %v9789_v46 }
 0x163   : > { %v9883_v46 = vand.u32 4294901760, %v8109_v43  ;;  %v9890_v43 = vand.u32 4294901760, %v8197_v19  ;;  %v9903_v19 = vand.u32 4294901760, %v9902_v4  ;;  %v9959_v4 = vand.u32 4294901760, %v9839_v20  ;;  %v9970_v20 = vld [vmem:[#allocation145_spill] sm:$0xff] }
 0x164   : > { %5358 = vmatmul.mubr.f32.vlgmr.msra.gmra.mrb[0].mxu1 %v9852_v24  ;;  %5838 = vmatmul.mubr.f32.vlgmr.msra.gmra.mrb[0].mxu0 %v9855_v47  ;;  %v9867_v47 = vand.u32 4294901760, %v7877_v15  ;;  %v6377_v61 = vpack.c.bf16 %v9870_v55, %v9869_v62  ;;  %v9874_v15 = vand.u32 4294901760, %v7963_v21  ;;  %v9881_v21 = vand.u32 4294901760, %v9793_v1  ;;  %v9898_v24 = vld [vmem:[#allocation74_spill] sm:$0xff]  ;;  %v9916_v62 = vld [vmem:[#allocation84_spill] sm:$0xff] }
 0x165   : > { %6176 = vmatpush3.bf16.msra.mxu1 %v6173_v26  ;;  %6368 = vmatpush3.bf16.msra.mxu0 %v6365_v35  ;;  %v9862_v35 = vand.u32 4294901760, %v7757_v17  ;;  %v9863_v26 = vand.u32 4294901760, %v9779_v52  ;;  %v9868_v17 = vand.u32 4294901760, %v9783_v32  ;;  %v6193_v34 = vpack.c.bf16 %v9883_v46, %v9882_v11  ;;  %v9892_v32 = vld [vmem:[#allocation73_spill] sm:$0xff] }
 0x166   : > { %5360 = vmatprep.mubr.f32.mxu1 %v9856_v16  ;;  %5840 = vmatprep.mubr.f32.mxu0 %v9857_v25  ;;  %v6185_v14 = vpack.c.bf16 %v9867_v47, %v9866_v53  ;;  %v6189_v18 = vpack.c.bf16 %v9875_v36, %v9874_v15  ;;  %v6385_v52 = vpack.c.bf16 %v9886_v5, %v9885_v56  ;;  %v9887_v1 = vand.u32 4294901760, %v9797_v63  ;;  %v9894_v63 = vld [vmem:[#allocation128_spill] sm:$0xff]  ;;  %v9900_v16 = vld [vmem:[#allocation75_spill] sm:$0xff]  ;;  %v9923_v36 = vld [vmem:[#allocation93_spill] sm:$0xff] }
 0x167   : > { %6178 = vmatprep.subr.bf16.mxu1 %v6177_v29  ;;  %6370 = vmatprep.subr.bf16.mxu0 %v6369_v51  ;;  %v6373_v45 = vpack.c.bf16 %v9862_v35, %v9861_v41  ;;  %v9893_v9 = vand.u32 4294901760, %v9892_v32  ;;  %v9895_v30 = vand.u32 4294901760, %v9894_v63  ;;  %v9899_v58 = vand.u32 4294901760, %v9898_v24  ;;  %v9908_v35 = vld [vmem:[#allocation78_spill] sm:$0xff]  ;;  %v9935_v11 = vld [vmem:[#allocation105_spill] sm:$0xff]  ;;  %v9939_v56 = vld [vmem:[#allocation107_spill] sm:$0xff] }
 0x168   : > { %5361 = vmatmul.mubr.f32.gmra.mrb[2].mxu1 %v9860_v39  ;;  %5841 = vmatmul.mubr.f32.gmra.mrb[2].mxu0 %v9863_v26  ;;  %v9901_v25 = vand.u32 4294901760, %v9900_v16  ;;  %v9910_v26 = vld [vmem:[#allocation148_spill] sm:$0xff]  ;;  %v9917_v55 = vand.u32 4294901760, %v9916_v62  ;;  %v9922_v15 = vand.u32 4294901760, %v9820_v10  ;;  %v9933_v10 = vld [vmem:[#allocation103_spill] sm:$0xff]  ;;  %v9936_v46 = vand.u32 4294901760, %v9935_v11 }
 0x169   : > { %5363 = vmatprep.mubr.f32.mxu1 %v9864_v13  ;;  %5843 = vmatprep.mubr.f32.mxu0 %v9865_v2  ;;  %v9911_v13 = vand.u32 4294901760, %v9910_v26  ;;  %v9912_v2 = vld [vmem:[#allocation149_spill] sm:$0xff]  ;;  %v9940_v5 = vand.u32 4294901760, %v9939_v56  ;;  %v9955_v24 = vld [vmem:[#allocation124_spill] sm:$0xff]  ;;  %v9957_v16 = vand.u32 4294901760, %v9837_v7  ;;  %v9971_v26 = vand.u32 4294901760, %v9970_v20 }
 0x16a   : > { %6180 = vmatpush3.bf16.msra.mxu1 %v6177_v29  ;;  %6372 = vmatpush3.bf16.msra.mxu0 %v6369_v51  ;;  %v9872_v51 = vand.u32 4294901760, %v9786_v40  ;;  %v9878_v40 = vand.u32 4294901760, %v7989_v12  ;;  %v9884_v12 = vand.u32 4294901760, %v9795_v27  ;;  %v9888_v29 = vand.u32 4294901760, %v9798_v42  ;;  %v9966_v7 = vld [vmem:[#allocation141_spill] sm:$0xff]  ;;  %v9980_v62 = vld [vmem:[#allocation158_spill] sm:$0xff] }
 0x16b   : > { %6182 = vmatprep.subr.bf16.mxu1 %v6181_v50  ;;  %6374 = vmatprep.subr.bf16.mxu0 %v6373_v45  ;;  %v9891_v27 = vand.u32 4294901760, %v8204_v44  ;;  %v9897_v42 = vand.u32 4294901760, %v9896_v31  ;;  %v9904_v44 = vld [vmem:[#allocation144_spill] sm:$0xff]  ;;  %v9913_v53 = vand.u32 4294901760, %v9912_v2  ;;  %v9999_v11 = vld [vmem:[#allocation50_spill] sm:$0xff]  ;;  %v10003_v56 = vld [vmem:[#allocation53_spill] sm:$0xff] }
 0x16c   : > { %5364 = vmatmul.mubr.f32.gmra.mrb[4].mxu1 %v9868_v17  ;;  %5844 = vmatmul.mubr.f32.gmra.mrb[4].mxu0 %v9871_v6  ;;  %v6381_v48 = vpack.c.bf16 %v9878_v40, %v9877_v57  ;;  %v9905_v33 = vand.u32 4294901760, %v9904_v44  ;;  %v9926_v57 = vld [vmem:[#allocation94_spill] sm:$0xff]  ;;  %v9961_v44 = vand.u32 4294901760, %v9841_v28  ;;  %v10034_v20 = vld [vmem:[#allocation99_spill] sm:$0xff] }
 0x16d   : > { %5366 = vmatprep.mubr.f32.mxu1 %v9872_v51  ;;  %5846 = vmatprep.mubr.f32.mxu0 %v9873_v23  ;;  %v6197_v60 = vpack.c.bf16 %v9891_v27, %v9890_v43  ;;  %v6389_v0 = vpack.c.bf16 %v9897_v42, %v9895_v30  ;;  %v6393_v47 = vpack.c.bf16 %v9913_v53, %v9911_v13  ;;  %v9920_v51 = vand.u32 4294901760, %v9815_v37  ;;  %v9929_v37 = vld [vmem:[#allocation96_spill] sm:$0xff]  ;;  %v9945_v43 = vld [vmem:[#allocation113_spill] sm:$0xff]  ;;  %v9951_v30 = vld [vmem:[#allocation119_spill] sm:$0xff] }
 0x16e   : > { %6184 = vmatpush3.bf16.msra.mxu1 %v6181_v50  ;;  %6376 = vmatpush3.bf16.msra.mxu0 %v6373_v45  ;;  %v9906_v50 = vld [vmem:[#allocation146_spill] sm:$0xff]  ;;  %v9909_v45 = vand.u32 4294901760, %v9908_v35  ;;  %v9921_v23 = vand.u32 4294901760, %v9819_v38  ;;  %v9927_v40 = vand.u32 4294901760, %v9926_v57  ;;  %v9946_v27 = vand.u32 4294901760, %v9945_v43  ;;  %v9953_v42 = vld [vmem:[#allocation120_spill] sm:$0xff] }
 0x16f   : > { %6186 = vmatprep.subr.bf16.mxu1 %v6185_v14  ;;  %6378 = vmatprep.subr.bf16.mxu0 %v6377_v61  ;;  %v9907_v39 = vand.u32 4294901760, %v9906_v50  ;;  %v9931_v38 = vld [vmem:[#allocation102_spill] sm:$0xff]  ;;  %v9952_v31 = vand.u32 4294901760, %v9951_v30  ;;  %v9967_v35 = vand.u32 4294901760, %v9966_v7  ;;  %v9976_v53 = vld [vmem:[#allocation156_spill] sm:$0xff]  ;;  %v9989_v57 = vld [vmem:[#allocation35_spill] sm:$0xff] }
 0x170   : > { %5367 = vmatmul.mubr.f32.gmra.mrb[6].mxu1 %v9876_v59  ;;  %5847 = vmatmul.mubr.f32.gmra.mrb[6].mxu0 %v9879_v3  ;;  %v9925_v59 = vld [vmem:[#allocation9_spill] sm:$0xff]  ;;  %v9930_v3 = vand.u32 4294901760, %v9929_v37  ;;  %v9974_v28 = vld [vmem:[#allocation154_spill] sm:$0xff]  ;;  %v9991_v37 = vld [vmem:[#allocation36_spill] sm:$0xff] }
 0x171   : > { %5369 = vmatprep.mubr.f32.mxu1 %v9880_v22  ;;  %5849 = vmatprep.mubr.f32.mxu0 %v9881_v21  ;;  %v6201_v41 = vpack.c.bf16 %v9907_v39, %v9905_v33  ;;  %v9932_v22 = vand.u32 4294901760, %v9931_v38  ;;  %v9934_v21 = vand.u32 4294901760, %v9933_v10  ;;  %v9962_v33 = vld [vmem:[#allocation139_spill] sm:$0xff]  ;;  %v9964_v39 = vld [vmem:[#allocation140_spill] sm:$0xff]  ;;  %v9975_v2 = vand.u32 4294901760, %v9974_v28 }
 0x172   : > { %6188 = vmatpush3.bf16.msra.mxu1 %v6185_v14  ;;  %6380 = vmatpush3.bf16.msra.mxu0 %v6377_v61  ;;  %v9914_v14 = vld [vmem:[#allocation81_spill] sm:$0xff]  ;;  %v9918_v61 = vld [vmem:[#allocation86_spill] sm:$0xff]  ;;  %v9963_v50 = vand.u32 4294901760, %v9962_v33  ;;  %v9993_v38 = vld [vmem:[#allocation40_spill] sm:$0xff] }
 0x173   : > { %6190 = vmatprep.subr.bf16.mxu1 %v6189_v18  ;;  %6382 = vmatprep.subr.bf16.mxu0 %v6381_v48  ;;  %v9915_v17 = vand.u32 4294901760, %v9914_v14  ;;  %v9919_v6 = vand.u32 4294901760, %v9918_v61  ;;  %v9978_v14 = vld [vmem:[#allocation157_spill] sm:$0xff]  ;;  %v9982_v61 = vld [vmem:[#allocation22_spill] sm:$0xff]  ;;  %v9997_v10 = vld [vmem:[#allocation47_spill] sm:$0xff] }
 0x174   : > { %5370 = vmatmul.mubr.f32.gmra.mrb[8].mxu1 %v9884_v12  ;;  %5850 = vmatmul.mubr.f32.gmra.mrb[8].mxu0 %v9887_v1  ;;  %v10009_v43 = vld [vmem:[#allocation63_spill] sm:$0xff]  ;;  %v10015_v30 = vld [vmem:[#allocation68_spill] sm:$0xff] }
 0x175   : > { %5372 = vmatprep.mubr.f32.mxu1 %v9888_v29  ;;  %5852 = vmatprep.mubr.f32.mxu0 %v9889_v8  ;;  %v9943_v29 = vld [vmem:[#allocation110_spill] sm:$0xff]  ;;  %v10026_v33 = vld [vmem:[#allocation27_spill] sm:$0xff]  ;;  %v10038_v28 = vld [vmem:[#allocation108_spill] sm:$0xff] }
 0x176   : > { %6192 = vmatpush3.bf16.msra.mxu1 %v6189_v18  ;;  %6384 = vmatpush3.bf16.msra.mxu0 %v6381_v48  ;;  %v9924_v18 = vand.u32 4294901760, %v9923_v36  ;;  %v9928_v48 = vld [vmem:[#allocation10_spill] sm:$0xff]  ;;  %v9944_v8 = vand.u32 4294901760, %v9943_v29  ;;  %v10007_v29 = vld [vmem:[#allocation59_spill] sm:$0xff] }
 0x177   : > { %6194 = vmatprep.subr.bf16.mxu1 %v6193_v34  ;;  %6386 = vmatprep.subr.bf16.mxu0 %v6385_v52  ;;  %v9987_v36 = vld [vmem:[#allocation34_spill] sm:$0xff]  ;;  %v10030_v7 = vld [vmem:[#allocation91_spill] sm:$0xff] }
 0x178   : > { %5373 = vmatmul.mubr.f32.gmra.mrb[10].mxu1 %v9893_v9  ;;  %5853 = vmatmul.mubr.f32.gmra.mrb[10].mxu0 %v9899_v58  ;;  %v9949_v9 = vld [vmem:[#allocation118_spill] sm:$0xff]  ;;  %v9956_v58 = vand.u32 4294901760, %v9955_v24  ;;  %v10019_v24 = vld [vmem:[#allocation76_spill] sm:$0xff] }
 0x179   : > { %5375 = vmatprep.mubr.f32.mxu1 %v9901_v25  ;;  %5855 = vmatprep.mubr.f32.mxu0 %v9903_v19  ;;  %v9950_v63 = vand.u32 4294901760, %v9949_v9  ;;  %v9958_v25 = vand.u32 4294901760, %v9838_v49  ;;  %v9960_v19 = vand.u32 4294901760, %v9840_v54  ;;  %v9968_v49 = vld [vmem:[#allocation143_spill] sm:$0xff] }
 0x17a   : > { %6196 = vmatpush3.bf16.msra.mxu1 %v6193_v34  ;;  %6388 = vmatpush3.bf16.msra.mxu0 %v6385_v52  ;;  %v9937_v34 = vld [vmem:[#allocation106_spill] sm:$0xff]  ;;  %v9941_v52 = vld [vmem:[#allocation109_spill] sm:$0xff]  ;;  %v9972_v54 = vld [vmem:[#allocation151_spill] sm:$0xff] }
 0x17b   : > { %6198 = vmatprep.subr.bf16.mxu1 %v6197_v60  ;;  %6390 = vmatprep.subr.bf16.mxu0 %v6389_v0  ;;  %v9938_v12 = vand.u32 4294901760, %v9937_v34  ;;  %v9942_v1 = vand.u32 4294901760, %v9941_v52  ;;  %v9973_v13 = vand.u32 4294901760, %v9972_v54  ;;  %v10001_v34 = vld [vmem:[#allocation51_spill] sm:$0xff]  ;;  %v10005_v52 = vld [vmem:[#allocation58_spill] sm:$0xff]  ;;  %v10036_v54 = vld [vmem:[#allocation101_spill] sm:$0xff] }
 0x17c   : > { %5376 = vmatmul.mubr.f32.gmra.mrb[12].mxu1 %v9909_v45  ;;  %5856 = vmatmul.mubr.f32.gmra.mrb[12].mxu0 %v9915_v17  ;;  %v9969_v45 = vand.u32 4294901760, %v9968_v49  ;;  %v9979_v17 = vand.u32 4294901760, %v9978_v14  ;;  %v10013_v9 = vld [vmem:[#allocation67_spill] sm:$0xff]  ;;  %v10032_v49 = vld [vmem:[#allocation97_spill] sm:$0xff] }
 0x17d   : > { %5378 = vmatprep.mubr.f32.mxu1 %v9917_v55  ;;  %5858 = vmatprep.mubr.f32.mxu0 %v9919_v6  ;;  %v9981_v55 = vand.u32 4294901760, %v9980_v62  ;;  %v9983_v6 = vld [vmem:[#allocation25_spill] sm:$0xff]  ;;  %v10042_v14 = vld [vmem:[#allocation115_spill] sm:$0xff] }
 0x17e   : > { %6200 = vmatpush3.bf16.msra.mxu1 %v6197_v60  ;;  %6392 = vmatpush3.bf16.msra.mxu0 %v6389_v0  ;;  %v9947_v60 = vld [vmem:[#allocation116_spill] sm:$0xff]  ;;  %v9954_v0 = vand.u32 4294901760, %v9953_v42  ;;  %v10044_v62 = vld [vmem:[#allocation121_spill] sm:$0xff] }
 0x17f   : > { %6202 = vmatprep.subr.bf16.mxu1 %v6201_v41  ;;  %6394 = vmatprep.subr.bf16.mxu0 %v6393_v47  ;;  %v9948_v32 = vand.u32 4294901760, %v9947_v60  ;;  %v10011_v60 = vld [vmem:[#allocation66_spill] sm:$0xff]  ;;  %v10017_v42 = vld [vmem:[#allocation72_spill] sm:$0xff] }
 0x180   : > { %5379 = vmatmul.mubr.f32.gmra.mrb[14].mxu1 %v9920_v51  ;;  %5859 = vmatmul.mubr.f32.gmra.mrb[14].mxu0 %v9921_v23  ;;  %v9984_v51 = vld [vmem:[#allocation26_spill] sm:$0xff]  ;;  %v9985_v23 = vld [vmem:[#allocation31_spill] sm:$0xff] }
 0x181   : > { %5381 = vmatprep.mubr.f32.mxu1 %v9922_v15  ;;  %5861 = vmatprep.mubr.f32.mxu0 %v9924_v18  ;;  %v9986_v15 = vld [vmem:[#allocation33_spill] sm:$0xff]  ;;  %v9988_v18 = vld [vmem:[#allocation11_spill] sm:$0xff] }
 0x182   : > { %6204 = vmatpush3.bf16.msra.mxu1 %v6201_v41  ;;  %6396 = vmatpush3.bf16.msra.mxu0 %v6393_v47  ;;  %v9965_v41 = vand.u32 4294901760, %v9964_v39  ;;  %v9977_v47 = vand.u32 4294901760, %v9976_v53  ;;  %v10028_v39 = vld [vmem:[#allocation89_spill] sm:$0xff]  ;;  %v10040_v53 = vld [vmem:[#allocation112_spill] sm:$0xff] }
 0x183   : > { %6206 = vmatprep.subr.bf16.mxu1 %v9925_v59  ;;  %6398 = vmatprep.subr.bf16.mxu0 %v9928_v48 }
 0x184   : > { %5382 = vmatmul.mubr.f32.gmra.mrb[16].mxu1 %v9927_v40  ;;  %5862 = vmatmul.mubr.f32.gmra.mrb[16].mxu0 %v9930_v3  ;;  %v9990_v40 = vld [vmem:[#allocation12_spill] sm:$0xff]  ;;  %v9992_v3 = vld [vmem:[#allocation37_spill] sm:$0xff] }
 0x185   : > { %5384 = vmatprep.mubr.f32.mxu1 %v9932_v22  ;;  %5864 = vmatprep.mubr.f32.mxu0 %v9934_v21  ;;  %v9996_v22 = vld [vmem:[#allocation14_spill] sm:$0xff]  ;;  %v9998_v21 = vld [vmem:[#allocation48_spill] sm:$0xff] }
 0x188   : > { %5385 = vmatmul.mubr.f32.gmra.mrb[18].mxu1 %v9936_v46  ;;  %5865 = vmatmul.mubr.f32.gmra.mrb[18].mxu0 %v9938_v12  ;;  %v10000_v46 = vld [vmem:[#allocation15_spill] sm:$0xff]  ;;  %v10002_v12 = vld [vmem:[#allocation16_spill] sm:$0xff] }
 0x189   : > { %5387 = vmatprep.mubr.f32.mxu1 %v9940_v5  ;;  %5867 = vmatprep.mubr.f32.mxu0 %v9942_v1  ;;  %v10004_v5 = vld [vmem:[#allocation57_spill] sm:$0xff] }
 0x18a   : > { %v10006_v1 = vld [vmem:[#allocation17_spill] sm:$0xff] }
 0x18c   : > { %5388 = vmatmul.mubr.f32.gmra.mrb[20].mxu1 %v9944_v8  ;;  %5868 = vmatmul.mubr.f32.gmra.mrb[20].mxu0 %v9946_v27  ;;  %v10008_v8 = vld [vmem:[#allocation18_spill] sm:$0xff]  ;;  %v10010_v27 = vld [vmem:[#allocation65_spill] sm:$0xff] }
 0x18d   : > { %5390 = vmatprep.mubr.f32.mxu1 %v9948_v32  ;;  %5870 = vmatprep.mubr.f32.mxu0 %v9950_v63  ;;  %v10012_v32 = vld [vmem:[#allocation19_spill] sm:$0xff]  ;;  %v10014_v63 = vld [vmem:[#allocation20_spill] sm:$0xff] }
 0x190   : > { %5391 = vmatmul.mubr.f32.gmra.mrb[22].mxu1 %v9952_v31  ;;  %5871 = vmatmul.mubr.f32.gmra.mrb[22].mxu0 %v9954_v0  ;;  %v10016_v31 = vld [vmem:[#allocation69_spill] sm:$0xff] }
 0x191   : > { %5393 = vmatprep.mubr.f32.mxu1 %v9956_v58  ;;  %5873 = vmatprep.mubr.f32.mxu0 %v9957_v16  ;;  %v10018_v0 = vld [vmem:[#allocation21_spill] sm:$0xff]  ;;  %v10020_v58 = vld [vmem:[#allocation23_spill] sm:$0xff] }
 0x192   : > { %v10021_v16 = vld [vmem:[#allocation79_spill] sm:$0xff] }
 0x194   : > { %5394 = vmatmul.mubr.f32.gmra.mrb[24].mxu1 %v9958_v25  ;;  %5874 = vmatmul.mubr.f32.gmra.mrb[24].mxu0 %v9959_v4  ;;  %v10022_v25 = vld [vmem:[#allocation80_spill] sm:$0xff]  ;;  %v10023_v4 = vld [vmem:[#allocation82_spill] sm:$0xff] }
 0x195   : > { %5396 = vmatprep.mubr.f32.mxu1 %v9960_v19  ;;  %5876 = vmatprep.mubr.f32.mxu0 %v9961_v44  ;;  %v10024_v19 = vld [vmem:[#allocation24_spill] sm:$0xff]  ;;  %v10025_v44 = vld [vmem:[#allocation83_spill] sm:$0xff] }
 0x198   : > { %5397 = vmatmul.mubr.f32.gmra.mrb[26].mxu1 %v9963_v50  ;;  %5877 = vmatmul.mubr.f32.gmra.mrb[26].mxu0 %v9965_v41  ;;  %v10027_v50 = vld [vmem:[#allocation85_spill] sm:$0xff]  ;;  %v10029_v41 = vld [vmem:[#allocation90_spill] sm:$0xff] }
 0x199   : > { %5399 = vmatprep.mubr.f32.mxu1 %v9967_v35  ;;  %5879 = vmatprep.mubr.f32.mxu0 %v9969_v45  ;;  %v10031_v35 = vld [vmem:[#allocation95_spill] sm:$0xff]  ;;  %v10033_v45 = vld [vmem:[#allocation98_spill] sm:$0xff] }
 0x19c   : > { %5400 = vmatmul.mubr.f32.gmra.mrb[28].mxu1 %v9971_v26  ;;  %5880 = vmatmul.mubr.f32.gmra.mrb[28].mxu0 %v9973_v13  ;;  %v10035_v26 = vld [vmem:[#allocation100_spill] sm:$0xff] }
 0x19d   : > { %5402 = vmatprep.mubr.f32.mxu1 %v9975_v2  ;;  %5882 = vmatprep.mubr.f32.mxu0 %v9977_v47  ;;  %v10037_v13 = vld [vmem:[#allocation104_spill] sm:$0xff]  ;;  %v10039_v2 = vld [vmem:[#allocation111_spill] sm:$0xff]  ;;  %v10041_v47 = vld [vmem:[#allocation114_spill] sm:$0xff] }
 0x1a0   : > { %5403 = vmatmul.mubr.f32.gmra.mrb[30].mxu1 %v9979_v17  ;;  %5883 = vmatmul.mubr.f32.gmra.mrb[30].mxu0 %v9981_v55  ;;  %v10043_v17 = vld [vmem:[#allocation117_spill] sm:$0xff]  ;;  %v10045_v55 = vld [vmem:[#allocation122_spill] sm:$0xff] }
 0x1a1   : > { %5437 = vmatprep.mubr.f32.mxu1 %v9982_v61  ;;  %5917 = vmatprep.mubr.f32.mxu0 %v9983_v6 }
 0x1a4   : > { %5438 = vmatmul.mubr.f32.vlgmr.msra.gmra.mrb[0].mxu1 %v9984_v51  ;;  %5918 = vmatmul.mubr.f32.vlgmr.msra.gmra.mrb[0].mxu0 %v9985_v23 }
 0x1a5   : > { %6208 = vmatpush3.bf16.msra.mxu1 %v9925_v59  ;;  %6400 = vmatpush3.bf16.msra.mxu0 %v9928_v48  ;;  %v9994_v59 = vld [vmem:[#allocation13_spill] sm:$0xff]  ;;  %v9995_v48 = vld [vmem:[#allocation44_spill] sm:$0xff] }
 0x1a6   : > { %5440 = vmatprep.mubr.f32.mxu1 %v9986_v15  ;;  %5920 = vmatprep.mubr.f32.mxu0 %v9987_v36 }
 0x1a7   : > { %6210 = vmatprep.subr.bf16.mxu1 %v9988_v18  ;;  %6402 = vmatprep.subr.bf16.mxu0 %v9990_v40 }
 0x1a8   : > { %5441 = vmatmul.mubr.f32.gmra.mrb[2].mxu1 %v9989_v57  ;;  %5921 = vmatmul.mubr.f32.gmra.mrb[2].mxu0 %v9991_v37 }
 0x1a9   : > { %5443 = vmatprep.mubr.f32.mxu1 %v9992_v3  ;;  %5923 = vmatprep.mubr.f32.mxu0 %v9993_v38 }
 0x1aa   : > { %6212 = vmatpush3.bf16.msra.mxu1 %v9988_v18  ;;  %6404 = vmatpush3.bf16.msra.mxu0 %v9990_v40  ;;  %v10046_v18 = vld [vmem:[#allocation123_spill] sm:$0xff] }
 0x1ab   : > { %6214 = vmatprep.subr.bf16.mxu1 %v9994_v59  ;;  %6406 = vmatprep.subr.bf16.mxu0 %v9996_v22  ;;  %v10047_v40 = vld [vmem:[#allocation127_spill] sm:$0xff] }
 0x1ac   : > { %5444 = vmatmul.mubr.f32.gmra.mrb[4].mxu1 %v9995_v48  ;;  %5924 = vmatmul.mubr.f32.gmra.mrb[4].mxu0 %v9997_v10 }
 0x1ad   : > { %5446 = vmatprep.mubr.f32.mxu1 %v9998_v21  ;;  %5926 = vmatprep.mubr.f32.mxu0 %v9999_v11 }
 0x1ae   : > { %6216 = vmatpush3.bf16.msra.mxu1 %v9994_v59  ;;  %6408 = vmatpush3.bf16.msra.mxu0 %v9996_v22  ;;  %v10048_v59 = vld [vmem:[#allocation131_spill] sm:$0xff]  ;;  %v10049_v22 = vld [vmem:[#allocation132_spill] sm:$0xff] }
 0x1af   : > { %6218 = vmatprep.subr.bf16.mxu1 %v10000_v46  ;;  %6410 = vmatprep.subr.bf16.mxu0 %v10002_v12 }
 0x1b0   : > { %5447 = vmatmul.mubr.f32.gmra.mrb[6].mxu1 %v10001_v34  ;;  %5927 = vmatmul.mubr.f32.gmra.mrb[6].mxu0 %v10003_v56 }
 0x1b1   : > { %5449 = vmatprep.mubr.f32.mxu1 %v10004_v5  ;;  %5929 = vmatprep.mubr.f32.mxu0 %v10005_v52 }
 0x1b2   : > { %6220 = vmatpush3.bf16.msra.mxu1 %v10000_v46  ;;  %6412 = vmatpush3.bf16.msra.mxu0 %v10002_v12  ;;  %v10050_v46 = vld [vmem:[#allocation133_spill] sm:$0xff]  ;;  %v10051_v12 = vld [vmem:[#allocation134_spill] sm:$0xff] }
 0x1b3   : > { %6222 = vmatprep.subr.bf16.mxu1 %v10006_v1  ;;  %6414 = vmatprep.subr.bf16.mxu0 %v10008_v8 }
 0x1b4   : > { %5450 = vmatmul.mubr.f32.gmra.mrb[8].mxu1 %v10007_v29  ;;  %5930 = vmatmul.mubr.f32.gmra.mrb[8].mxu0 %v10009_v43 }
 0x1b5   : > { %5452 = vmatprep.mubr.f32.mxu1 %v10010_v27  ;;  %5932 = vmatprep.mubr.f32.mxu0 %v10011_v60 }
 0x1b6   : > { %6224 = vmatpush3.bf16.msra.mxu1 %v10006_v1  ;;  %6416 = vmatpush3.bf16.msra.mxu0 %v10008_v8  ;;  %v10052_v1 = vld [vmem:[#allocation135_spill] sm:$0xff]  ;;  %v10053_v8 = vld [vmem:[#allocation138_spill] sm:$0xff] }
 0x1b7   : > { %6226 = vmatprep.subr.bf16.mxu1 %v10012_v32  ;;  %6418 = vmatprep.subr.bf16.mxu0 %v10014_v63 }
 0x1b8   : > { %5453 = vmatmul.mubr.f32.gmra.mrb[10].mxu1 %v10013_v9  ;;  %5933 = vmatmul.mubr.f32.gmra.mrb[10].mxu0 %v10015_v30 }
 0x1b9   : > { %5455 = vmatprep.mubr.f32.mxu1 %v10016_v31  ;;  %5935 = vmatprep.mubr.f32.mxu0 %v10017_v42 }
 0x1ba   : > { %6228 = vmatpush3.bf16.msra.mxu1 %v10012_v32  ;;  %6420 = vmatpush3.bf16.msra.mxu0 %v10014_v63  ;;  %v10054_v32 = vld [vmem:[#allocation142_spill] sm:$0xff]  ;;  %v10055_v63 = vld [vmem:[#allocation147_spill] sm:$0xff] }
 0x1bb   : > { %6230 = vmatprep.subr.bf16.mxu1 %v10018_v0  ;;  %6422 = vmatprep.subr.bf16.mxu0 %v10020_v58 }
 0x1bc   : > { %5456 = vmatmul.mubr.f32.gmra.mrb[12].mxu1 %v10019_v24  ;;  %5936 = vmatmul.mubr.f32.gmra.mrb[12].mxu0 %v10021_v16 }
 0x1bd   : > { %5458 = vmatprep.mubr.f32.mxu1 %v10022_v25  ;;  %5938 = vmatprep.mubr.f32.mxu0 %v10023_v4 }
 0x1be   : > { %6232 = vmatpush3.bf16.msra.mxu1 %v10018_v0  ;;  %6424 = vmatpush3.bf16.msra.mxu0 %v10020_v58  ;;  %v10056_v0 = vld [vmem:[#allocation150_spill] sm:$0xff]  ;;  %v10057_v58 = vld [vmem:[#allocation152_spill] sm:$0xff] }
 0x1bf   : > { %6234 = vmatprep.subr.bf16.mxu1 %v10024_v19  ;;  %6426 = vmatprep.subr.bf16.mxu0 %v10026_v33 }
 0x1c0   : > { %5459 = vmatmul.mubr.f32.gmra.mrb[14].mxu1 %v10025_v44  ;;  %5939 = vmatmul.mubr.f32.gmra.mrb[14].mxu0 %v10027_v50 }
 0x1c1   : > { %5461 = vmatprep.mubr.f32.mxu1 %v10028_v39  ;;  %5941 = vmatprep.mubr.f32.mxu0 %v10029_v41 }
 0x1c2   : > { %6236 = vmatpush3.bf16.msra.mxu1 %v10024_v19  ;;  %6428 = vmatpush3.bf16.msra.mxu0 %v10026_v33  ;;  %v10058_v19 = vld [vmem:[#allocation153_spill] sm:$0xff]  ;;  %v10059_v33 = vld [vmem:[#allocation155_spill] sm:$0xff] }
 0x1c4   : > { %5462 = vmatmul.mubr.f32.gmra.mrb[16].mxu1 %v10030_v7  ;;  %5942 = vmatmul.mubr.f32.gmra.mrb[16].mxu0 %v10031_v35 }
 0x1c5   : > { %5464 = vmatprep.mubr.f32.mxu1 %v10032_v49  ;;  %5944 = vmatprep.mubr.f32.mxu0 %v10033_v45 }
 0x1c8   : > { %5465 = vmatmul.mubr.f32.gmra.mrb[18].mxu1 %v10034_v20  ;;  %5945 = vmatmul.mubr.f32.gmra.mrb[18].mxu0 %v10035_v26 }
 0x1c9   : > { %5467 = vmatprep.mubr.f32.mxu1 %v10036_v54  ;;  %5947 = vmatprep.mubr.f32.mxu0 %v10037_v13 }
 0x1cc   : > { %5468 = vmatmul.mubr.f32.gmra.mrb[20].mxu1 %v10038_v28  ;;  %5948 = vmatmul.mubr.f32.gmra.mrb[20].mxu0 %v10039_v2 }
 0x1cd   : > { %5470 = vmatprep.mubr.f32.mxu1 %v10040_v53  ;;  %5950 = vmatprep.mubr.f32.mxu0 %v10041_v47 }
 0x1d0   : > { %5471 = vmatmul.mubr.f32.gmra.mrb[22].mxu1 %v10042_v14  ;;  %5951 = vmatmul.mubr.f32.gmra.mrb[22].mxu0 %v10043_v17 }
 0x1d1   : > { %5473 = vmatprep.mubr.f32.mxu1 %v10044_v62  ;;  %5953 = vmatprep.mubr.f32.mxu0 %v10045_v55 }
 0x1d4   : > { %5474 = vmatmul.mubr.f32.gmra.mrb[24].mxu1 %v10046_v18  ;;  %5954 = vmatmul.mubr.f32.gmra.mrb[24].mxu0 %v10047_v40 }
 0x1d5   : > { %5476 = vmatprep.mubr.f32.mxu1 %v10048_v59  ;;  %5956 = vmatprep.mubr.f32.mxu0 %v10049_v22 }
 0x1d8   : > { %5477 = vmatmul.mubr.f32.gmra.mrb[26].mxu1 %v10050_v46  ;;  %5957 = vmatmul.mubr.f32.gmra.mrb[26].mxu0 %v10051_v12 }
 0x1d9   : > { %5479 = vmatprep.mubr.f32.mxu1 %v10052_v1  ;;  %5959 = vmatprep.mubr.f32.mxu0 %v10053_v8 }
 0x1dc   : > { %5480 = vmatmul.mubr.f32.gmra.mrb[28].mxu1 %v10054_v32  ;;  %5960 = vmatmul.mubr.f32.gmra.mrb[28].mxu0 %v10055_v63 }
 0x1dd   : > { %5482 = vmatprep.mubr.f32.mxu1 %v10056_v0  ;;  %5962 = vmatprep.mubr.f32.mxu0 %v10057_v58 }
 0x1e0   : > { %5483 = vmatmul.mubr.f32.gmra.mrb[30].mxu1 %v10058_v19  ;;  %5963 = vmatmul.mubr.f32.gmra.mrb[30].mxu0 %v10059_v33 }
 0x1e1   : > { %5517 = vmatprep.mubr.f32.mxu1 %v9982_v61  ;;  %5997 = vmatprep.mubr.f32.mxu0 %v9983_v6 }
 0x1e4   : > { %5518 = vmatmul.mubr.f32.vlgmr.msra.gmra.mrb[0].mxu1 %v9984_v51  ;;  %5998 = vmatmul.mubr.f32.vlgmr.msra.gmra.mrb[0].mxu0 %v9985_v23  ;;  %v8973_v51 = vstv %s4333_s20 }
 0x1e5   : > { %5520 = vmatprep.mubr.f32.mxu1 %v9986_v15  ;;  %6000 = vmatprep.mubr.f32.mxu0 %v9987_v36 }
 0x1e8   : > { %5521 = vmatmul.mubr.f32.gmra.mrb[2].mxu1 %v9989_v57  ;;  %6001 = vmatmul.mubr.f32.gmra.mrb[2].mxu0 %v9991_v37 }
 0x1e9   : > { %5523 = vmatprep.mubr.f32.mxu1 %v9992_v3  ;;  %6003 = vmatprep.mubr.f32.mxu0 %v9993_v38 }
 0x1ec   : > { %5524 = vmatmul.mubr.f32.gmra.mrb[4].mxu1 %v9995_v48  ;;  %6004 = vmatmul.mubr.f32.gmra.mrb[4].mxu0 %v9997_v10 }
 0x1ed   : > { %5526 = vmatprep.mubr.f32.mxu1 %v9998_v21  ;;  %6006 = vmatprep.mubr.f32.mxu0 %v9999_v11 }
 0x1f0   : > { %5527 = vmatmul.mubr.f32.gmra.mrb[6].mxu1 %v10001_v34  ;;  %6007 = vmatmul.mubr.f32.gmra.mrb[6].mxu0 %v10003_v56 }
 0x1f1   : > { %5529 = vmatprep.mubr.f32.mxu1 %v10004_v5  ;;  %6009 = vmatprep.mubr.f32.mxu0 %v10005_v52 }
 0x1f4   : > { %5530 = vmatmul.mubr.f32.gmra.mrb[8].mxu1 %v10007_v29  ;;  %6010 = vmatmul.mubr.f32.gmra.mrb[8].mxu0 %v10009_v43 }
 0x1f5   : > { %5532 = vmatprep.mubr.f32.mxu1 %v10010_v27  ;;  %6012 = vmatprep.mubr.f32.mxu0 %v10011_v60 }
 0x1f8   : > { %5533 = vmatmul.mubr.f32.gmra.mrb[10].mxu1 %v10013_v9  ;;  %6013 = vmatmul.mubr.f32.gmra.mrb[10].mxu0 %v10015_v30 }
 0x1f9   : > { %5535 = vmatprep.mubr.f32.mxu1 %v10016_v31  ;;  %6015 = vmatprep.mubr.f32.mxu0 %v10017_v42 }
 0x1fc   : > { %5536 = vmatmul.mubr.f32.gmra.mrb[12].mxu1 %v10019_v24  ;;  %6016 = vmatmul.mubr.f32.gmra.mrb[12].mxu0 %v10021_v16 }
 0x1fd   : > { %5538 = vmatprep.mubr.f32.mxu1 %v10022_v25  ;;  %6018 = vmatprep.mubr.f32.mxu0 %v10023_v4 }
 0x200   : > { %5539 = vmatmul.mubr.f32.gmra.mrb[14].mxu1 %v10025_v44  ;;  %6019 = vmatmul.mubr.f32.gmra.mrb[14].mxu0 %v10027_v50 }
 0x201   : > { %5541 = vmatprep.mubr.f32.mxu1 %v10028_v39  ;;  %6021 = vmatprep.mubr.f32.mxu0 %v10029_v41 }
 0x204   : > { %5542 = vmatmul.mubr.f32.gmra.mrb[16].mxu1 %v10030_v7  ;;  %6022 = vmatmul.mubr.f32.gmra.mrb[16].mxu0 %v10031_v35 }
 0x205   : > { %5544 = vmatprep.mubr.f32.mxu1 %v10032_v49  ;;  %6024 = vmatprep.mubr.f32.mxu0 %v10033_v45 }
 0x208   : > { %5545 = vmatmul.mubr.f32.gmra.mrb[18].mxu1 %v10034_v20  ;;  %6025 = vmatmul.mubr.f32.gmra.mrb[18].mxu0 %v10035_v26 }
 0x209   : > { %5547 = vmatprep.mubr.f32.mxu1 %v10036_v54  ;;  %6027 = vmatprep.mubr.f32.mxu0 %v10037_v13 }
 0x20c   : > { %5548 = vmatmul.mubr.f32.gmra.mrb[20].mxu1 %v10038_v28  ;;  %6028 = vmatmul.mubr.f32.gmra.mrb[20].mxu0 %v10039_v2 }
 0x20d   : > { %5550 = vmatprep.mubr.f32.mxu1 %v10040_v53  ;;  %6030 = vmatprep.mubr.f32.mxu0 %v10041_v47 }
 0x210   : > { %5551 = vmatmul.mubr.f32.gmra.mrb[22].mxu1 %v10042_v14  ;;  %6031 = vmatmul.mubr.f32.gmra.mrb[22].mxu0 %v10043_v17 }
 0x211   : > { %5553 = vmatprep.mubr.f32.mxu1 %v10044_v62  ;;  %6033 = vmatprep.mubr.f32.mxu0 %v10045_v55 }
 0x214   : > { %5554 = vmatmul.mubr.f32.gmra.mrb[24].mxu1 %v10046_v18  ;;  %6034 = vmatmul.mubr.f32.gmra.mrb[24].mxu0 %v10047_v40 }
 0x215   : > { %5556 = vmatprep.mubr.f32.mxu1 %v10048_v59  ;;  %6036 = vmatprep.mubr.f32.mxu0 %v10049_v22 }
 0x218   : > { %5557 = vmatmul.mubr.f32.gmra.mrb[26].mxu1 %v10050_v46  ;;  %6037 = vmatmul.mubr.f32.gmra.mrb[26].mxu0 %v10051_v12 }
 0x219   : > { %5559 = vmatprep.mubr.f32.mxu1 %v10052_v1  ;;  %6039 = vmatprep.mubr.f32.mxu0 %v10053_v8 }
 0x21c   : > { %5560 = vmatmul.mubr.f32.gmra.mrb[28].mxu1 %v10054_v32  ;;  %6040 = vmatmul.mubr.f32.gmra.mrb[28].mxu0 %v10055_v63 }
 0x21d   : > { %5562 = vmatprep.mubr.f32.mxu1 %v10056_v0  ;;  %6042 = vmatprep.mubr.f32.mxu0 %v10057_v58 }
 0x220   : > { %5563 = vmatmul.mubr.f32.gmra.mrb[30].mxu1 %v10058_v19  ;;  %6043 = vmatmul.mubr.f32.gmra.mrb[30].mxu0 %v10059_v33 }
 0x2b7   : > { %v5519_v61 = vpop.f32.mrb[0].mxu1  ;;  %v5999_v6 = vpop.f32.mrb[0].mxu0 }
 0x2b8   : > { %v2169_v23 = vpop.f32.mrb[1].mxu1  ;;  %v6429_v15 = vadd.f32 %v5999_v6, %v5519_v61  ;;  %v4143_v36 = vpop.f32.mrb[1].mxu0 }
 0x2b9   : > { %v6430_v57 = vadd.f32 %v4143_v36, %v2169_v23 }
 0x2ba   : > { %v4336_v37 = vadd.f32 %v6429_v15, %v8973_v51 }
 0x2bb   : > { %v5522_v3 = vpop.f32.mrb[2].mxu1  ;;  %v4335_v38 = vadd.f32 %v6430_v57, %v8973_v51  ;;  %v6002_v48 = vpop.f32.mrb[2].mxu0 }
 0x2bc   : > { %v2181_v10 = vpop.f32.mrb[3].mxu1  ;;  %4369 = vst.msk [vmem:[%s8978_s7 + $0x8] sm:$0xff] %vm4367_vm0, %v4336_v37  ;;  %v6431_v21 = vadd.f32 %v6002_v48, %v5522_v3  ;;  %v4155_v11 = vpop.f32.mrb[3].mxu0 }
 0x2bd   : > { %4368 = vst.msk [vmem:[%s8978_s7] sm:$0xff] %vm4367_vm0, %v4335_v38  ;;  %v6432_v34 = vadd.f32 %v4155_v11, %v2181_v10 }
 0x2be   : > { %v4338_v56 = vadd.f32 %v6431_v21, %v8973_v51 }
 0x2bf   : > { %v5525_v5 = vpop.f32.mrb[4].mxu1  ;;  %v4337_v52 = vadd.f32 %v6432_v34, %v8973_v51  ;;  %v6005_v29 = vpop.f32.mrb[4].mxu0 }
 0x2c0   : > { %v2193_v43 = vpop.f32.mrb[5].mxu1  ;;  %4371 = vst.msk [vmem:[%s8978_s7 + $0x18] sm:$0xff] %vm4367_vm0, %v4338_v56  ;;  %v6433_v27 = vadd.f32 %v6005_v29, %v5525_v5  ;;  %v4167_v60 = vpop.f32.mrb[5].mxu0 }
 0x2c1   : > { %4370 = vst.msk [vmem:[%s8978_s7 + $0x10] sm:$0xff] %vm4367_vm0, %v4337_v52  ;;  %v6434_v9 = vadd.f32 %v4167_v60, %v2193_v43 }
 0x2c2   : > { %v4340_v30 = vadd.f32 %v6433_v27, %v8973_v51 }
 0x2c3   : > { %v5528_v31 = vpop.f32.mrb[6].mxu1  ;;  %v4339_v42 = vadd.f32 %v6434_v9, %v8973_v51  ;;  %v6008_v24 = vpop.f32.mrb[6].mxu0 }
 0x2c4   : > { %v2205_v16 = vpop.f32.mrb[7].mxu1  ;;  %4373 = vst.msk [vmem:[%s8978_s7 + $0x28] sm:$0xff] %vm4367_vm0, %v4340_v30  ;;  %v6435_v25 = vadd.f32 %v6008_v24, %v5528_v31  ;;  %v4179_v4 = vpop.f32.mrb[7].mxu0 }
 0x2c5   : > { %4372 = vst.msk [vmem:[%s8978_s7 + $0x20] sm:$0xff] %vm4367_vm0, %v4339_v42  ;;  %v6436_v44 = vadd.f32 %v4179_v4, %v2205_v16 }
 0x2c6   : > { %v4342_v50 = vadd.f32 %v6435_v25, %v8973_v51 }
 0x2c7   : > { %v5531_v39 = vpop.f32.mrb[8].mxu1  ;;  %v4341_v41 = vadd.f32 %v6436_v44, %v8973_v51  ;;  %v6011_v7 = vpop.f32.mrb[8].mxu0 }
 0x2c8   : > { %v2217_v35 = vpop.f32.mrb[9].mxu1  ;;  %4375 = vst.msk [vmem:[%s8978_s7 + $0x38] sm:$0xff] %vm4367_vm0, %v4342_v50  ;;  %v6437_v49 = vadd.f32 %v6011_v7, %v5531_v39  ;;  %v4191_v45 = vpop.f32.mrb[9].mxu0 }
 0x2c9   : > { %4374 = vst.msk [vmem:[%s8978_s7 + $0x30] sm:$0xff] %vm4367_vm0, %v4341_v41  ;;  %v6438_v20 = vadd.f32 %v4191_v45, %v2217_v35 }
 0x2ca   : > { %v4344_v26 = vadd.f32 %v6437_v49, %v8973_v51 }
 0x2cb   : > { %v5534_v54 = vpop.f32.mrb[10].mxu1  ;;  %v4343_v13 = vadd.f32 %v6438_v20, %v8973_v51  ;;  %v6014_v28 = vpop.f32.mrb[10].mxu0 }
 0x2cc   : > { %v2229_v2 = vpop.f32.mrb[11].mxu1  ;;  %4377 = vst.msk [vmem:[%s8978_s7 + $0x48] sm:$0xff] %vm4367_vm0, %v4344_v26  ;;  %v6439_v53 = vadd.f32 %v6014_v28, %v5534_v54  ;;  %v4203_v47 = vpop.f32.mrb[11].mxu0 }
 0x2cd   : > { %4376 = vst.msk [vmem:[%s8978_s7 + $0x40] sm:$0xff] %vm4367_vm0, %v4343_v13  ;;  %v6440_v14 = vadd.f32 %v4203_v47, %v2229_v2 }
 0x2ce   : > { %v4346_v17 = vadd.f32 %v6439_v53, %v8973_v51 }
 0x2cf   : > { %v5537_v62 = vpop.f32.mrb[12].mxu1  ;;  %v4345_v55 = vadd.f32 %v6440_v14, %v8973_v51  ;;  %v6017_v18 = vpop.f32.mrb[12].mxu0 }
 0x2d0   : > { %v2241_v40 = vpop.f32.mrb[13].mxu1  ;;  %4379 = vst.msk [vmem:[%s8978_s7 + $0x58] sm:$0xff] %vm4367_vm0, %v4346_v17  ;;  %v6441_v59 = vadd.f32 %v6017_v18, %v5537_v62  ;;  %v4215_v22 = vpop.f32.mrb[13].mxu0 }
 0x2d1   : > { %4378 = vst.msk [vmem:[%s8978_s7 + $0x50] sm:$0xff] %vm4367_vm0, %v4345_v55  ;;  %v6442_v46 = vadd.f32 %v4215_v22, %v2241_v40 }
 0x2d2   : > { %v4348_v12 = vadd.f32 %v6441_v59, %v8973_v51 }
 0x2d3   : > { %v5540_v1 = vpop.f32.mrb[14].mxu1  ;;  %v4347_v8 = vadd.f32 %v6442_v46, %v8973_v51  ;;  %v6020_v32 = vpop.f32.mrb[14].mxu0 }
 0x2d4   : > { %v2253_v63 = vpop.f32.mrb[15].mxu1  ;;  %4381 = vst.msk [vmem:[%s8978_s7 + $0x68] sm:$0xff] %vm4367_vm0, %v4348_v12  ;;  %v6443_v0 = vadd.f32 %v6020_v32, %v5540_v1  ;;  %v4227_v58 = vpop.f32.mrb[15].mxu0 }
 0x2d5   : > { %4380 = vst.msk [vmem:[%s8978_s7 + $0x60] sm:$0xff] %vm4367_vm0, %v4347_v8  ;;  %v6444_v19 = vadd.f32 %v4227_v58, %v2253_v63 }
 0x2d6   : > { %v4350_v33 = vadd.f32 %v6443_v0, %v8973_v51 }
 0x2d7   : > { %v5543_v61 = vpop.f32.mrb[16].mxu1  ;;  %v4349_v6 = vadd.f32 %v6444_v19, %v8973_v51  ;;  %v6023_v23 = vpop.f32.mrb[16].mxu0 }
 0x2d8   : > { %v2265_v15 = vpop.f32.mrb[17].mxu1  ;;  %4383 = vst.msk [vmem:[%s8978_s7 + $0x78] sm:$0xff] %vm4367_vm0, %v4350_v33  ;;  %v6445_v36 = vadd.f32 %v6023_v23, %v5543_v61  ;;  %v4239_v57 = vpop.f32.mrb[17].mxu0 }
 0x2d9   : > { %4382 = vst.msk [vmem:[%s8978_s7 + $0x70] sm:$0xff] %vm4367_vm0, %v4349_v6  ;;  %v6446_v37 = vadd.f32 %v4239_v57, %v2265_v15 }
 0x2da   : > { %v4352_v3 = vadd.f32 %v6445_v36, %v8973_v51 }
 0x2db   : > { %v5546_v38 = vpop.f32.mrb[18].mxu1  ;;  %v4351_v48 = vadd.f32 %v6446_v37, %v8973_v51  ;;  %v6026_v10 = vpop.f32.mrb[18].mxu0 }
 0x2dc   : > { %v2277_v21 = vpop.f32.mrb[19].mxu1  ;;  %4385 = vst.msk [vmem:[%s8978_s7 + $0x88] sm:$0xff] %vm4367_vm0, %v4352_v3  ;;  %v6447_v11 = vadd.f32 %v6026_v10, %v5546_v38  ;;  %v4251_v34 = vpop.f32.mrb[19].mxu0 }
 0x2dd   : > { %4384 = vst.msk [vmem:[%s8978_s7 + $0x80] sm:$0xff] %vm4367_vm0, %v4351_v48  ;;  %v6448_v56 = vadd.f32 %v4251_v34, %v2277_v21 }
 0x2de   : > { %v4354_v5 = vadd.f32 %v6447_v11, %v8973_v51 }
 0x2df   : > { %v5549_v52 = vpop.f32.mrb[20].mxu1  ;;  %v4353_v29 = vadd.f32 %v6448_v56, %v8973_v51  ;;  %v6029_v43 = vpop.f32.mrb[20].mxu0 }
 0x2e0   : > { %v2289_v27 = vpop.f32.mrb[21].mxu1  ;;  %4387 = vst.msk [vmem:[%s8978_s7 + $0x98] sm:$0xff] %vm4367_vm0, %v4354_v5  ;;  %v6449_v60 = vadd.f32 %v6029_v43, %v5549_v52  ;;  %v4263_v9 = vpop.f32.mrb[21].mxu0 }
 0x2e1   : > { %4386 = vst.msk [vmem:[%s8978_s7 + $0x90] sm:$0xff] %vm4367_vm0, %v4353_v29  ;;  %v6450_v30 = vadd.f32 %v4263_v9, %v2289_v27 }
 0x2e2   : > { %v4356_v31 = vadd.f32 %v6449_v60, %v8973_v51 }
 0x2e3   : > { %v5552_v42 = vpop.f32.mrb[22].mxu1  ;;  %v4355_v24 = vadd.f32 %v6450_v30, %v8973_v51  ;;  %v6032_v16 = vpop.f32.mrb[22].mxu0 }
 0x2e4   : > { %v2301_v25 = vpop.f32.mrb[23].mxu1  ;;  %4389 = vst.msk [vmem:[%s8978_s7 + $0xa8] sm:$0xff] %vm4367_vm0, %v4356_v31  ;;  %v6451_v4 = vadd.f32 %v6032_v16, %v5552_v42  ;;  %v4275_v44 = vpop.f32.mrb[23].mxu0 }
 0x2e5   : > { %4388 = vst.msk [vmem:[%s8978_s7 + $0xa0] sm:$0xff] %vm4367_vm0, %v4355_v24  ;;  %v6452_v50 = vadd.f32 %v4275_v44, %v2301_v25 }
 0x2e6   : > { %v4358_v39 = vadd.f32 %v6451_v4, %v8973_v51 }
 0x2e7   : > { %v5555_v41 = vpop.f32.mrb[24].mxu1  ;;  %v4357_v7 = vadd.f32 %v6452_v50, %v8973_v51  ;;  %v6035_v35 = vpop.f32.mrb[24].mxu0 }
 0x2e8   : > { %v2313_v49 = vpop.f32.mrb[25].mxu1  ;;  %4391 = vst.msk [vmem:[%s8978_s7 + $0xb8] sm:$0xff] %vm4367_vm0, %v4358_v39  ;;  %v6453_v45 = vadd.f32 %v6035_v35, %v5555_v41  ;;  %v4287_v20 = vpop.f32.mrb[25].mxu0 }
 0x2e9   : > { %4390 = vst.msk [vmem:[%s8978_s7 + $0xb0] sm:$0xff] %vm4367_vm0, %v4357_v7  ;;  %v6454_v26 = vadd.f32 %v4287_v20, %v2313_v49 }
 0x2ea   : > { %v4360_v54 = vadd.f32 %v6453_v45, %v8973_v51 }
 0x2eb   : > { %v5558_v13 = vpop.f32.mrb[26].mxu1  ;;  %v4359_v28 = vadd.f32 %v6454_v26, %v8973_v51  ;;  %v6038_v2 = vpop.f32.mrb[26].mxu0 }
 0x2ec   : > { %v2325_v53 = vpop.f32.mrb[27].mxu1  ;;  %4393 = vst.msk [vmem:[%s8978_s7 + $0xc8] sm:$0xff] %vm4367_vm0, %v4360_v54  ;;  %v6455_v47 = vadd.f32 %v6038_v2, %v5558_v13  ;;  %v4299_v14 = vpop.f32.mrb[27].mxu0 }
 0x2ed   : > { %4392 = vst.msk [vmem:[%s8978_s7 + $0xc0] sm:$0xff] %vm4367_vm0, %v4359_v28  ;;  %v6456_v17 = vadd.f32 %v4299_v14, %v2325_v53 }
 0x2ee   : > { %v4362_v62 = vadd.f32 %v6455_v47, %v8973_v51 }
 0x2ef   : > { %v5561_v55 = vpop.f32.mrb[28].mxu1  ;;  %v4361_v18 = vadd.f32 %v6456_v17, %v8973_v51  ;;  %v6041_v40 = vpop.f32.mrb[28].mxu0 }
 0x2f0   : > { %v2337_v59 = vpop.f32.mrb[29].mxu1  ;;  %4395 = vst.msk [vmem:[%s8978_s7 + $0xd8] sm:$0xff] %vm4367_vm0, %v4362_v62  ;;  %v6457_v22 = vadd.f32 %v6041_v40, %v5561_v55  ;;  %v4311_v46 = vpop.f32.mrb[29].mxu0 }
 0x2f1   : > { %4394 = vst.msk [vmem:[%s8978_s7 + $0xd0] sm:$0xff] %vm4367_vm0, %v4361_v18  ;;  %v6458_v12 = vadd.f32 %v4311_v46, %v2337_v59 }
 0x2f2   : > { %v4364_v1 = vadd.f32 %v6457_v22, %v8973_v51 }
 0x2f3   : > { %v5564_v8 = vpop.f32.mrb[30].mxu1  ;;  %v4363_v32 = vadd.f32 %v6458_v12, %v8973_v51  ;;  %v6044_v63 = vpop.f32.mrb[30].mxu0 }
 0x2f4   : > { %v2349_v0 = vpop.f32.mrb[31].mxu1  ;;  %4397 = vst.msk [vmem:[%s8978_s7 + $0xe8] sm:$0xff] %vm4367_vm0, %v4364_v1  ;;  %v6459_v58 = vadd.f32 %v6044_v63, %v5564_v8  ;;  %v4323_v19 = vpop.f32.mrb[31].mxu0 }
 0x2f5   : > { %4396 = vst.msk [vmem:[%s8978_s7 + $0xe0] sm:$0xff] %vm4367_vm0, %v4363_v32  ;;  %v6460_v33 = vadd.f32 %v4323_v19, %v2349_v0 }
 0x2f6   : > { %v4366_v61 = vadd.f32 %v6459_v58, %v8973_v51 }
 0x2f7   : > { %v4365_v6 = vadd.f32 %v6460_v33, %v8973_v51 }
 0x2f8   : > { %4399 = vst.msk [vmem:[%s8978_s7 + $0xf8] sm:$0xff] %vm4367_vm0, %v4366_v61 }
 0x2f9   : > { %4398 = vst.msk [vmem:[%s8978_s7 + $0xf0] sm:$0xff] %vm4367_vm0, %v4365_v6 }
 0x2fa PF: > { %p19_p11 = scmp.ge.s32.totalorder %s6992_s24, 10   ;;  %s10060_s20 = smov %s6925_s21 }
 0x2fb   : > { %s10061_s21 = smov %s6929_s22  ;;  %s10062_s22 = smov %s7002_s27 }
 0x2fc   : > { %s10063_s23 = smov %s6992_s24  ;;  %21 = sbr.rel (!%p19_p11) target bundleno = 7 (0x7), region = 93 }
 0x303   :  { %4422 = vsyncpa [#allocation4], 1 }
 0x304   :  { %4424 = vsyncpa [#allocation4 + $0x1], 1 }
 0x305   :  { %4425 = vsyncpa [#allocation6], 1 }
 0x306   :  { %4427 = vsyncpa [#allocation6 + $0x1], 1 }

</bundles_post_ra>
